<compile_context>
chip_gen: v5e
topology: v5e:2x2
jax: 0.10.0
libtpu: 0.0.40
codegen_flags: <defaults>
</compile_context>

<pallas_src>
import jax
import jax.numpy as jnp
from jax import lax
from jax.experimental import pallas as pl
from jax.experimental.pallas import tpu as pltpu

# ----------------------------- geometry constants ----------------------------
H = W = 28          # input spatial dims (fixed by fc1 = 8*12*12)
P = H * W           # 784 flattened grid positions
LX = 1024           # padded flat input length   (needs >= 848 + 87)
W1 = 848            # conv1 activation width     (needs >= 816 + 29)
W2 = 816            # conv2 activation width     (needs >= 784 + 29)
C1, C2 = 16, 8      # conv channel counts
FC1 = 128           # fc1 width
NCLS = 26           # real number of classes (fc2 padded to 128 lanes)


# ------------------------------- fused kernel --------------------------------
def _cnn_fused_kernel(x_ref, w1_ref, b1_ref, w2_ref, b2_ref,
                      fw1_ref, fb1_ref, fw2_ref, fb2_ref,
                      o_ref, y1_s, y2_s):
    # ---- conv1 (1->16, k=4) on the flat grid, channel-major [16, W1] -------
    # tap (di, dj) of the 4x4 kernel is a constant lane offset di*28 + dj.
    xv = x_ref[0]                                   # [1, LX]
    w1v = w1_ref[...]                               # [16, 16]  (out_ch, tap)
    y1 = jnp.zeros((C1, W1), jnp.float32)
    for di in range(4):
        for dj in range(4):
            t = di * 4 + dj
            off = di * W + dj
            y1 = y1 + w1v[:, t:t + 1] * xv[:, off:off + W1]
    y1 = jnp.maximum(y1 + b1_ref[...], 0.0)
    y1_s[...] = y1                                  # VMEM scratch [16, W1]

    # ---- conv2 (16->8, k=2): 4 shifted MXU matmuls [8,16] @ [16,W2] ---------
    y2 = jnp.zeros((C2, W2), jnp.float32)
    for di in range(2):
        for dj in range(2):
            t = di * 2 + dj
            off = di * W + dj
            y2 = y2 + jnp.dot(w2_ref[t], y1_s[:, off:off + W2],
                              preferred_element_type=jnp.float32)
    y2 = jnp.maximum(y2 + b2_ref[...], 0.0)
    y2_s[...] = y2                                  # VMEM scratch [8, W2]

    # ---- 2x2 / stride-2 max pool: taps {0, 1, 28, 29} on the flat grid -----
    pool = jnp.maximum(
        jnp.maximum(y2_s[:, 0:P], y2_s[:, 1:P + 1]),
        jnp.maximum(y2_s[:, W:W + P], y2_s[:, W + 1:W + 1 + P]))   # [8, 784]

    # ---- fc1: stride-2 selection + NCHW flatten folded into fw1_ref --------
    # fw1_ref[p, c*128 + o] is zero at invalid grid positions p, so garbage
    # (but finite) pool lanes contribute nothing.
    yp = jnp.dot(pool, fw1_ref[...],
                 preferred_element_type=jnp.float32)               # [8, 1024]
    h = fb1_ref[...]                                               # [1, 128]
    for c in range(C2):
        h = h + yp[c:c + 1, c * FC1:(c + 1) * FC1]

    # ---- fc2 (padded to 128 output lanes -> dense, unmasked store) ---------
    out = jnp.dot(h, fw2_ref[...],
                  preferred_element_type=jnp.float32) + fb2_ref[...]
    o_ref[0] = out


# ------------------------- one-time weight repacking --------------------------
def prepare_params(params):
    """Repack PyTorch-layout params into kernel layouts (call once, hoisted)."""
    w1, b1, w2, b2, fw1, fb1, fw2, fb2 = params
    w1c = w1.reshape(C1, 16).astype(jnp.float32)                  # [oc, di*4+dj]
    b1c = b1.reshape(C1, 1).astype(jnp.float32)
    w2t = jnp.transpose(w2, (2, 3, 0, 1)).reshape(4, C2, C1)      # [tap, oc, ic]
    w2t = w2t.astype(jnp.float32)
    b2c = b2.reshape(C2, 1).astype(jnp.float32)

    # fc1 weight: zero-expanded over the 784 flat-grid positions; column block
    # c*128+o holds fw1[o, c*144 + i*12 + j] at row p = 56*i + 2*j.
    src = jnp.transpose(fw1.reshape(FC1, C2, 12, 12), (2, 3, 1, 0))
    src = src.reshape(144, C2 * FC1).astype(jnp.float32)          # [144, 1024]
    rows = (56 * jnp.arange(12)[:, None] + 2 * jnp.arange(12)[None, :]).reshape(144)
    fw1w = jnp.zeros((P, C2 * FC1), jnp.float32).at[rows].set(src)

    fb1r = fb1.reshape(1, FC1).astype(jnp.float32)
    fw2p = jnp.zeros((FC1, FC1), jnp.float32).at[:, :NCLS].set(fw2.T)
    fb2p = jnp.zeros((1, FC1), jnp.float32).at[:, :NCLS].set(fb2.reshape(1, NCLS))
    return (w1c, b1c, w2t, b2c, fw1w, fb1r, fw2p, fb2p)


# --------------------------------- forward ------------------------------------
@jax.jit
def cnn_forward(x_nchw, packed):
    w1c, b1c, w2t, b2c, fw1w, fb1r, fw2p, fb2p = packed
    B = x_nchw.shape[0]
    assert x_nchw.shape[1:] == (1, H, W)

    xpad = jnp.pad(x_nchw.reshape(B, P), ((0, 0), (0, LX - P))).reshape(B, 1, LX)

    out = pl.pallas_call(
        _cnn_fused_kernel,
        out_shape=jax.ShapeDtypeStruct((B, 1, FC1), jnp.float32),
        grid=(B,),
        in_specs=[
            pl.BlockSpec((1, 1, LX), lambda b: (b, 0, 0)),        # image row
            pl.BlockSpec((C1, 16), lambda b: (0, 0)),             # conv1 w
            pl.BlockSpec((C1, 1), lambda b: (0, 0)),              # conv1 b
            pl.BlockSpec((4, C2, C1), lambda b: (0, 0, 0)),       # conv2 w taps
            pl.BlockSpec((C2, 1), lambda b: (0, 0)),              # conv2 b
            pl.BlockSpec((P, C2 * FC1), lambda b: (0, 0)),        # fc1 w (expanded)
            pl.BlockSpec((1, FC1), lambda b: (0, 0)),             # fc1 b
            pl.BlockSpec((FC1, FC1), lambda b: (0, 0)),           # fc2 w (padded)
            pl.BlockSpec((1, FC1), lambda b: (0, 0)),             # fc2 b (padded)
        ],
        out_specs=pl.BlockSpec((1, 1, FC1), lambda b: (b, 0, 0)),
        scratch_shapes=[pltpu.VMEM((C1, W1), jnp.float32),
                        pltpu.VMEM((C2, W2), jnp.float32)],
        compiler_params=pltpu.CompilerParams(
            dimension_semantics=("parallel",)),
    )(xpad, w1c, b1c, w2t, b2c, fw1w, fb1r, fw2p, fb2p)

    return out.reshape(B, FC1)[:, :NCLS]


# ------------------------- pure-JAX reference check ---------------------------
def ref_forward(x, params):
    w1, b1, w2, b2, fw1, fb1, fw2, fb2 = params
    dn = ("NCHW", "OIHW", "NCHW")
    y = lax.conv_general_dilated(x, w1, (1, 1), "VALID", dimension_numbers=dn)
    y = jnp.maximum(y + b1[None, :, None, None], 0.0)
    y = lax.conv_general_dilated(y, w2, (1, 1), "VALID", dimension_numbers=dn)
    y = jnp.maximum(y + b2[None, :, None, None], 0.0)
    B = x.shape[0]
    y = y.reshape(B, 8, 12, 2, 12, 2).max(axis=(3, 5)).reshape(B, -1)
    y = y @ fw1.T + fb1
    y = y @ fw2.T + fb2
    return y


# ---------------------------------- main ---------------------------------------
def init_params(key):
    ks = jax.random.split(key, 8)
    w1 = jax.random.normal(ks[0], (16, 1, 4, 4), jnp.float32) * 0.1
    b1 = jax.random.normal(ks[1], (16,), jnp.float32) * 0.1
    w2 = jax.random.normal(ks[2], (8, 16, 2, 2), jnp.float32) * 0.1
    b2 = jax.random.normal(ks[3], (8,), jnp.float32) * 0.1
    fw1 = jax.random.normal(ks[4], (128, 8 * 12 * 12), jnp.float32) * 0.02
    fb1 = jax.random.normal(ks[5], (128,), jnp.float32) * 0.02
    fw2 = jax.random.normal(ks[6], (26, 128), jnp.float32) * 0.05
    fb2 = jax.random.normal(ks[7], (26,), jnp.float32) * 0.05
    return (w1, b1, w2, b2, fw1, fb1, fw2, fb2)


if __name__ == "__main__":
    key = jax.random.PRNGKey(0)
    kx, kp = jax.random.split(key)
    # EMNIST-style input: batch=2, 1 channel, 28x28 (required by fc1 = 8*12*12)
    x = jax.random.normal(kx, (2, 1, 28, 28), jnp.float32)
    params = init_params(kp)
    packed = prepare_params(params)          # weight repack hoisted, done once

    out = jax.block_until_ready(cnn_forward(x, packed))
    assert out.shape == (2, 26), out.shape

    ref = jax.block_until_ready(ref_forward(x, params))
    assert jnp.allclose(out, ref, atol=2e-3, rtol=2e-3), (
        "Pallas output mismatch vs reference"
    )

    print("KERNEL_OK")
</pallas_src>

<mosaic_0001>
module attributes {stable_mosaic.version = 11 : i64} {
  func.func @_cnn_fused_kernel(%arg0: i32, %arg1: memref<1x1x1024xf32, #tpu.memory_space<vmem>>, %arg2: memref<16x16xf32, #tpu.memory_space<vmem>>, %arg3: memref<16x1xf32, #tpu.memory_space<vmem>>, %arg4: memref<4x8x16xf32, #tpu.memory_space<vmem>>, %arg5: memref<8x1xf32, #tpu.memory_space<vmem>>, %arg6: memref<784x1024xf32, #tpu.memory_space<vmem>>, %arg7: memref<1x128xf32, #tpu.memory_space<vmem>>, %arg8: memref<128x128xf32, #tpu.memory_space<vmem>>, %arg9: memref<1x128xf32, #tpu.memory_space<vmem>>, %arg10: memref<1x1x128xf32, #tpu.memory_space<vmem>>, %arg11: memref<16x848xf32, #tpu.memory_space<vmem>>, %arg12: memref<8x816xf32, #tpu.memory_space<vmem>>) attributes {dimension_semantics = [#tpu.dimension_semantics<parallel>], iteration_bounds = array<i64: 2>, scalar_prefetch = 0 : i64, scratch_operands = 2 : i64, tpu.core_type = #tpu.core_type<tc>, window_params = [{transform_indices = @transform_0, window_bounds = array<i64: 1, 1, 1024>}, {pipeline_mode = #tpu.pipeline_mode<synchronous>, transform_indices = @transform_1, window_bounds = array<i64: 16, 16>}, {pipeline_mode = #tpu.pipeline_mode<synchronous>, transform_indices = @transform_2, window_bounds = array<i64: 16, 1>}, {pipeline_mode = #tpu.pipeline_mode<synchronous>, transform_indices = @transform_3, window_bounds = array<i64: 4, 8, 16>}, {pipeline_mode = #tpu.pipeline_mode<synchronous>, transform_indices = @transform_4, window_bounds = array<i64: 8, 1>}, {pipeline_mode = #tpu.pipeline_mode<synchronous>, transform_indices = @transform_5, window_bounds = array<i64: 784, 1024>}, {pipeline_mode = #tpu.pipeline_mode<synchronous>, transform_indices = @transform_6, window_bounds = array<i64: 1, 128>}, {pipeline_mode = #tpu.pipeline_mode<synchronous>, transform_indices = @transform_7, window_bounds = array<i64: 128, 128>}, {pipeline_mode = #tpu.pipeline_mode<synchronous>, transform_indices = @transform_8, window_bounds = array<i64: 1, 128>}, {transform_indices = @transform_9, window_bounds = array<i64: 1, 1, 128>}]} {
    %c0 = arith.constant 0 : index
    %c0_0 = arith.constant 0 : index
    %c0_1 = arith.constant 0 : index
    %0 = vector.load %arg1[%c0, %c0_0, %c0_1] : memref<1x1x1024xf32, #tpu.memory_space<vmem>>, vector<1x1x1024xf32>
    %1 = vector.shape_cast %0 : vector<1x1x1024xf32> to vector<1x1024xf32>
    %c0_2 = arith.constant 0 : index
    %c0_3 = arith.constant 0 : index
    %2 = vector.load %arg2[%c0_2, %c0_3] : memref<16x16xf32, #tpu.memory_space<vmem>>, vector<16x16xf32>
    %cst = arith.constant 0.000000e+00 : f32
    %3 = vector.broadcast %cst : f32 to vector<16x848xf32>
    %4 = vector.extract_strided_slice %2 {offsets = [0, 0], sizes = [16, 1], strides = [1, 1]} : vector<16x16xf32> to vector<16x1xf32>
    %5 = vector.extract_strided_slice %1 {offsets = [0, 0], sizes = [1, 848], strides = [1, 1]} : vector<1x1024xf32> to vector<1x848xf32>
    %6 = vector.broadcast %4 : vector<16x1xf32> to vector<16x848xf32>
    %7 = vector.broadcast %5 : vector<1x848xf32> to vector<16x848xf32>
    %8 = arith.mulf %6, %7 : vector<16x848xf32>
    %9 = arith.addf %3, %8 : vector<16x848xf32>
    %10 = vector.extract_strided_slice %2 {offsets = [0, 1], sizes = [16, 1], strides = [1, 1]} : vector<16x16xf32> to vector<16x1xf32>
    %11 = vector.extract_strided_slice %1 {offsets = [0, 1], sizes = [1, 848], strides = [1, 1]} : vector<1x1024xf32> to vector<1x848xf32>
    %12 = vector.broadcast %10 : vector<16x1xf32> to vector<16x848xf32>
    %13 = vector.broadcast %11 : vector<1x848xf32> to vector<16x848xf32>
    %14 = arith.mulf %12, %13 : vector<16x848xf32>
    %15 = arith.addf %9, %14 : vector<16x848xf32>
    %16 = vector.extract_strided_slice %2 {offsets = [0, 2], sizes = [16, 1], strides = [1, 1]} : vector<16x16xf32> to vector<16x1xf32>
    %17 = vector.extract_strided_slice %1 {offsets = [0, 2], sizes = [1, 848], strides = [1, 1]} : vector<1x1024xf32> to vector<1x848xf32>
    %18 = vector.broadcast %16 : vector<16x1xf32> to vector<16x848xf32>
    %19 = vector.broadcast %17 : vector<1x848xf32> to vector<16x848xf32>
    %20 = arith.mulf %18, %19 : vector<16x848xf32>
    %21 = arith.addf %15, %20 : vector<16x848xf32>
    %22 = vector.extract_strided_slice %2 {offsets = [0, 3], sizes = [16, 1], strides = [1, 1]} : vector<16x16xf32> to vector<16x1xf32>
    %23 = vector.extract_strided_slice %1 {offsets = [0, 3], sizes = [1, 848], strides = [1, 1]} : vector<1x1024xf32> to vector<1x848xf32>
    %24 = vector.broadcast %22 : vector<16x1xf32> to vector<16x848xf32>
    %25 = vector.broadcast %23 : vector<1x848xf32> to vector<16x848xf32>
    %26 = arith.mulf %24, %25 : vector<16x848xf32>
    %27 = arith.addf %21, %26 : vector<16x848xf32>
    %28 = vector.extract_strided_slice %2 {offsets = [0, 4], sizes = [16, 1], strides = [1, 1]} : vector<16x16xf32> to vector<16x1xf32>
    %29 = vector.extract_strided_slice %1 {offsets = [0, 28], sizes = [1, 848], strides = [1, 1]} : vector<1x1024xf32> to vector<1x848xf32>
    %30 = vector.broadcast %28 : vector<16x1xf32> to vector<16x848xf32>
    %31 = vector.broadcast %29 : vector<1x848xf32> to vector<16x848xf32>
    %32 = arith.mulf %30, %31 : vector<16x848xf32>
    %33 = arith.addf %27, %32 : vector<16x848xf32>
    %34 = vector.extract_strided_slice %2 {offsets = [0, 5], sizes = [16, 1], strides = [1, 1]} : vector<16x16xf32> to vector<16x1xf32>
    %35 = vector.extract_strided_slice %1 {offsets = [0, 29], sizes = [1, 848], strides = [1, 1]} : vector<1x1024xf32> to vector<1x848xf32>
    %36 = vector.broadcast %34 : vector<16x1xf32> to vector<16x848xf32>
    %37 = vector.broadcast %35 : vector<1x848xf32> to vector<16x848xf32>
    %38 = arith.mulf %36, %37 : vector<16x848xf32>
    %39 = arith.addf %33, %38 : vector<16x848xf32>
    %40 = vector.extract_strided_slice %2 {offsets = [0, 6], sizes = [16, 1], strides = [1, 1]} : vector<16x16xf32> to vector<16x1xf32>
    %41 = vector.extract_strided_slice %1 {offsets = [0, 30], sizes = [1, 848], strides = [1, 1]} : vector<1x1024xf32> to vector<1x848xf32>
    %42 = vector.broadcast %40 : vector<16x1xf32> to vector<16x848xf32>
    %43 = vector.broadcast %41 : vector<1x848xf32> to vector<16x848xf32>
    %44 = arith.mulf %42, %43 : vector<16x848xf32>
    %45 = arith.addf %39, %44 : vector<16x848xf32>
    %46 = vector.extract_strided_slice %2 {offsets = [0, 7], sizes = [16, 1], strides = [1, 1]} : vector<16x16xf32> to vector<16x1xf32>
    %47 = vector.extract_strided_slice %1 {offsets = [0, 31], sizes = [1, 848], strides = [1, 1]} : vector<1x1024xf32> to vector<1x848xf32>
    %48 = vector.broadcast %46 : vector<16x1xf32> to vector<16x848xf32>
    %49 = vector.broadcast %47 : vector<1x848xf32> to vector<16x848xf32>
    %50 = arith.mulf %48, %49 : vector<16x848xf32>
    %51 = arith.addf %45, %50 : vector<16x848xf32>
    %52 = vector.extract_strided_slice %2 {offsets = [0, 8], sizes = [16, 1], strides = [1, 1]} : vector<16x16xf32> to vector<16x1xf32>
    %53 = vector.extract_strided_slice %1 {offsets = [0, 56], sizes = [1, 848], strides = [1, 1]} : vector<1x1024xf32> to vector<1x848xf32>
    %54 = vector.broadcast %52 : vector<16x1xf32> to vector<16x848xf32>
    %55 = vector.broadcast %53 : vector<1x848xf32> to vector<16x848xf32>
    %56 = arith.mulf %54, %55 : vector<16x848xf32>
    %57 = arith.addf %51, %56 : vector<16x848xf32>
    %58 = vector.extract_strided_slice %2 {offsets = [0, 9], sizes = [16, 1], strides = [1, 1]} : vector<16x16xf32> to vector<16x1xf32>
    %59 = vector.extract_strided_slice %1 {offsets = [0, 57], sizes = [1, 848], strides = [1, 1]} : vector<1x1024xf32> to vector<1x848xf32>
    %60 = vector.broadcast %58 : vector<16x1xf32> to vector<16x848xf32>
    %61 = vector.broadcast %59 : vector<1x848xf32> to vector<16x848xf32>
    %62 = arith.mulf %60, %61 : vector<16x848xf32>
    %63 = arith.addf %57, %62 : vector<16x848xf32>
    %64 = vector.extract_strided_slice %2 {offsets = [0, 10], sizes = [16, 1], strides = [1, 1]} : vector<16x16xf32> to vector<16x1xf32>
    %65 = vector.extract_strided_slice %1 {offsets = [0, 58], sizes = [1, 848], strides = [1, 1]} : vector<1x1024xf32> to vector<1x848xf32>
    %66 = vector.broadcast %64 : vector<16x1xf32> to vector<16x848xf32>
    %67 = vector.broadcast %65 : vector<1x848xf32> to vector<16x848xf32>
    %68 = arith.mulf %66, %67 : vector<16x848xf32>
    %69 = arith.addf %63, %68 : vector<16x848xf32>
    %70 = vector.extract_strided_slice %2 {offsets = [0, 11], sizes = [16, 1], strides = [1, 1]} : vector<16x16xf32> to vector<16x1xf32>
    %71 = vector.extract_strided_slice %1 {offsets = [0, 59], sizes = [1, 848], strides = [1, 1]} : vector<1x1024xf32> to vector<1x848xf32>
    %72 = vector.broadcast %70 : vector<16x1xf32> to vector<16x848xf32>
    %73 = vector.broadcast %71 : vector<1x848xf32> to vector<16x848xf32>
    %74 = arith.mulf %72, %73 : vector<16x848xf32>
    %75 = arith.addf %69, %74 : vector<16x848xf32>
    %76 = vector.extract_strided_slice %2 {offsets = [0, 12], sizes = [16, 1], strides = [1, 1]} : vector<16x16xf32> to vector<16x1xf32>
    %77 = vector.extract_strided_slice %1 {offsets = [0, 84], sizes = [1, 848], strides = [1, 1]} : vector<1x1024xf32> to vector<1x848xf32>
    %78 = vector.broadcast %76 : vector<16x1xf32> to vector<16x848xf32>
    %79 = vector.broadcast %77 : vector<1x848xf32> to vector<16x848xf32>
    %80 = arith.mulf %78, %79 : vector<16x848xf32>
    %81 = arith.addf %75, %80 : vector<16x848xf32>
    %82 = vector.extract_strided_slice %2 {offsets = [0, 13], sizes = [16, 1], strides = [1, 1]} : vector<16x16xf32> to vector<16x1xf32>
    %83 = vector.extract_strided_slice %1 {offsets = [0, 85], sizes = [1, 848], strides = [1, 1]} : vector<1x1024xf32> to vector<1x848xf32>
    %84 = vector.broadcast %82 : vector<16x1xf32> to vector<16x848xf32>
    %85 = vector.broadcast %83 : vector<1x848xf32> to vector<16x848xf32>
    %86 = arith.mulf %84, %85 : vector<16x848xf32>
    %87 = arith.addf %81, %86 : vector<16x848xf32>
    %88 = vector.extract_strided_slice %2 {offsets = [0, 14], sizes = [16, 1], strides = [1, 1]} : vector<16x16xf32> to vector<16x1xf32>
    %89 = vector.extract_strided_slice %1 {offsets = [0, 86], sizes = [1, 848], strides = [1, 1]} : vector<1x1024xf32> to vector<1x848xf32>
    %90 = vector.broadcast %88 : vector<16x1xf32> to vector<16x848xf32>
    %91 = vector.broadcast %89 : vector<1x848xf32> to vector<16x848xf32>
    %92 = arith.mulf %90, %91 : vector<16x848xf32>
    %93 = arith.addf %87, %92 : vector<16x848xf32>
    %94 = vector.extract_strided_slice %2 {offsets = [0, 15], sizes = [16, 1], strides = [1, 1]} : vector<16x16xf32> to vector<16x1xf32>
    %95 = vector.extract_strided_slice %1 {offsets = [0, 87], sizes = [1, 848], strides = [1, 1]} : vector<1x1024xf32> to vector<1x848xf32>
    %96 = vector.broadcast %94 : vector<16x1xf32> to vector<16x848xf32>
    %97 = vector.broadcast %95 : vector<1x848xf32> to vector<16x848xf32>
    %98 = arith.mulf %96, %97 : vector<16x848xf32>
    %99 = arith.addf %93, %98 : vector<16x848xf32>
    %c0_4 = arith.constant 0 : index
    %c0_5 = arith.constant 0 : index
    %100 = vector.load %arg3[%c0_4, %c0_5] : memref<16x1xf32, #tpu.memory_space<vmem>>, vector<16x1xf32>
    %101 = vector.broadcast %100 : vector<16x1xf32> to vector<16x848xf32>
    %102 = arith.addf %99, %101 : vector<16x848xf32>
    %cst_6 = arith.constant 0.000000e+00 : f32
    %103 = vector.broadcast %cst_6 : f32 to vector<16x848xf32>
    %104 = arith.maximumf %102, %103 : vector<16x848xf32>
    %c0_7 = arith.constant 0 : index
    %c0_8 = arith.constant 0 : index
    %105 = vector.load %arg11[%c0_7, %c0_8] : memref<16x848xf32, #tpu.memory_space<vmem>>, vector<16x848xf32>
    tpu.vector_store %arg11[%c0_7, %c0_8], %104 {strides = array<i32>} : memref<16x848xf32, #tpu.memory_space<vmem>>, vector<16x848xf32>,
    %cst_9 = arith.constant 0.000000e+00 : f32
    %106 = vector.broadcast %cst_9 : f32 to vector<8x816xf32>
    %c0_10 = arith.constant 0 : index
    %c0_11 = arith.constant 0 : index
    %c0_12 = arith.constant 0 : index
    %107 = vector.load %arg4[%c0_10, %c0_11, %c0_12] : memref<4x8x16xf32, #tpu.memory_space<vmem>>, vector<1x8x16xf32>
    %108 = vector.shape_cast %107 : vector<1x8x16xf32> to vector<8x16xf32>
    %c0_13 = arith.constant 0 : index
    %c0_14 = arith.constant 0 : index
    %109 = vector.load %arg11[%c0_13, %c0_14] : memref<16x848xf32, #tpu.memory_space<vmem>>, vector<16x816xf32>
    %cst_15 = arith.constant dense<0.000000e+00> : vector<8x816xf32>
    %110 = tpu.matmul %108, %109, %cst_15 {dimension_numbers = #tpu.dot_dimension_numbers<[1], [0], [0], [1], [0, 0, 1, 1], [], []>} : vector<8x16xf32>, vector<16x816xf32>, vector<8x816xf32> -> vector<8x816xf32>
    %111 = arith.addf %106, %110 : vector<8x816xf32>
    %c1 = arith.constant 1 : index
    %c0_16 = arith.constant 0 : index
    %c0_17 = arith.constant 0 : index
    %112 = vector.load %arg4[%c1, %c0_16, %c0_17] : memref<4x8x16xf32, #tpu.memory_space<vmem>>, vector<1x8x16xf32>
    %113 = vector.shape_cast %112 : vector<1x8x16xf32> to vector<8x16xf32>
    %c0_18 = arith.constant 0 : index
    %c1_19 = arith.constant 1 : index
    %114 = vector.load %arg11[%c0_18, %c1_19] : memref<16x848xf32, #tpu.memory_space<vmem>>, vector<16x816xf32>
    %cst_20 = arith.constant dense<0.000000e+00> : vector<8x816xf32>
    %115 = tpu.matmul %113, %114, %cst_20 {dimension_numbers = #tpu.dot_dimension_numbers<[1], [0], [0], [1], [0, 0, 1, 1], [], []>} : vector<8x16xf32>, vector<16x816xf32>, vector<8x816xf32> -> vector<8x816xf32>
    %116 = arith.addf %111, %115 : vector<8x816xf32>
    %c2 = arith.constant 2 : index
    %c0_21 = arith.constant 0 : index
    %c0_22 = arith.constant 0 : index
    %117 = vector.load %arg4[%c2, %c0_21, %c0_22] : memref<4x8x16xf32, #tpu.memory_space<vmem>>, vector<1x8x16xf32>
    %118 = vector.shape_cast %117 : vector<1x8x16xf32> to vector<8x16xf32>
    %c0_23 = arith.constant 0 : index
    %c28 = arith.constant 28 : index
    %119 = vector.load %arg11[%c0_23, %c28] : memref<16x848xf32, #tpu.memory_space<vmem>>, vector<16x816xf32>
    %cst_24 = arith.constant dense<0.000000e+00> : vector<8x816xf32>
    %120 = tpu.matmul %118, %119, %cst_24 {dimension_numbers = #tpu.dot_dimension_numbers<[1], [0], [0], [1], [0, 0, 1, 1], [], []>} : vector<8x16xf32>, vector<16x816xf32>, vector<8x816xf32> -> vector<8x816xf32>
    %121 = arith.addf %116, %120 : vector<8x816xf32>
    %c3 = arith.constant 3 : index
    %c0_25 = arith.constant 0 : index
    %c0_26 = arith.constant 0 : index
    %122 = vector.load %arg4[%c3, %c0_25, %c0_26] : memref<4x8x16xf32, #tpu.memory_space<vmem>>, vector<1x8x16xf32>
    %123 = vector.shape_cast %122 : vector<1x8x16xf32> to vector<8x16xf32>
    %c0_27 = arith.constant 0 : index
    %c29 = arith.constant 29 : index
    %124 = vector.load %arg11[%c0_27, %c29] : memref<16x848xf32, #tpu.memory_space<vmem>>, vector<16x816xf32>
    %cst_28 = arith.constant dense<0.000000e+00> : vector<8x816xf32>
    %125 = tpu.matmul %123, %124, %cst_28 {dimension_numbers = #tpu.dot_dimension_numbers<[1], [0], [0], [1], [0, 0, 1, 1], [], []>} : vector<8x16xf32>, vector<16x816xf32>, vector<8x816xf32> -> vector<8x816xf32>
    %126 = arith.addf %121, %125 : vector<8x816xf32>
    %c0_29 = arith.constant 0 : index
    %c0_30 = arith.constant 0 : index
    %127 = vector.load %arg5[%c0_29, %c0_30] : memref<8x1xf32, #tpu.memory_space<vmem>>, vector<8x1xf32>
    %128 = vector.broadcast %127 : vector<8x1xf32> to vector<8x816xf32>
    %129 = arith.addf %126, %128 : vector<8x816xf32>
    %cst_31 = arith.constant 0.000000e+00 : f32
    %130 = vector.broadcast %cst_31 : f32 to vector<8x816xf32>
    %131 = arith.maximumf %129, %130 : vector<8x816xf32>
    %c0_32 = arith.constant 0 : index
    %c0_33 = arith.constant 0 : index
    %132 = vector.load %arg12[%c0_32, %c0_33] : memref<8x816xf32, #tpu.memory_space<vmem>>, vector<8x816xf32>
    tpu.vector_store %arg12[%c0_32, %c0_33], %131 {strides = array<i32>} : memref<8x816xf32, #tpu.memory_space<vmem>>, vector<8x816xf32>,
    %c0_34 = arith.constant 0 : index
    %c0_35 = arith.constant 0 : index
    %133 = vector.load %arg12[%c0_34, %c0_35] : memref<8x816xf32, #tpu.memory_space<vmem>>, vector<8x784xf32>
    %c0_36 = arith.constant 0 : index
    %c1_37 = arith.constant 1 : index
    %134 = vector.load %arg12[%c0_36, %c1_37] : memref<8x816xf32, #tpu.memory_space<vmem>>, vector<8x784xf32>
    %135 = arith.maximumf %133, %134 : vector<8x784xf32>
    %c0_38 = arith.constant 0 : index
    %c28_39 = arith.constant 28 : index
    %136 = vector.load %arg12[%c0_38, %c28_39] : memref<8x816xf32, #tpu.memory_space<vmem>>, vector<8x784xf32>
    %c0_40 = arith.constant 0 : index
    %c29_41 = arith.constant 29 : index
    %137 = vector.load %arg12[%c0_40, %c29_41] : memref<8x816xf32, #tpu.memory_space<vmem>>, vector<8x784xf32>
    %138 = arith.maximumf %136, %137 : vector<8x784xf32>
    %139 = arith.maximumf %135, %138 : vector<8x784xf32>
    %c0_42 = arith.constant 0 : index
    %c0_43 = arith.constant 0 : index
    %140 = vector.load %arg6[%c0_42, %c0_43] : memref<784x1024xf32, #tpu.memory_space<vmem>>, vector<784x1024xf32>
    %cst_44 = arith.constant dense<0.000000e+00> : vector<8x1024xf32>
    %141 = tpu.matmul %139, %140, %cst_44 {dimension_numbers = #tpu.dot_dimension_numbers<[1], [0], [0], [1], [0, 0, 1, 1], [], []>} : vector<8x784xf32>, vector<784x1024xf32>, vector<8x1024xf32> -> vector<8x1024xf32>
    %c0_45 = arith.constant 0 : index
    %c0_46 = arith.constant 0 : index
    %142 = vector.load %arg7[%c0_45, %c0_46] : memref<1x128xf32, #tpu.memory_space<vmem>>, vector<1x128xf32>
    %143 = vector.extract_strided_slice %141 {offsets = [0, 0], sizes = [1, 128], strides = [1, 1]} : vector<8x1024xf32> to vector<1x128xf32>
    %144 = arith.addf %142, %143 : vector<1x128xf32>
    %145 = vector.extract_strided_slice %141 {offsets = [1, 128], sizes = [1, 128], strides = [1, 1]} : vector<8x1024xf32> to vector<1x128xf32>
    %146 = arith.addf %144, %145 : vector<1x128xf32>
    %147 = vector.extract_strided_slice %141 {offsets = [2, 256], sizes = [1, 128], strides = [1, 1]} : vector<8x1024xf32> to vector<1x128xf32>
    %148 = arith.addf %146, %147 : vector<1x128xf32>
    %149 = vector.extract_strided_slice %141 {offsets = [3, 384], sizes = [1, 128], strides = [1, 1]} : vector<8x1024xf32> to vector<1x128xf32>
    %150 = arith.addf %148, %149 : vector<1x128xf32>
    %151 = vector.extract_strided_slice %141 {offsets = [4, 512], sizes = [1, 128], strides = [1, 1]} : vector<8x1024xf32> to vector<1x128xf32>
    %152 = arith.addf %150, %151 : vector<1x128xf32>
    %153 = vector.extract_strided_slice %141 {offsets = [5, 640], sizes = [1, 128], strides = [1, 1]} : vector<8x1024xf32> to vector<1x128xf32>
    %154 = arith.addf %152, %153 : vector<1x128xf32>
    %155 = vector.extract_strided_slice %141 {offsets = [6, 768], sizes = [1, 128], strides = [1, 1]} : vector<8x1024xf32> to vector<1x128xf32>
    %156 = arith.addf %154, %155 : vector<1x128xf32>
    %157 = vector.extract_strided_slice %141 {offsets = [7, 896], sizes = [1, 128], strides = [1, 1]} : vector<8x1024xf32> to vector<1x128xf32>
    %158 = arith.addf %156, %157 : vector<1x128xf32>
    %c0_47 = arith.constant 0 : index
    %c0_48 = arith.constant 0 : index
    %159 = vector.load %arg8[%c0_47, %c0_48] : memref<128x128xf32, #tpu.memory_space<vmem>>, vector<128x128xf32>
    %cst_49 = arith.constant dense<0.000000e+00> : vector<1x128xf32>
    %160 = tpu.matmul %158, %159, %cst_49 {dimension_numbers = #tpu.dot_dimension_numbers<[1], [0], [0], [1], [0, 0, 1, 1], [], []>} : vector<1x128xf32>, vector<128x128xf32>, vector<1x128xf32> -> vector<1x128xf32>
    %c0_50 = arith.constant 0 : index
    %c0_51 = arith.constant 0 : index
    %161 = vector.load %arg9[%c0_50, %c0_51] : memref<1x128xf32, #tpu.memory_space<vmem>>, vector<1x128xf32>
    %162 = arith.addf %160, %161 : vector<1x128xf32>
    %c0_52 = arith.constant 0 : index
    %c0_53 = arith.constant 0 : index
    %c0_54 = arith.constant 0 : index
    %163 = vector.load %arg10[%c0_52, %c0_53, %c0_54] : memref<1x1x128xf32, #tpu.memory_space<vmem>>, vector<1x1x128xf32>
    %164 = vector.shape_cast %163 : vector<1x1x128xf32> to vector<1x128xf32>
    %165 = vector.shape_cast %162 : vector<1x128xf32> to vector<1x1x128xf32>
    tpu.vector_store %arg10[%c0_52, %c0_53, %c0_54], %165 {strides = array<i32>} : memref<1x1x128xf32, #tpu.memory_space<vmem>>, vector<1x1x128xf32>,
    return
  }
  func.func @transform_0(%arg0: i32) -> (i32, i32, i32) {
    %c0_i32 = arith.constant 0 : i32
    %c0_i32_0 = arith.constant 0 : i32
    %c0_i32_1 = arith.constant 0 : i32
    return %arg0, %c0_i32, %c0_i32_0 : i32, i32, i32
  }
  func.func @transform_1(%arg0: i32) -> (i32, i32) {
    %c0_i32 = arith.constant 0 : i32
    %c0_i32_0 = arith.constant 0 : i32
    %c0_i32_1 = arith.constant 0 : i32
    return %c0_i32, %c0_i32_0 : i32, i32
  }
  func.func @transform_2(%arg0: i32) -> (i32, i32) {
    %c0_i32 = arith.constant 0 : i32
    %c0_i32_0 = arith.constant 0 : i32
    %c0_i32_1 = arith.constant 0 : i32
    return %c0_i32, %c0_i32_0 : i32, i32
  }
  func.func @transform_3(%arg0: i32) -> (i32, i32, i32) {
    %c0_i32 = arith.constant 0 : i32
    %c0_i32_0 = arith.constant 0 : i32
    %c0_i32_1 = arith.constant 0 : i32
    %c0_i32_2 = arith.constant 0 : i32
    return %c0_i32, %c0_i32_0, %c0_i32_1 : i32, i32, i32
  }
  func.func @transform_4(%arg0: i32) -> (i32, i32) {
    %c0_i32 = arith.constant 0 : i32
    %c0_i32_0 = arith.constant 0 : i32
    %c0_i32_1 = arith.constant 0 : i32
    return %c0_i32, %c0_i32_0 : i32, i32
  }
  func.func @transform_5(%arg0: i32) -> (i32, i32) {
    %c0_i32 = arith.constant 0 : i32
    %c0_i32_0 = arith.constant 0 : i32
    %c0_i32_1 = arith.constant 0 : i32
    return %c0_i32, %c0_i32_0 : i32, i32
  }
  func.func @transform_6(%arg0: i32) -> (i32, i32) {
    %c0_i32 = arith.constant 0 : i32
    %c0_i32_0 = arith.constant 0 : i32
    %c0_i32_1 = arith.constant 0 : i32
    return %c0_i32, %c0_i32_0 : i32, i32
  }
  func.func @transform_7(%arg0: i32) -> (i32, i32) {
    %c0_i32 = arith.constant 0 : i32
    %c0_i32_0 = arith.constant 0 : i32
    %c0_i32_1 = arith.constant 0 : i32
    return %c0_i32, %c0_i32_0 : i32, i32
  }
  func.func @transform_8(%arg0: i32) -> (i32, i32) {
    %c0_i32 = arith.constant 0 : i32
    %c0_i32_0 = arith.constant 0 : i32
    %c0_i32_1 = arith.constant 0 : i32
    return %c0_i32, %c0_i32_0 : i32, i32
  }
  func.func @transform_9(%arg0: i32) -> (i32, i32, i32) {
    %c0_i32 = arith.constant 0 : i32
    %c0_i32_0 = arith.constant 0 : i32
    %c0_i32_1 = arith.constant 0 : i32
    return %arg0, %c0_i32, %c0_i32_0 : i32, i32, i32
  }
}

</mosaic_0001>

<bundles_post_ra>
// kernel: cnn_forward.1
= control target key start
LH: loop header
LB: loop body
LE: loop exit
PB: predicated region body
PF: predicated region fallthrough
CT: control target
= control target key end

     0   :  { %s8308_s0 = inlined_call_operand.vmem [shape: f32[2,1,1024], index: 0, kind: input, shape index: {}]   ;;  %s8309_s1 = inlined_call_operand.hbm [shape: f32[16,16], index: 1, kind: input, shape index: {}]   ;;  %s8310_s2 = inlined_call_operand.vmem [shape: f32[16,1], index: 2, kind: input, shape index: {}]   ;;  %s8311_s3 = inlined_call_operand.hbm [shape: f32[4,8,16], index: 3, kind: input, shape index: {}]   ;;  %s8312_s4 = inlined_call_operand.vmem [shape: f32[8,1], index: 4, kind: input, shape index: {}]   ;;  %s8313_s5 = inlined_call_operand.hbm [shape: f32[784,1024], index: 5, kind: input, shape index: {}]   ;;  %s8314_s6 = inlined_call_operand.hbm [shape: f32[1,128], index: 6, kind: input, shape index: {}]   ;;  %s8315_s7 = inlined_call_operand.hbm [shape: f32[128,128], index: 7, kind: input, shape index: {}]   ;;  %s8316_s8 = inlined_call_operand.hbm [shape: f32[1,128], index: 8, kind: input, shape index: {}]   ;;  %s8317_s9 = inlined_call_operand.hbm [shape: f32[2,1,128], index: 9, kind: output, shape index: {}]  }
   0x1   :  { %8439 = sst [smem:[#allocation126_spill]] %s8309_s1 }
   0x2   :  { %8440 = sst [smem:[#allocation127_spill]] %s8311_s3 }
   0x3   :  { %8441 = sst [smem:[#allocation128_spill]] %s8314_s6 }
   0x4   :  { %14 = vsyncpa [#allocation5], 0 }
   0x5   :  { %15 = vsyncpa [#allocation8], 0 }
   0x6   :  { %16 = vsyncpa [#allocation11], 0 }
   0x7   :  { %17 = vsyncpa [#allocation14], 0 }
   0x8   :  { %18 = vsyncpa [#allocation6], 0 }
   0x9   :  { %20 = vsyncpa [#allocation6 + $0x1], 0  ;;  %s5906_s30 = smov 0   ;;  %s5908_s10 = smov 0  }
   0xa   :  { %s5910_s11 = smov 0   ;;  %s5912_s12 = smov 0  }
   0xb LB: > { %8442 = sst [smem:[#allocation21_spill]] %s5809_s11  ;;  %s5927_s13 = sadd.s32 4294967295, %s5813_s12   ;;  %s5813_s12 = sphi %s5912_s12, %s8712_s12   ;;  %s5809_s11 = sphi %s5910_s11, %s8714_s11   ;;  %s5805_s10 = sphi %s5908_s10, %s8716_s10   ;;  %s5801_s30 = sphi %s5906_s30, %s8715_s30  }
   0xc   : > { %s5209_s14 = sadd.s32 4294967294, %s5813_s12   ;;  %s5931_s15 = sadd.s32 1, %s5813_s12  }
   0xd   : > { %8443 = sst [smem:[#allocation22_spill]] %s5931_s15  ;;  %s227_s16 = sadd.s32 1, %s5809_s11 }
   0xe   : > { %s224_s17 = ssub.s32 %s5813_s12, %s5931_s15  ;;  %p237_p0 = scmp.ne.s32.totalorder %s5809_s11, %s5805_s10 }
   0xf   : > { %p225_p1 = scmp.eq.s32.totalorder %s224_s17, 0  ;;  %p238_p2 = scmp.eq.s32.totalorder %s5927_s13, 1 }
  0x10   : > { %p243_p3 = scmp.ne.s32.totalorder %s5805_s10, %s5801_s30  ;;  %p244_p4 = scmp.eq.s32.totalorder %s5209_s14, 1 }
  0x11   : > { %s5942_s18 = scalar_select %p225_p1, %s5809_s11, %s227_s16  }
  0x12   : > { %p5944_p5 = por %p238_p2, %p237_p0  ;;  %p5948_p6 = por %p244_p4, %p243_p3 }
  0x13   : > { %8444 = sst [smem:[#allocation23_spill]] %s5942_s18  ;;  %p5210_p7 = scmp.ge.s32.totalorder %s5813_s12, 1 }
  0x14   : > { %p251_p8 = scmp.lt.s32.totalorder %s5813_s12, 3  ;;  %p5313_p9 = scmp.eq.s32.totalorder %s5927_s13, 0 }
  0x15   : > { %s8448_s3 = sld [smem:[#allocation127_spill]]  ;;  %s5815_s29 = smov [#allocation7]  }
  0x16   : > { %p5955_p10 = pnand %p5210_p7, %p251_p8  ;;  %s8449_s6 = sld [smem:[#allocation128_spill]] }
  0x17   : > { %s281_s14 = sshll.u32 %s5815_s29, 4  ;;  %s5816_s16 = smov 128   ;;  %s282_s14 = int_to_ptr.vmem [resolvable:$true] %s281_s14 }
  0x18   : > { %p5290_p11 = pneg %p5955_p10  ;;  %s5817_s17 = smov 8  }
  0x19   : > { %s5818_s22 = smov [#allocation10]   ;;  %s8451_s1 = sld [smem:[#allocation126_spill]] }
  0x1a   : > { %p5969_p12 = pnand %p5313_p9, %p5290_p11  ;;  %s313_s23 = sshll.u32 %s5818_s22, 4  ;;  %s314_s23 = int_to_ptr.vmem [resolvable:$true] %s313_s23 }
  0x1b   : > { %s279_s24 = sshll.u32 %s8448_s3, 4  ;;  %s296_s18 = sshll.u32 %s8313_s5, 4  ;;  %s280_s24 = int_to_ptr.hbm [resolvable:$true] %s279_s24  ;;  %s297_s18 = int_to_ptr.hbm [resolvable:$true] %s296_s18 }
  0x1c   : > { %s311_s27 = sshll.u32 %s8449_s6, 4  ;;  %s5819_s11 = smov [#allocation4]   ;;  %s312_s27 = int_to_ptr.hbm [resolvable:$true] %s311_s27 }
  0x1d   : > { %5296 = dma.hbm_to_vmem [thread:$0]  (!%p5969_p12), %s280_s24, 512, %s282_s14, [#allocation8], %s5816_s16, %s5816_s16, %s5817_s17  }
  0x1e   : > { %5302 = dma.hbm_to_vmem [thread:$0]  (!%p5969_p12), %s312_s27, 16, %s314_s23, [#allocation11]  }
  0x1f   : > { %s262_s3 = sshll.u32 %s8451_s1, 4  ;;  %s264_s15 = sshll.u32 %s5819_s11, 4  ;;  %s263_s3 = int_to_ptr.hbm [resolvable:$true] %s262_s3  ;;  %s265_s15 = int_to_ptr.vmem [resolvable:$true] %s264_s15 }
  0x20   : > { %5293 = dma.hbm_to_vmem [thread:$0]  (!%p5969_p12), %s263_s3, 256, %s265_s15, [#allocation5], %s5816_s16, %s5816_s16, %s5817_s17  }
  0x21   : > { %s5820_s24 = smov [#allocation9]   ;;  %s5821_s22 = smov 1024  }
  0x22   : > { %s298_s14 = sshll.u32 %s5820_s24, 4  ;;  %s5822_s27 = smov 64   ;;  %s299_s14 = int_to_ptr.vmem [resolvable:$true] %s298_s14 }
  0x23   : > { %5299 = dma.hbm_to_vmem [thread:$0]  (!%p5969_p12), %s297_s18, 100352, %s299_s14, [#allocation8], %s5821_s22, %s5821_s22, %s5822_s27  }
  0x24   : > { %s322_s11 = sshll.u32 %s8315_s7, 4  ;;  %s5823_s25 = smov [#allocation12]   ;;  %s323_s11 = int_to_ptr.hbm [resolvable:$true] %s322_s11 }
  0x25   : > { %s324_s26 = sshll.u32 %s5823_s25, 4  ;;  %s337_s3 = sshll.u32 %s8316_s8, 4  ;;  %s325_s26 = int_to_ptr.vmem [resolvable:$true] %s324_s26  ;;  %s338_s3 = int_to_ptr.hbm [resolvable:$true] %s337_s3 }
  0x26   : > { %5305 = dma.hbm_to_vmem [thread:$0]  (!%p5969_p12), %s323_s11, 2048, %s325_s26, [#allocation11], %s5816_s16, %s5816_s16, %s5817_s17  }
  0x27   : > { %s5824_s15 = smov [#allocation13]   ;;  %359 = sbr.rel (%p5955_p10) target bundleno = 2166 (0x876), region = 56 }
  0x28   : > { %s339_s18 = sshll.u32 %s5824_s15, 4  ;;  %s340_s18 = int_to_ptr.vmem [resolvable:$true] %s339_s18 }
  0x29   : > { %5308 = dma.hbm_to_vmem [thread:$0]  (!%p5969_p12), %s338_s3, 16, %s340_s18, [#allocation14]  }
  0x2c   : > { %5780 = dma.done.wait (%p5313_p9), [#allocation5], 256  }
  0x2d   : > { %5782 = vsyncadd (%p5313_p9), [#allocation5], 4294967040 }
  0x2e   : > { %5784 = dma.done.wait (%p5313_p9), [#allocation8], 100864  }
  0x2f   : > { %5786 = vsyncadd (%p5313_p9), [#allocation8], 4294866432 }
  0x30   : > { %5788 = dma.done.wait (%p5313_p9), [#allocation11], 2064  }
  0x31   : > { %5790 = vsyncadd (%p5313_p9), [#allocation11], 4294965232 }
  0x32   : > { %5792 = dma.done.wait (%p5313_p9), [#allocation14], 16  }
  0x33   : > { %5794 = vsyncadd (%p5313_p9), [#allocation14], 4294967280  ;;  %v5825_v0 = vmov 1   ;;  %v5826_v1 = vmov 2   ;;  %v5827_v2 = vmov 3   ;;  %v6024_v3 = vld [vmem:[#allocation4] sm:$0xff] }
  0x34   : > { %5399 = vset.pattern.permute.xlu1 %v5825_v0  ;;  %5400 = vset.pattern.permute.xlu0 %v5826_v1  ;;  %v6029_v4 = vld [vmem:[#allocation4 + $0x8] sm:$0xff]  ;;  %v5828_v5 = vmov 4   ;;  %v5829_v6 = vmov 5   ;;  %v5830_v7 = vmov 6   ;;  %v5831_v8 = vmov 7   ;;  %p419_p13 = scmp.lt.s32.totalorder %s5927_s13, 1 }
  0x35   : > { %5402 = vset.pattern.permute.xlu2 %v5827_v2  ;;  %480 = vperm.xlu1 %5399, %v6024_v3   ;;  %s5832_s24 = smov 127   ;;  %v5833_v32 = vmov 8   ;;  %s5834_s14 = smov 126   ;;  %v5835_v45 = vmov 9   ;;  %v5836_v55 = vmov 10   ;;  %v5838_v57 = vmov 13  }
  0x36   : > { %585 = vperm.xlu0 %5400, %v6024_v3   ;;  %690 = vperm.xlu2 %5402, %v6024_v3   ;;  %s420_s1 = scalar_select %p419_p13, %s5927_s13, 1  ;;  %v5839_v60 = vmov 15   ;;  %v5840_v0 = vmov 11   ;;  %vm543_vm0 = vcmask 1039360   ;;  %vm648_vm1 = vcmask 1031168  }
  0x37   : > { %s5837_s22 = smov 125   ;;  %s5844_s27 = smov 100   ;;  %vm753_vm2 = vcmask 1022976   ;;  %vm858_vm3 = vcmask 818176   ;;  %vm963_vm4 = vcmask 809984   ;;  %vm1068_vm5 = vcmask 801792  }
  0x38   : > { %s5225_s21 = sshll.u32 %s420_s1, 3  ;;  %s5845_s6 = smov 99   ;;  %vm1173_vm6 = vcmask 793600   ;;  %vm1288_vm7 = vcmask 588800   ;;  %vm1518_vm8 = vcmask 572416   ;;  %vm1633_vm9 = vcmask 564224  }
  0x39   : > { %s422_s17 = scalar_lea.vmem %s8308_s0, %s5225_s21  ;;  %s5846_s23 = smov 98   ;;  %vm1403_vm10 = vcmask 580608   ;;  %vm1748_vm11 = vcmask 359424   ;;  %vm1863_vm12 = vcmask 351232   ;;  %vm1978_vm13 = vcmask 343040  }
  0x3a   : > { %v6047_v9 = vld [vmem:[%s422_s17] sm:$0xff]  ;;  %s5847_s11 = smov 97   ;;  %s5848_s25 = smov 72   ;;  %vm2093_vm14 = vcmask 334848   ;;  %vm2182_vm15 = vcmask 654336  }
  0x3b   : > { %v6050_v10 = vperm.slane %v6047_v9, 3  ;;  %v6053_v11 = vperm.slane %v6047_v9, 2  ;;  %v6056_v12 = vperm.slane %v6047_v9, 0  ;;  %v6065_v17 = vperm.slane %v6047_v9, 6  ;;  %s5849_s26 = smov 71   ;;  %s5850_s29 = smov 70  }
  0x3c   : > { %v6068_v18 = vperm.slane %v6047_v9, 5  ;;  %v6071_v19 = vperm.slane %v6047_v9, 1  ;;  %v6080_v24 = vperm.slane %v6047_v9, 4  ;;  %s5851_s3 = smov 69   ;;  %s5852_s15 = smov 44  }
  0x3d   : > { %484 = vperm.xlu1 %5399, %v6029_v4   ;;  %8452 = vst [vmem:[#allocation24_spill] sm:$0xff] %v6053_v11  ;;  %s5853_s18 = smov 43   ;;  %s5854_s1 = smov 42  }
  0x3e   : > { %5403 = vset.pattern.permute.xlu0 %v5827_v2  ;;  %5404 = vset.pattern.permute.xlu2 %v5828_v5  ;;  %8453 = vst [vmem:[#allocation25_spill] sm:$0xff] %v6056_v12  ;;  %v5841_v2 = vmov 0   ;;  %s5855_s21 = smov 41  }
  0x3f   : > { %694 = vperm.xlu0 %5403, %v6029_v4   ;;  %799 = vperm.xlu2 %5404, %v6029_v4   ;;  %8454 = vst [vmem:[#allocation26_spill] sm:$0xff] %v6068_v18 }
  0x40   : > { %8455 = vst [vmem:[#allocation27_spill] sm:$0xff] %v6071_v19 }
  0x41   : > { %8456 = vst [vmem:[#allocation28_spill] sm:$0xff] %v6080_v24 }
  0x45   : > { %5401 = vset.pattern.permute.xlu1 %v5826_v1 }
  0x46   : > { %589 = vperm.xlu1 %5401, %v6029_v4  }
  0x47   : > { %5407 = vset.pattern.permute.xlu0 %v5829_v6  ;;  %5406 = vset.pattern.permute.xlu2 %v5829_v6 }
  0x48   : > { %900 = vperm.xlu0 %5407, %v6024_v3   ;;  %904 = vperm.xlu2 %5406, %v6029_v4  }
  0x4e   : > { %5405 = vset.pattern.permute.xlu1 %v5828_v5 }
  0x4f   : > { %795 = vperm.xlu1 %5405, %v6024_v3  }
  0x50   : > { %5409 = vset.pattern.permute.xlu2 %v5830_v7  ;;  %5412 = vset.pattern.permute.xlu0 %v5833_v32 }
  0x51   : > { %1005 = vperm.xlu2 %5409, %v6024_v3  }
  0x57   : > { %5408 = vset.pattern.permute.xlu1 %v5830_v7  ;;  %v5842_v7 = vmov 12  }
  0x58   : > { %1009 = vperm.xlu1 %5408, %v6029_v4  }
  0x59   : > { %5411 = vset.pattern.permute.xlu2 %v5831_v8 }
  0x5a   : > { %1110 = vperm.xlu2 %5411, %v6024_v3  }
  0x60   : > { %5410 = vset.pattern.permute.xlu1 %v5831_v8 }
  0x61   : > { %1114 = vperm.xlu1 %5410, %v6029_v4  }
  0x62   : > { %5414 = vset.pattern.permute.xlu2 %v5835_v45 }
  0x69   : > { %5413 = vset.pattern.permute.xlu1 %v5833_v32 }
  0x90   : > { %v6106_v40 = vpop.permute.xlu2 %690 }
  0x91   : > { %v697_v52 = vmul.f32 %v6106_v40, %v6056_v12 }
  0x99   : > { %v6114_v44 = vpop.permute.xlu2 %799 }
  0xa2   : > { %v6122_v49 = vpop.permute.xlu2 %904 }
  0xa7   : > { %v481_v13 = vpop.permute.xlu1 %480 }
  0xa8   : > { %v490_v14 = vmul.f32 %v481_v13, %v6050_v10  ;;  %v489_v15 = vmul.f32 %v481_v13, %v6053_v11  ;;  %v487_v16 = vmul.f32 %v481_v13, %v6056_v12  ;;  %v493_v20 = vmul.f32 %v481_v13, %v6065_v17  ;;  %v586_v31 = vpop.permute.xlu0 %585 }
  0xa9   : > { %v492_v21 = vmul.f32 %v481_v13, %v6068_v18  ;;  %v488_v22 = vmul.f32 %v481_v13, %v6071_v19  ;;  %v491_v27 = vmul.f32 %v481_v13, %v6080_v24  ;;  %v593_v33 = vmul.f32 %v586_v31, %v6071_v19 }
  0xaa   : > { %521 = vrot.lane.b32.xlu1 %v490_v14, %s5832_s24  ;;  %519 = vrot.lane.b32.xlu0 %v489_v15, %s5832_s24  ;;  %v595_v34 = vmul.f32 %v586_v31, %v6050_v10  ;;  %v596_v36 = vmul.f32 %v586_v31, %v6080_v24  ;;  %v598_v37 = vmul.f32 %v586_v31, %v6065_v17 }
  0xab   : > { %515 = vrot.lane.b32.xlu2 %v487_v16, %s5832_s24  ;;  %v592_v43 = vmul.f32 %v586_v31, %v6056_v12  ;;  %v594_v48 = vmul.f32 %v586_v31, %v6053_v11  ;;  %v597_v51 = vmul.f32 %v586_v31, %v6068_v18  ;;  %v6132_v54 = vpop.permute.xlu2 %1005  ;;  %v698_v15 = vmul.f32 %v6106_v40, %v6071_v19 }
  0xaf   : > { %v485_v23 = vpop.permute.xlu1 %484 }
  0xb0   : > { %v496_v25 = vmul.f32 %v485_v23, %v6053_v11  ;;  %v495_v26 = vmul.f32 %v485_v23, %v6071_v19  ;;  %v499_v28 = vmul.f32 %v485_v23, %v6068_v18  ;;  %v498_v29 = vmul.f32 %v485_v23, %v6080_v24 }
  0xb1   : > { %v494_v30 = vmul.f32 %v485_v23, %v6056_v12  ;;  %v497_v35 = vmul.f32 %v485_v23, %v6050_v10  ;;  %v500_v38 = vmul.f32 %v485_v23, %v6065_v17  ;;  %v6152_v63 = vpop.permute.xlu0 %694 }
  0xb2   : > { %527 = vrot.lane.b32.xlu1 %v493_v20, %s5832_s24  ;;  %525 = vrot.lane.b32.xlu0 %v492_v21, %s5832_s24 }
  0xb3   : > { %517 = vrot.lane.b32.xlu2 %v488_v22, %s5832_s24  ;;  %v701_v22 = vmul.f32 %v6106_v40, %v6080_v24 }
  0xb4   : > { %v6140_v58 = vpop.permute.xlu2 %1110 }
  0xb8   : > { %v590_v39 = vpop.permute.xlu1 %589 }
  0xb9   : > { %v601_v41 = vmul.f32 %v590_v39, %v6053_v11  ;;  %v599_v42 = vmul.f32 %v590_v39, %v6056_v12  ;;  %v604_v46 = vmul.f32 %v590_v39, %v6068_v18  ;;  %v602_v47 = vmul.f32 %v590_v39, %v6050_v10 }
  0xba   : > { %533 = vrot.lane.b32.xlu1 %v496_v25, %s5832_s24  ;;  %531 = vrot.lane.b32.xlu0 %v495_v26, %s5832_s24  ;;  %v605_v50 = vmul.f32 %v590_v39, %v6065_v17  ;;  %v600_v53 = vmul.f32 %v590_v39, %v6071_v19  ;;  %v603_v56 = vmul.f32 %v590_v39, %v6080_v24  ;;  %v6159_v5 = vpop.permute.xlu0 %900  ;;  %v5843_v25 = vmov 14  }
  0xbb   : > { %523 = vrot.lane.b32.xlu2 %v491_v27, %s5832_s24  ;;  %v699_v39 = vmul.f32 %v6106_v40, %v6053_v11 }
  0xc1   : > { %v6143_v59 = vpop.permute.xlu1 %795 }
  0xc2   : > { %539 = vrot.lane.b32.xlu1 %v499_v28, %s5832_s24  ;;  %537 = vrot.lane.b32.xlu0 %v498_v29, %s5832_s24  ;;  %v812_v28 = vmul.f32 %v6114_v44, %v6050_v10  ;;  %v804_v32 = vmul.f32 %v6143_v59, %v6053_v11 }
  0xc3   : > { %529 = vrot.lane.b32.xlu2 %v494_v30, %s5832_s24  ;;  %v705_v30 = vmul.f32 %v6152_v63, %v6071_v19 }
  0xca   : > { %622 = vrot.lane.b32.xlu1 %v593_v33, %s5834_s14  ;;  %626 = vrot.lane.b32.xlu0 %v595_v34, %s5834_s14  ;;  %v6150_v62 = vpop.permute.xlu1 %1009  ;;  %v707_v34 = vmul.f32 %v6152_v63, %v6050_v10 }
  0xcb   : > { %535 = vrot.lane.b32.xlu2 %v497_v35, %s5832_s24  ;;  %v706_v35 = vmul.f32 %v6152_v63, %v6053_v11 }
  0xd2   : > { %628 = vrot.lane.b32.xlu1 %v596_v36, %s5834_s14  ;;  %632 = vrot.lane.b32.xlu0 %v598_v37, %s5834_s14  ;;  %v915_v37 = vmul.f32 %v6122_v49, %v6071_v19 }
  0xd3   : > { %541 = vrot.lane.b32.xlu2 %v500_v38, %s5832_s24  ;;  %v6161_v6 = vpop.permute.xlu1 %1114 }
  0xda   : > { %638 = vrot.lane.b32.xlu0 %v601_v41, %s5834_s14  ;;  %634 = vrot.lane.b32.xlu1 %v599_v42, %s5834_s14  ;;  %v708_v41 = vmul.f32 %v6152_v63, %v6080_v24 }
  0xdb   : > { %620 = vrot.lane.b32.xlu2 %v592_v43, %s5834_s14 }
  0xe2   : > { %644 = vrot.lane.b32.xlu0 %v604_v46, %s5834_s14  ;;  %640 = vrot.lane.b32.xlu1 %v602_v47, %s5834_s14  ;;  %v810_v47 = vmul.f32 %v6114_v44, %v6071_v19 }
  0xe3   : > { %624 = vrot.lane.b32.xlu2 %v594_v48, %s5834_s14  ;;  %v700_v48 = vmul.f32 %v6106_v40, %v6050_v10 }
  0xea   : > { %1219 = vperm.xlu0 %5412, %v6029_v4   ;;  %646 = vrot.lane.b32.xlu1 %v605_v50, %s5834_s14 }
  0xeb   : > { %630 = vrot.lane.b32.xlu2 %v597_v51, %s5834_s14 }
  0xf2   : > { %5417 = vset.pattern.permute.xlu0 %v5836_v55  ;;  %725 = vrot.lane.b32.xlu1 %v697_v52, %s5837_s22  ;;  %v910_v52 = vmul.f32 %v6159_v5, %v6050_v10 }
  0xf3   : > { %636 = vrot.lane.b32.xlu2 %v600_v53, %s5834_s14  ;;  %1447 = vperm.xlu0 %5417, %v6024_v3  }
  0xfa   : > { %1215 = vperm.xlu1 %5413, %v6024_v3  }
  0xfb   : > { %642 = vrot.lane.b32.xlu2 %v603_v56, %s5834_s14  ;;  %5422 = vset.pattern.permute.xlu0 %v5838_v57  ;;  %v811_v56 = vmul.f32 %v6114_v44, %v6053_v11 }
  0xfc   : > { %1796 = vperm.xlu0 %5422, %v6029_v4  }
 0x102   : > { %5415 = vset.pattern.permute.xlu1 %v5835_v45  ;;  %v918_v45 = vmul.f32 %v6122_v49, %v6080_v24 }
 0x103   : > { %1336 = vperm.xlu2 %5414, %v6029_v4   ;;  %1332 = vperm.xlu1 %5415, %v6024_v3  }
 0x104   : > { %5427 = vset.pattern.permute.xlu0 %v5839_v60 }
 0x105   : > { %v6147_v61 = vpop.permute.xlu2 %515  ;;  %2022 = vperm.xlu0 %5427, %v6024_v3  }
 0x10b   : > { %5416 = vset.pattern.permute.xlu2 %v5836_v55  ;;  %5418 = vset.pattern.permute.xlu1 %v5840_v0  ;;  %v813_v55 = vmul.f32 %v6114_v44, %v6080_v24 }
 0x10c   : > { %1451 = vperm.xlu2 %5416, %v6029_v4   ;;  %1566 = vperm.xlu1 %5418, %v6029_v4  }
 0x10d   : > { %v6156_v1 = vpop.permute.xlu2 %517  ;;  %5428 = vset.pattern.permute.xlu0 %v5841_v2 }
 0x10e   : > { %428 = vperm.xlu0 %5428, %v6024_v3  }
 0x114   : > { %5419 = vset.pattern.permute.xlu2 %v5840_v0  ;;  %5420 = vset.pattern.permute.xlu1 %v5842_v7  ;;  %v1021_v0 = vmul.f32 %v6150_v62, %v6053_v11 }
 0x115   : > { %1562 = vperm.xlu2 %5419, %v6024_v3   ;;  %v6164_v8 = vpop.permute.xlu2 %523  ;;  %1681 = vperm.xlu1 %5420, %v6029_v4  }
 0x116   : > { %433 = vperm.xlu0 %5428, %v6029_v4  }
 0x11c   : > { %v6168_v13 = vpop.permute.xlu1 %521  ;;  %v6170_v14 = vpop.permute.xlu0 %519 }
 0x11d   : > { %5421 = vset.pattern.permute.xlu2 %v5842_v7  ;;  %v6174_v16 = vpop.permute.xlu2 %529  ;;  %5423 = vset.pattern.permute.xlu1 %v5838_v57  ;;  %v805_v7 = vmul.f32 %v6143_v59, %v6050_v10 }
 0x11e   : > { %1677 = vperm.xlu2 %5421, %v6024_v3   ;;  %727 = vrot.lane.b32.xlu0 %v698_v15, %s5837_s22  ;;  %v803_v15 = vmul.f32 %v6143_v59, %v6071_v19 }
 0x11f   : > { %1792 = vperm.xlu1 %5423, %v6024_v3  }
 0x124   : > { %v6179_v20 = vpop.permute.xlu1 %527  ;;  %v6181_v21 = vpop.permute.xlu0 %525 }
 0x125   : > { %v6185_v23 = vpop.permute.xlu2 %535 }
 0x126   : > { %5424 = vset.pattern.permute.xlu2 %v5843_v25  ;;  %733 = vrot.lane.b32.xlu0 %v701_v22, %s5837_s22 }
 0x127   : > { %5425 = vset.pattern.permute.xlu1 %v5843_v25  ;;  %1911 = vperm.xlu2 %5424, %v6029_v4   ;;  %v704_v25 = vmul.f32 %v6152_v63, %v6056_v12 }
 0x128   : > { %1907 = vperm.xlu1 %5425, %v6024_v3  }
 0x12c   : > { %v6190_v26 = vpop.permute.xlu1 %533  ;;  %v6192_v27 = vpop.permute.xlu0 %531 }
 0x12d   : > { %v6196_v29 = vpop.permute.xlu2 %541 }
 0x12e   : > { %8457 = vst [vmem:[#allocation29_spill] sm:$0xff] %v6196_v29  ;;  %850 = vrot.lane.b32.xlu0 %v812_v28, %s5844_s27 }
 0x12f   : > { %5426 = vset.pattern.permute.xlu2 %v5839_v60 }
 0x130   : > { %741 = vrot.lane.b32.xlu1 %v705_v30, %s5837_s22  ;;  %2026 = vperm.xlu2 %5426, %v6029_v4  }
 0x131   : > { %5429 = vset.pattern.permute.xlu1 %v5841_v2 }
 0x134   : > { %v6203_v3 = vpop.permute.xlu1 %539  ;;  %v6205_v31 = vpop.permute.xlu0 %537 }
 0x135   : > { %v6209_v33 = vpop.permute.xlu2 %620 }
 0x136   : > { %834 = vrot.lane.b32.xlu0 %v804_v32, %s5844_s27  ;;  %v916_v32 = vmul.f32 %v6122_v49, %v6053_v11 }
 0x138   : > { %745 = vrot.lane.b32.xlu1 %v707_v34, %s5837_s22  ;;  %743 = vrot.lane.b32.xlu2 %v706_v35, %s5837_s22  ;;  %v806_v34 = vmul.f32 %v6143_v59, %v6080_v24 }
 0x13c   : > { %v6218_v4 = vpop.permute.xlu1 %622  ;;  %v6220_v36 = vpop.permute.xlu0 %626 }
 0x13d   : > { %8458 = vst [vmem:[#allocation30_spill] sm:$0xff] %v6220_v36  ;;  %v6224_v38 = vpop.permute.xlu2 %624  ;;  %v1024_v36 = vmul.f32 %v6150_v62, %v6068_v18 }
 0x13e   : > { %951 = vrot.lane.b32.xlu0 %v915_v37, %s5845_s6  ;;  %v1014_v37 = vmul.f32 %v6132_v54, %v6053_v11 }
 0x140   : > { %729 = vrot.lane.b32.xlu1 %v699_v39, %s5837_s22  ;;  %747 = vrot.lane.b32.xlu2 %v708_v41, %s5837_s22  ;;  %v908_v41 = vmul.f32 %v6159_v5, %v6071_v19 }
 0x144   : > { %v6233_v42 = vpop.permute.xlu1 %628  ;;  %v6235_v43 = vpop.permute.xlu0 %632 }
 0x145   : > { %8459 = vst [vmem:[#allocation31_spill] sm:$0xff] %v6235_v43  ;;  %v6239_v46 = vpop.permute.xlu2 %630  ;;  %v1121_v43 = vmul.f32 %v6140_v58, %v6080_v24 }
 0x146   : > { %957 = vrot.lane.b32.xlu0 %v918_v45, %s5845_s6  ;;  %v917_v45 = vmul.f32 %v6122_v49, %v6050_v10 }
 0x148   : > { %846 = vrot.lane.b32.xlu1 %v810_v47, %s5844_s27  ;;  %731 = vrot.lane.b32.xlu2 %v700_v48, %s5837_s22 }
 0x14c   : > { %v6248_v50 = vpop.permute.xlu0 %638  ;;  %v6250_v51 = vpop.permute.xlu1 %634 }
 0x14d   : > { %8460 = vst [vmem:[#allocation32_spill] sm:$0xff] %v6248_v50  ;;  %v6254_v53 = vpop.permute.xlu2 %636  ;;  %v710_v50 = vmul.f32 %v6152_v63, %v6065_v17 }
 0x14e   : > { %941 = vrot.lane.b32.xlu0 %v910_v52, %s5845_s6  ;;  %v1125_v52 = vmul.f32 %v6161_v6, %v6071_v19 }
 0x150   : > { %852 = vrot.lane.b32.xlu1 %v813_v55, %s5844_s27  ;;  %848 = vrot.lane.b32.xlu2 %v811_v56, %s5844_s27  ;;  %v911_v55 = vmul.f32 %v6159_v5, %v6080_v24  ;;  %v909_v56 = vmul.f32 %v6159_v5, %v6053_v11 }
 0x154   : > { %v6263_v57 = vpop.permute.xlu0 %644  ;;  %v6265_v60 = vpop.permute.xlu1 %640 }
 0x155   : > { %8461 = vst [vmem:[#allocation33_spill] sm:$0xff] %v6263_v57  ;;  %v6269_v2 = vpop.permute.xlu2 %642  ;;  %v1016_v57 = vmul.f32 %v6132_v54, %v6080_v24 }
 0x156   : > { %8462 = vst [vmem:[#allocation34_spill] sm:$0xff] %v6265_v60  ;;  %1058 = vrot.lane.b32.xlu0 %v1021_v0, %s5846_s23  ;;  %v1127_v60 = vmul.f32 %v6161_v6, %v6050_v10 }
 0x157   : > { %8463 = vst [vmem:[#allocation35_spill] sm:$0xff] %v6269_v2 }
 0x158   : > { %836 = vrot.lane.b32.xlu1 %v805_v7, %s5844_s27  ;;  %832 = vrot.lane.b32.xlu2 %v803_v15, %s5844_s27  ;;  %v1128_v15 = vmul.f32 %v6161_v6, %v6080_v24 }
 0x15c   : > { %v6278_v22 = vpop.permute.xlu1 %646  ;;  %v6282_v28 = vpop.permute.xlu0 %1219 }
 0x15d   : > { %8464 = vst [vmem:[#allocation36_spill] sm:$0xff] %v6278_v22  ;;  %v6284_v30 = vpop.permute.xlu2 %1336  ;;  %v1233_v22 = vmul.f32 %v6282_v28, %v6071_v19  ;;  %v1236_v2 = vmul.f32 %v6282_v28, %v6080_v24 }
 0x15e   : > { %739 = vrot.lane.b32.xlu0 %v704_v25, %s5837_s22 }
 0x160   : > { %953 = vrot.lane.b32.xlu1 %v916_v32, %s5845_s6  ;;  %838 = vrot.lane.b32.xlu2 %v806_v34, %s5844_s27  ;;  %v1022_v32 = vmul.f32 %v6150_v62, %v6050_v10  ;;  %v1020_v34 = vmul.f32 %v6150_v62, %v6071_v19 }
 0x164   : > { %v6293_v35 = vpop.permute.xlu1 %725 }
 0x165   : > { %8465 = vst [vmem:[#allocation37_spill] sm:$0xff] %v6293_v35  ;;  %v6297_v39 = vpop.permute.xlu0 %1447 }
 0x166   : > { %8466 = vst [vmem:[#allocation38_spill] sm:$0xff] %v6297_v39  ;;  %1044 = vrot.lane.b32.xlu0 %v1014_v37, %s5846_s23  ;;  %v6304_v47 = vpop.permute.xlu2 %1451 }
 0x168   : > { %937 = vrot.lane.b32.xlu1 %v908_v41, %s5845_s6  ;;  %955 = vrot.lane.b32.xlu2 %v917_v45, %s5845_s6  ;;  %v809_v45 = vmul.f32 %v6114_v44, %v6056_v12 }
 0x16c   : > { %v6308_v48 = vpop.permute.xlu1 %1215 }
 0x16e   : > { %1161 = vrot.lane.b32.xlu0 %v1125_v52, %s5847_s11  ;;  %v6317_v0 = vpop.permute.xlu0 %1796 }
 0x16f   : > { %8467 = vst [vmem:[#allocation39_spill] sm:$0xff] %v6317_v0  ;;  %v6319_v7 = vpop.permute.xlu2 %1562 }
 0x170   : > { %8468 = vst [vmem:[#allocation40_spill] sm:$0xff] %v6319_v7  ;;  %943 = vrot.lane.b32.xlu1 %v911_v55, %s5845_s6  ;;  %939 = vrot.lane.b32.xlu2 %v909_v56, %s5845_s6  ;;  %v709_v55 = vmul.f32 %v6152_v63, %v6068_v18  ;;  %v1023_v56 = vmul.f32 %v6150_v62, %v6080_v24 }
 0x171   : > { %v1118_v63 = vmul.f32 %v6140_v58, %v6071_v19 }
 0x175   : > { %v6325_v25 = vpop.permute.xlu1 %1332 }
 0x176   : > { %8469 = vst [vmem:[#allocation41_spill] sm:$0xff] %v6325_v25  ;;  %1167 = vrot.lane.b32.xlu0 %v1128_v15, %s5847_s11 }
 0x177   : > { %v6332_v37 = vpop.permute.xlu0 %2022 }
 0x178   : > { %8470 = vst [vmem:[#allocation42_spill] sm:$0xff] %v6332_v37  ;;  %1060 = vrot.lane.b32.xlu1 %v1022_v32, %s5846_s23  ;;  %1056 = vrot.lane.b32.xlu2 %v1020_v34, %s5846_s23  ;;  %v6336_v41 = vpop.permute.xlu2 %1677  ;;  %v1119_v34 = vmul.f32 %v6140_v58, %v6053_v11  ;;  %v1013_v37 = vmul.f32 %v6132_v54, %v6071_v19 }
 0x179   : > { %8471 = vst [vmem:[#allocation43_spill] sm:$0xff] %v6336_v41 }
 0x17e   : > { %844 = vrot.lane.b32.xlu0 %v809_v45, %s5844_s27  ;;  %v6341_v52 = vpop.permute.xlu1 %1566  ;;  %v1015_v45 = vmul.f32 %v6132_v54, %v6050_v10 }
 0x17f   : > { %8472 = vst [vmem:[#allocation44_spill] sm:$0xff] %v6341_v52 }
 0x180   : > { %749 = vrot.lane.b32.xlu1 %v709_v55, %s5837_s22  ;;  %1062 = vrot.lane.b32.xlu2 %v1023_v56, %s5846_s23  ;;  %v6349_v15 = vpop.permute.xlu0 %428 }
 0x181   : > { %v6351_v32 = vpop.permute.xlu2 %1911 }
 0x182   : > { %8473 = vst [vmem:[#allocation45_spill] sm:$0xff] %v6351_v32 }
 0x186   : > { %1149 = vrot.lane.b32.xlu0 %v1119_v34, %s5847_s11  ;;  %v1126_v34 = vmul.f32 %v6161_v6, %v6053_v11 }
 0x187   : > { %v6360_v35 = vpop.permute.xlu1 %1681 }
 0x188   : > { %8474 = vst [vmem:[#allocation46_spill] sm:$0xff] %v6360_v35  ;;  %1046 = vrot.lane.b32.xlu1 %v1015_v45, %s5846_s23  ;;  %1042 = vrot.lane.b32.xlu2 %v1013_v37, %s5846_s23  ;;  %v6364_v55 = vpop.permute.xlu0 %433 }
 0x18a   : > { %v6366_v56 = vpop.permute.xlu2 %2026 }
 0x18b   : > { %8475 = vst [vmem:[#allocation47_spill] sm:$0xff] %v6366_v56 }
 0x18e   : > { %1274 = vrot.lane.b32.xlu0 %v1233_v22, %s5848_s25  ;;  %v702_v22 = vmul.f32 %v6106_v40, %v6068_v18 }
 0x190   : > { %1163 = vrot.lane.b32.xlu1 %v1126_v34, %s5847_s11  ;;  %1048 = vrot.lane.b32.xlu2 %v1016_v57, %s5846_s23  ;;  %v6377_v37 = vpop.permute.xlu0 %727 }
 0x191   : > { %8476 = vst [vmem:[#allocation48_spill] sm:$0xff] %v6377_v37  ;;  %v6379_v45 = vpop.permute.xlu1 %1792  ;;  %v807_v37 = vmul.f32 %v6143_v59, %v6068_v18 }
 0x192   : > { %8477 = vst [vmem:[#allocation49_spill] sm:$0xff] %v6379_v45  ;;  %v6381_v56 = vpop.permute.xlu2 %743 }
 0x193   : > { %8478 = vst [vmem:[#allocation50_spill] sm:$0xff] %v6381_v56 }
 0x196   : > { %1280 = vrot.lane.b32.xlu0 %v1236_v2, %s5848_s25  ;;  %v814_v2 = vmul.f32 %v6114_v44, %v6068_v18 }
 0x198   : > { %735 = vrot.lane.b32.xlu1 %v702_v22, %s5837_s22  ;;  %1165 = vrot.lane.b32.xlu2 %v1127_v60, %s5847_s11  ;;  %v6392_v57 = vpop.permute.xlu0 %733 }
 0x199   : > { %8479 = vst [vmem:[#allocation51_spill] sm:$0xff] %v6392_v57 }
 0x19a   : > { %v6394_v34 = vpop.permute.xlu1 %1907  ;;  %v6396_v56 = vpop.permute.xlu2 %747 }
 0x19b   : > { %8480 = vst [vmem:[#allocation52_spill] sm:$0xff] %v6394_v34 }
 0x19c   : > { %8481 = vst [vmem:[#allocation53_spill] sm:$0xff] %v6396_v56  ;;  %v919_v56 = vmul.f32 %v6122_v49, %v6068_v18 }
 0x19e   : > { %840 = vrot.lane.b32.xlu0 %v807_v37, %s5844_s27  ;;  %v1120_v37 = vmul.f32 %v6140_v58, %v6050_v10 }
 0x1a0   : > { %854 = vrot.lane.b32.xlu1 %v814_v2, %s5844_s27  ;;  %751 = vrot.lane.b32.xlu2 %v710_v50, %s5837_s22  ;;  %v6407_v60 = vpop.permute.xlu0 %850 }
 0x1a1   : > { %8482 = vst [vmem:[#allocation54_spill] sm:$0xff] %v6407_v60 }
 0x1a2   : > { %v6409_v22 = vpop.permute.xlu1 %741  ;;  %v6411_v34 = vpop.permute.xlu2 %731 }
 0x1a3   : > { %8483 = vst [vmem:[#allocation55_spill] sm:$0xff] %v6411_v34  ;;  %v1227_v34 = vmul.f32 %v6308_v48, %v6050_v10 }
 0x1a6   : > { %959 = vrot.lane.b32.xlu0 %v919_v56, %s5845_s6  ;;  %v1234_v56 = vmul.f32 %v6282_v28, %v6053_v11 }
 0x1a8   : > { %1151 = vrot.lane.b32.xlu1 %v1120_v37, %s5847_s11  ;;  %1147 = vrot.lane.b32.xlu2 %v1118_v63, %s5847_s11  ;;  %v6422_v50 = vpop.permute.xlu0 %834 }
 0x1a9   : > { %8484 = vst [vmem:[#allocation56_spill] sm:$0xff] %v6422_v50 }
 0x1aa   : > { %v6424_v2 = vpop.permute.xlu1 %745  ;;  %v6426_v60 = vpop.permute.xlu2 %848 }
 0x1ab   : > { %8485 = vst [vmem:[#allocation57_spill] sm:$0xff] %v6424_v2 }
 0x1ac   : > { %8486 = vst [vmem:[#allocation58_spill] sm:$0xff] %v6426_v60  ;;  %v1349_v60 = vmul.f32 %v6284_v30, %v6053_v11 }
 0x1ae   : > { %1262 = vrot.lane.b32.xlu0 %v1227_v34, %s5848_s25  ;;  %v703_v34 = vmul.f32 %v6106_v40, %v6065_v17  ;;  %v815_v40 = vmul.f32 %v6114_v44, %v6065_v17  ;;  %v1225_v44 = vmul.f32 %v6308_v48, %v6071_v19 }
 0x1b0   : > { %1276 = vrot.lane.b32.xlu1 %v1234_v56, %s5848_s25  ;;  %1153 = vrot.lane.b32.xlu2 %v1121_v43, %s5847_s11  ;;  %v6437_v37 = vpop.permute.xlu0 %951  ;;  %v1235_v56 = vmul.f32 %v6282_v28, %v6050_v10 }
 0x1b2   : > { %v6439_v63 = vpop.permute.xlu1 %729  ;;  %v6441_v2 = vpop.permute.xlu2 %832 }
 0x1b3   : > { %8487 = vst [vmem:[#allocation59_spill] sm:$0xff] %v6439_v63 }
 0x1b4   : > { %8488 = vst [vmem:[#allocation60_spill] sm:$0xff] %v6441_v2  ;;  %v808_v2 = vmul.f32 %v6143_v59, %v6065_v17 }
 0x1b6   : > { %1391 = vrot.lane.b32.xlu0 %v1349_v60, %s5849_s26  ;;  %v802_v60 = vmul.f32 %v6143_v59, %v6056_v12  ;;  %v914_v59 = vmul.f32 %v6122_v49, %v6056_v12 }
 0x1b8   : > { %737 = vrot.lane.b32.xlu1 %v703_v34, %s5837_s22  ;;  %1278 = vrot.lane.b32.xlu2 %v1235_v56, %s5848_s25  ;;  %v6452_v43 = vpop.permute.xlu0 %957 }
 0x1b9   : > { %8489 = vst [vmem:[#allocation61_spill] sm:$0xff] %v6452_v43 }
 0x1ba   : > { %v6454_v50 = vpop.permute.xlu1 %846  ;;  %v6456_v63 = vpop.permute.xlu2 %838 }
 0x1bb   : > { %8490 = vst [vmem:[#allocation62_spill] sm:$0xff] %v6456_v63  ;;  %v920_v63 = vmul.f32 %v6122_v49, %v6065_v17  ;;  %v1226_v49 = vmul.f32 %v6308_v48, %v6053_v11 }
 0x1be   : > { %842 = vrot.lane.b32.xlu0 %v808_v2, %s5844_s27 }
 0x1c0   : > { %856 = vrot.lane.b32.xlu1 %v815_v40, %s5844_s27  ;;  %830 = vrot.lane.b32.xlu2 %v802_v60, %s5844_s27  ;;  %v6467_v34 = vpop.permute.xlu0 %941 }
 0x1c1   : > { %8491 = vst [vmem:[#allocation63_spill] sm:$0xff] %v6467_v34  ;;  %v1348_v34 = vmul.f32 %v6284_v30, %v6071_v19 }
 0x1c2   : > { %v6469_v56 = vpop.permute.xlu1 %852  ;;  %v6471_v43 = vpop.permute.xlu2 %955 }
 0x1c3   : > { %8492 = vst [vmem:[#allocation64_spill] sm:$0xff] %v6469_v56  ;;  %v912_v56 = vmul.f32 %v6159_v5, %v6068_v18 }
 0x1c4   : > { %8493 = vst [vmem:[#allocation65_spill] sm:$0xff] %v6471_v43  ;;  %v1340_v43 = vmul.f32 %v6325_v25, %v6071_v19 }
 0x1c6   : > { %961 = vrot.lane.b32.xlu0 %v920_v63, %s5845_s6  ;;  %v1228_v63 = vmul.f32 %v6308_v48, %v6080_v24 }
 0x1c8   : > { %1258 = vrot.lane.b32.xlu1 %v1225_v44, %s5848_s25  ;;  %949 = vrot.lane.b32.xlu2 %v914_v59, %s5845_s6  ;;  %v6482_v2 = vpop.permute.xlu0 %1058 }
 0x1c9   : > { %8494 = vst [vmem:[#allocation66_spill] sm:$0xff] %v6482_v2 }
 0x1ca   : > { %v6484_v40 = vpop.permute.xlu1 %836  ;;  %v6486_v60 = vpop.permute.xlu2 %939 }
 0x1cb   : > { %8495 = vst [vmem:[#allocation67_spill] sm:$0xff] %v6484_v40  ;;  %v1465_v40 = vmul.f32 %v6304_v47, %v6050_v10 }
 0x1cc   : > { %8496 = vst [vmem:[#allocation68_spill] sm:$0xff] %v6486_v60  ;;  %v1343_v60 = vmul.f32 %v6325_v25, %v6080_v24 }
 0x1ce   : > { %1373 = vrot.lane.b32.xlu0 %v1340_v43, %s5849_s26  ;;  %v1350_v43 = vmul.f32 %v6284_v30, %v6050_v10 }
 0x1d0   : > { %1264 = vrot.lane.b32.xlu1 %v1228_v63, %s5848_s25  ;;  %1260 = vrot.lane.b32.xlu2 %v1226_v49, %s5848_s25  ;;  %v6497_v44 = vpop.permute.xlu0 %739 }
 0x1d2   : > { %v6499_v59 = vpop.permute.xlu1 %953  ;;  %v6501_v2 = vpop.permute.xlu2 %1056 }
 0x1d3   : > { %8497 = vst [vmem:[#allocation69_spill] sm:$0xff] %v6499_v59 }
 0x1d4   : > { %8498 = vst [vmem:[#allocation70_spill] sm:$0xff] %v6501_v2 }
 0x1d6   : > { %1379 = vrot.lane.b32.xlu0 %v1343_v60, %s5849_s26  ;;  %v907_v60 = vmul.f32 %v6159_v5, %v6056_v12 }
 0x1d8   : > { %1393 = vrot.lane.b32.xlu1 %v1350_v43, %s5849_s26  ;;  %1389 = vrot.lane.b32.xlu2 %v1348_v34, %s5849_s26  ;;  %v6512_v63 = vpop.permute.xlu0 %1044  ;;  %v1351_v43 = vmul.f32 %v6284_v30, %v6080_v24 }
 0x1d9   : > { %8499 = vst [vmem:[#allocation71_spill] sm:$0xff] %v6512_v63 }
 0x1da   : > { %v6514_v49 = vpop.permute.xlu1 %937  ;;  %v6516_v59 = vpop.permute.xlu2 %1062 }
 0x1db   : > { %8500 = vst [vmem:[#allocation72_spill] sm:$0xff] %v6514_v49 }
 0x1dc   : > { %8501 = vst [vmem:[#allocation73_spill] sm:$0xff] %v6516_v59  ;;  %v1012_v59 = vmul.f32 %v6132_v54, %v6056_v12 }
 0x1de   : > { %1508 = vrot.lane.b32.xlu0 %v1465_v40, %s5850_s29  ;;  %v1019_v40 = vmul.f32 %v6150_v62, %v6056_v12 }
 0x1e0   : > { %935 = vrot.lane.b32.xlu1 %v907_v60, %s5845_s6  ;;  %1395 = vrot.lane.b32.xlu2 %v1351_v43, %s5849_s26  ;;  %v6527_v34 = vpop.permute.xlu0 %1161 }
 0x1e1   : > { %8502 = vst [vmem:[#allocation74_spill] sm:$0xff] %v6527_v34 }
 0x1e2   : > { %v6529_v63 = vpop.permute.xlu1 %943  ;;  %v6531_v49 = vpop.permute.xlu2 %1042 }
 0x1e3   : > { %8503 = vst [vmem:[#allocation75_spill] sm:$0xff] %v6529_v63  ;;  %v1124_v63 = vmul.f32 %v6161_v6, %v6056_v12 }
 0x1e4   : > { %8504 = vst [vmem:[#allocation76_spill] sm:$0xff] %v6531_v49 }
 0x1e6   : > { %1040 = vrot.lane.b32.xlu0 %v1012_v59, %s5846_s23  ;;  %v1341_v59 = vmul.f32 %v6325_v25, %v6053_v11 }
 0x1e8   : > { %1054 = vrot.lane.b32.xlu1 %v1019_v40, %s5846_s23  ;;  %945 = vrot.lane.b32.xlu2 %v912_v56, %s5845_s6  ;;  %v6542_v60 = vpop.permute.xlu0 %1167 }
 0x1e9   : > { %8505 = vst [vmem:[#allocation77_spill] sm:$0xff] %v6542_v60  ;;  %v1456_v60 = vmul.f32 %v6297_v39, %v6053_v11 }
 0x1ea   : > { %v6544_v43 = vpop.permute.xlu1 %1060  ;;  %v6546_v49 = vpop.permute.xlu2 %1048 }
 0x1eb   : > { %8506 = vst [vmem:[#allocation78_spill] sm:$0xff] %v6544_v43 }
 0x1ec   : > { %8507 = vst [vmem:[#allocation79_spill] sm:$0xff] %v6546_v49  ;;  %v1463_v49 = vmul.f32 %v6304_v47, %v6071_v19 }
 0x1ee   : > { %1159 = vrot.lane.b32.xlu0 %v1124_v63, %s5847_s11  ;;  %v1342_v63 = vmul.f32 %v6325_v25, %v6050_v10  ;;  %v1017_v25 = vmul.f32 %v6132_v54, %v6068_v18 }
 0x1f0   : > { %1375 = vrot.lane.b32.xlu1 %v1341_v59, %s5849_s26  ;;  %1064 = vrot.lane.b32.xlu2 %v1024_v36, %s5846_s23  ;;  %v6557_v56 = vpop.permute.xlu0 %844 }
 0x1f2   : > { %v6559_v40 = vpop.permute.xlu1 %749  ;;  %v6561_v43 = vpop.permute.xlu2 %1165 }
 0x1f3   : > { %8508 = vst [vmem:[#allocation80_spill] sm:$0xff] %v6559_v40  ;;  %v1578_v40 = vmul.f32 %v6341_v52, %v6071_v19 }
 0x1f4   : > { %8509 = vst [vmem:[#allocation81_spill] sm:$0xff] %v6561_v43 }
 0x1f6   : > { %1490 = vrot.lane.b32.xlu0 %v1456_v60, %s5850_s29  ;;  %v1464_v60 = vmul.f32 %v6304_v47, %v6053_v11 }
 0x1f8   : > { %1377 = vrot.lane.b32.xlu2 %v1342_v63, %s5849_s26  ;;  %1504 = vrot.lane.b32.xlu1 %v1463_v49, %s5850_s29  ;;  %v6572_v36 = vpop.permute.xlu0 %1149  ;;  %v1466_v63 = vmul.f32 %v6304_v47, %v6080_v24 }
 0x1f9   : > { %8510 = vst [vmem:[#allocation82_spill] sm:$0xff] %v6572_v36 }
 0x1fa   : > { %v6574_v59 = vpop.permute.xlu1 %1046  ;;  %v6576_v43 = vpop.permute.xlu2 %751 }
 0x1fb   : > { %8511 = vst [vmem:[#allocation83_spill] sm:$0xff] %v6574_v59  ;;  %v1581_v59 = vmul.f32 %v6341_v52, %v6080_v24 }
 0x1fc   : > { %8512 = vst [vmem:[#allocation84_spill] sm:$0xff] %v6576_v43 }
 0x1fe   : > { %1619 = vrot.lane.b32.xlu0 %v1578_v40, %s5851_s3  ;;  %v913_v40 = vmul.f32 %v6159_v5, %v6065_v17  ;;  %v1025_v5 = vmul.f32 %v6150_v62, %v6065_v17  ;;  %v1455_v62 = vmul.f32 %v6297_v39, %v6071_v19 }
 0x200   : > { %1506 = vrot.lane.b32.xlu2 %v1464_v60, %s5850_s29  ;;  %1510 = vrot.lane.b32.xlu1 %v1466_v63, %s5850_s29  ;;  %v6587_v49 = vpop.permute.xlu0 %1274 }
 0x201   : > { %8513 = vst [vmem:[#allocation85_spill] sm:$0xff] %v6587_v49  ;;  %v1122_v49 = vmul.f32 %v6140_v58, %v6068_v18 }
 0x202   : > { %v6589_v36 = vpop.permute.xlu1 %1163  ;;  %v6591_v43 = vpop.permute.xlu2 %1147 }
 0x203   : > { %8514 = vst [vmem:[#allocation86_spill] sm:$0xff] %v6589_v36 }
 0x204   : > { %8515 = vst [vmem:[#allocation87_spill] sm:$0xff] %v6591_v43 }
 0x206   : > { %1625 = vrot.lane.b32.xlu0 %v1581_v59, %s5851_s3  ;;  %v1129_v59 = vmul.f32 %v6161_v6, %v6068_v18 }
 0x208   : > { %947 = vrot.lane.b32.xlu2 %v913_v40, %s5845_s6  ;;  %1050 = vrot.lane.b32.xlu1 %v1017_v25, %s5846_s23  ;;  %v6602_v60 = vpop.permute.xlu0 %1280 }
 0x209   : > { %8516 = vst [vmem:[#allocation88_spill] sm:$0xff] %v6602_v60  ;;  %v1237_v60 = vmul.f32 %v6282_v28, %v6068_v18 }
 0x20a   : > { %v6604_v63 = vpop.permute.xlu1 %735  ;;  %v6606_v36 = vpop.permute.xlu2 %1153 }
 0x20b   : > { %8517 = vst [vmem:[#allocation89_spill] sm:$0xff] %v6606_v36  ;;  %v1572_v36 = vmul.f32 %v6319_v7, %v6050_v10 }
 0x20e   : > { %1155 = vrot.lane.b32.xlu0 %v1122_v49, %s5847_s11  ;;  %v1457_v49 = vmul.f32 %v6297_v39, %v6050_v10 }
 0x210   : > { %1066 = vrot.lane.b32.xlu2 %v1025_v5, %s5846_s23  ;;  %1169 = vrot.lane.b32.xlu1 %v1129_v59, %s5847_s11  ;;  %v6617_v25 = vpop.permute.xlu0 %840 }
 0x212   : > { %v6619_v40 = vpop.permute.xlu1 %854  ;;  %v6621_v43 = vpop.permute.xlu2 %1278 }
 0x213   : > { %8518 = vst [vmem:[#allocation90_spill] sm:$0xff] %v6619_v40  ;;  %v1579_v40 = vmul.f32 %v6341_v52, %v6053_v11 }
 0x214   : > { %8519 = vst [vmem:[#allocation91_spill] sm:$0xff] %v6621_v43 }
 0x216   : > { %1282 = vrot.lane.b32.xlu0 %v1237_v60, %s5848_s25  ;;  %v1458_v60 = vmul.f32 %v6297_v39, %v6080_v24 }
 0x218   : > { %1488 = vrot.lane.b32.xlu2 %v1455_v62, %s5850_s29  ;;  %1492 = vrot.lane.b32.xlu1 %v1457_v49, %s5850_s29  ;;  %v6632_v5 = vpop.permute.xlu0 %959 }
 0x219   : > { %8520 = vst [vmem:[#allocation92_spill] sm:$0xff] %v6632_v5  ;;  %v1238_v5 = vmul.f32 %v6282_v28, %v6065_v17 }
 0x21a   : > { %v6634_v59 = vpop.permute.xlu1 %1151  ;;  %v6636_v43 = vpop.permute.xlu2 %830 }
 0x21b   : > { %8521 = vst [vmem:[#allocation93_spill] sm:$0xff] %v6634_v59 }
 0x21c   : > { %8522 = vst [vmem:[#allocation94_spill] sm:$0xff] %v6636_v43  ;;  %v1694_v43 = vmul.f32 %v6360_v35, %v6053_v11 }
 0x21e   : > { %1607 = vrot.lane.b32.xlu0 %v1572_v36, %s5851_s3  ;;  %v1580_v36 = vmul.f32 %v6341_v52, %v6050_v10 }
 0x220   : > { %1494 = vrot.lane.b32.xlu2 %v1458_v60, %s5850_s29  ;;  %1621 = vrot.lane.b32.xlu1 %v1579_v40, %s5851_s3  ;;  %v6647_v62 = vpop.permute.xlu0 %1262  ;;  %v1018_v60 = vmul.f32 %v6132_v54, %v6065_v17  ;;  %v1130_v54 = vmul.f32 %v6161_v6, %v6065_v17  ;;  %v1570_v6 = vmul.f32 %v6319_v7, %v6071_v19 }
 0x221   : > { %8523 = vst [vmem:[#allocation95_spill] sm:$0xff] %v6647_v62 }
 0x222   : > { %v6649_v49 = vpop.permute.xlu1 %1276  ;;  %v6651_v59 = vpop.permute.xlu2 %949 }
 0x223   : > { %8524 = vst [vmem:[#allocation96_spill] sm:$0xff] %v6649_v49 }
 0x226   : > { %1736 = vrot.lane.b32.xlu0 %v1694_v43, %s5852_s15  ;;  %v1117_v43 = vmul.f32 %v6140_v58, %v6056_v12 }
 0x228   : > { %1623 = vrot.lane.b32.xlu2 %v1580_v36, %s5851_s3  ;;  %1052 = vrot.lane.b32.xlu1 %v1018_v60, %s5846_s23  ;;  %v6662_v40 = vpop.permute.xlu0 %1391 }
 0x229   : > { %8525 = vst [vmem:[#allocation97_spill] sm:$0xff] %v6662_v40  ;;  %v1224_v40 = vmul.f32 %v6308_v48, %v6056_v12 }
 0x22a   : > { %v6664_v49 = vpop.permute.xlu1 %737  ;;  %v6666_v62 = vpop.permute.xlu2 %1260 }
 0x22b   : > { %8526 = vst [vmem:[#allocation98_spill] sm:$0xff] %v6664_v49 }
 0x22c   : > { %8527 = vst [vmem:[#allocation99_spill] sm:$0xff] %v6666_v62 }
 0x22e   : > { %1284 = vrot.lane.b32.xlu0 %v1238_v5, %s5848_s25  ;;  %v1232_v5 = vmul.f32 %v6282_v28, %v6056_v12 }
 0x230   : > { %1145 = vrot.lane.b32.xlu2 %v1117_v43, %s5847_s11  ;;  %1171 = vrot.lane.b32.xlu1 %v1130_v54, %s5847_s11  ;;  %v6677_v36 = vpop.permute.xlu0 %842 }
 0x231   : > { %8528 = vst [vmem:[#allocation100_spill] sm:$0xff] %v6677_v36  ;;  %v1573_v36 = vmul.f32 %v6319_v7, %v6080_v24 }
 0x232   : > { %v6679_v60 = vpop.permute.xlu1 %856  ;;  %v6681_v52 = vpop.permute.xlu2 %1389 }
 0x233   : > { %8529 = vst [vmem:[#allocation101_spill] sm:$0xff] %v6679_v60  ;;  %v1352_v60 = vmul.f32 %v6284_v30, %v6068_v18 }
 0x234   : > { %8530 = vst [vmem:[#allocation102_spill] sm:$0xff] %v6681_v52 }
 0x236   : > { %1256 = vrot.lane.b32.xlu0 %v1224_v40, %s5848_s25  ;;  %v1571_v40 = vmul.f32 %v6319_v7, %v6053_v11 }
 0x238   : > { %1272 = vrot.lane.b32.xlu2 %v1232_v5, %s5848_s25  ;;  %1603 = vrot.lane.b32.xlu1 %v1570_v6, %s5851_s3  ;;  %v6692_v43 = vpop.permute.xlu0 %961 }
 0x239   : > { %8531 = vst [vmem:[#allocation103_spill] sm:$0xff] %v6692_v43  ;;  %v1695_v43 = vmul.f32 %v6360_v35, %v6050_v10 }
 0x23a   : > { %v6694_v54 = vpop.permute.xlu1 %1258  ;;  %v6696_v52 = vpop.permute.xlu2 %1395 }
 0x23b   : > { %8532 = vst [vmem:[#allocation104_spill] sm:$0xff] %v6694_v54  ;;  %v1687_v54 = vmul.f32 %v6336_v41, %v6050_v10 }
 0x23c   : > { %8533 = vst [vmem:[#allocation105_spill] sm:$0xff] %v6696_v52 }
 0x23e   : > { %1397 = vrot.lane.b32.xlu0 %v1352_v60, %s5849_s26  ;;  %v1693_v60 = vmul.f32 %v6360_v35, %v6071_v19 }
 0x240   : > { %1605 = vrot.lane.b32.xlu2 %v1571_v40, %s5851_s3  ;;  %1609 = vrot.lane.b32.xlu1 %v1573_v36, %s5851_s3  ;;  %v6707_v5 = vpop.permute.xlu0 %1373 }
 0x241   : > { %8534 = vst [vmem:[#allocation106_spill] sm:$0xff] %v6707_v5  ;;  %v1809_v5 = vmul.f32 %v6317_v0, %v6053_v11 }
 0x242   : > { %v6709_v6 = vpop.permute.xlu1 %1264  ;;  %v6711_v52 = vpop.permute.xlu2 %945 }
 0x243   : > { %8535 = vst [vmem:[#allocation107_spill] sm:$0xff] %v6709_v6 }
 0x244   : > { %8536 = vst [vmem:[#allocation108_spill] sm:$0xff] %v6711_v52 }
 0x246   : > { %1722 = vrot.lane.b32.xlu0 %v1687_v54, %s5852_s15  ;;  %v6731_v54 = vperm.slane %v6047_v9, 7 }
 0x248   : > { %1734 = vrot.lane.b32.xlu2 %v1693_v60, %s5852_s15  ;;  %1738 = vrot.lane.b32.xlu1 %v1695_v43, %s5852_s15  ;;  %v6722_v36 = vpop.permute.xlu0 %1379  ;;  %8540 = vst [vmem:[#allocation112_spill] sm:$0xff] %v6731_v54  ;;  %v1696_v60 = vmul.f32 %v6360_v35, %v6080_v24  ;;  %v1239_v43 = vmul.f32 %v6731_v54, %v6282_v28 }
 0x249   : > { %8537 = vst [vmem:[#allocation109_spill] sm:$0xff] %v6722_v36  ;;  %v1230_v28 = vmul.f32 %v6308_v48, %v6065_v17 }
 0x24a   : > { %v6724_v40 = vpop.permute.xlu1 %1393  ;;  %v6726_v6 = vpop.permute.xlu2 %1064 }
 0x24b   : > { %8538 = vst [vmem:[#allocation110_spill] sm:$0xff] %v6724_v40  ;;  %v458_v40 = vmul.f32 %v6056_v12, %v6364_v55 }
 0x24c   : > { %8539 = vst [vmem:[#allocation111_spill] sm:$0xff] %v6726_v6 }
 0x24e   : > { %1851 = vrot.lane.b32.xlu0 %v1809_v5, %s5853_s18  ;;  %v550_v5 = vsel %vm543_vm0, %v6174_v16, %v6192_v27  ;;  %v760_v16 = vsel %vm753_vm2, %v6497_v44, %v6409_v22  ;;  %v970_v44 = vsel %vm963_vm4, %v6651_v59, %v6437_v37 }
 0x24f   : > { %v577_v35 = vadd.f32 %v550_v5, %v458_v40 }
 0x250   : > { %1740 = vrot.lane.b32.xlu2 %v1696_v60, %s5852_s15  ;;  %1286 = vrot.lane.b32.xlu1 %v1239_v43, %s5848_s25  ;;  %v6742_v36 = vpop.permute.xlu0 %1508  ;;  %v1123_v60 = vmul.f32 %v6140_v58, %v6065_v17  ;;  %v1229_v43 = vmul.f32 %v6308_v48, %v6068_v18  ;;  %v865_v58 = vsel %vm858_vm3, %v6557_v56, %v6454_v50 }
 0x251   : > { %8541 = vst [vmem:[#allocation113_spill] sm:$0xff] %v6742_v36  ;;  %v655_v36 = vsel %vm648_vm1, %v6250_v51, %v6254_v53  ;;  %v1347_v56 = vmul.f32 %v6284_v30, %v6056_v12 }
 0x252   : > { %v6744_v9 = vpop.permute.xlu1 %935  ;;  %v6746_v62 = vpop.permute.xlu2 %1377  ;;  %v682_v40 = vadd.f32 %v655_v36, %v577_v35  ;;  %v1354_v36 = vmul.f32 %v6284_v30, %v6731_v54 }
 0x253   : > { %8542 = vst [vmem:[#allocation114_spill] sm:$0xff] %v6746_v62 }
 0x256   : > { %1268 = vrot.lane.b32.xlu0 %v1230_v28, %s5848_s25  ;;  %v787_v28 = vadd.f32 %v760_v16, %v682_v40  ;;  %v1685_v16 = vmul.f32 %v6336_v41, %v6071_v19 }
 0x258   : > { %1157 = vrot.lane.b32.xlu2 %v1123_v60, %s5847_s11  ;;  %1266 = vrot.lane.b32.xlu1 %v1229_v43, %s5848_s25  ;;  %v6766_v5 = vpop.permute.xlu0 %1040  ;;  %v892_v35 = vadd.f32 %v865_v58, %v787_v28  ;;  %s5090_s11 = scalar_lea.hbm %s8317_s9, %s5927_s13  ;;  %s5755_s13 = scalar_lea.hbm %s8317_s9, 2 }
 0x25a   : > { %v1055_v62 = vpop.permute.xlu1 %1054  ;;  %v6771_v51 = vpop.permute.xlu2 %1506  ;;  %v997_v43 = vadd.f32 %v970_v44, %v892_v35  ;;  %v1462_v35 = vmul.f32 %v6304_v47, %v6056_v12 }
 0x25b   : > { %8543 = vst [vmem:[#allocation115_spill] sm:$0xff] %v6771_v51  ;;  %v1075_v60 = vsel %vm1068_vm5, %v1055_v62, %v6501_v2  ;;  %v8568_v2 = vld [vmem:[#allocation79_spill] sm:$0xff] }
 0x25c   : > { %v1102_v40 = vadd.f32 %v1075_v60, %v997_v43  ;;  %v1688_v60 = vmul.f32 %v6336_v41, %v6080_v24 }
 0x25e   : > { %1401 = vrot.lane.b32.xlu0 %v1354_v36, %s5849_s26  ;;  %v1686_v36 = vmul.f32 %v6336_v41, %v6053_v11 }
 0x260   : > { %1387 = vrot.lane.b32.xlu2 %v1347_v56, %s5849_s26  ;;  %1718 = vrot.lane.b32.xlu1 %v1685_v16, %s5852_s15  ;;  %v1160_v59 = vpop.permute.xlu0 %1159 }
 0x261   : > { %v1180_v58 = vsel %vm1173_vm6, %v1160_v59, %v6527_v34  ;;  %v1808_v59 = vmul.f32 %v6317_v0, %v6071_v19  ;;  %v8566_v34 = vld [vmem:[#allocation80_spill] sm:$0xff] }
 0x262   : > { %v6789_v62 = vadd.f32 %v1180_v58, %v1102_v40  ;;  %v6791_v28 = vpop.permute.xlu1 %1375  ;;  %v6793_v44 = vpop.permute.xlu2 %947  ;;  %v1801_v40 = vmul.f32 %v6379_v45, %v6053_v11  ;;  %v1810_v58 = vmul.f32 %v6317_v0, %v6050_v10 }
 0x263   : > { %8544 = vst [vmem:[#allocation116_spill] sm:$0xff] %v6793_v44 }
 0x266   : > { %1502 = vrot.lane.b32.xlu0 %v1462_v35, %s5850_s29  ;;  %v455_v35 = vmul.f32 %v6080_v24, %v6349_v15 }
 0x268   : > { %1720 = vrot.lane.b32.xlu2 %v1686_v36, %s5852_s15  ;;  %1724 = vrot.lane.b32.xlu1 %v1688_v60, %s5852_s15  ;;  %v6804_v43 = vpop.permute.xlu0 %1490 }
 0x26a   : > { %v6806_v56 = vpop.permute.xlu1 %1504  ;;  %v6808_v16 = vpop.permute.xlu2 %1066 }
 0x26b   : > { %8545 = vst [vmem:[#allocation117_spill] sm:$0xff] %v6806_v56 }
 0x26c   : > { %8546 = vst [vmem:[#allocation118_spill] sm:$0xff] %v6808_v16  ;;  %v544_v16 = vsel %vm543_vm0, %v6147_v61, %v6156_v1  ;;  %v6853_v61 = vsel %vm543_vm0, %v6181_v21, %v6179_v20 }
 0x26e   : > { %1835 = vrot.lane.b32.xlu0 %v1801_v40, %s5853_s18  ;;  %v548_v40 = vsel %vm543_vm0, %v6164_v8, %v6181_v21  ;;  %v6875_v21 = vsel %vm543_vm0, %v6203_v3, %v6196_v29  ;;  %v6901_v29 = vsel %vm648_vm1, %v6218_v4, %v6224_v38 }
 0x270   : > { %1849 = vrot.lane.b32.xlu2 %v1808_v59, %s5853_s18  ;;  %1853 = vrot.lane.b32.xlu1 %v1810_v58, %s5853_s18  ;;  %v6821_v36 = vpop.permute.xlu0 %1619  ;;  %v6836_v59 = vsel %vm543_vm0, %v6168_v13, %v6164_v8  ;;  %v574_v58 = vadd.f32 %v548_v40, %v455_v35  ;;  %v6858_v8 = vsel %vm543_vm0, %v6190_v26, %v6185_v23 }
 0x271   : > { %8547 = vst [vmem:[#allocation119_spill] sm:$0xff] %v6821_v36  ;;  %v1923_v36 = vmul.f32 %v6351_v32, %v6071_v19  ;;  %v462_v35 = vmul.f32 %v6080_v24, %v6364_v55  ;;  %v649_v40 = vsel %vm648_vm1, %v6209_v33, %v6218_v4  ;;  %v8553_v33 = vld [vmem:[#allocation62_spill] sm:$0xff]  ;;  %v451_v4 = vmul.f32 %v6056_v12, %v6349_v15 }
 0x272   : > { %v6823_v60 = vpop.permute.xlu1 %1510  ;;  %v6825_v41 = vpop.permute.xlu2 %1488 }
 0x273   : > { %8548 = vst [vmem:[#allocation120_spill] sm:$0xff] %v6823_v60  ;;  %v6843_v60 = vsel %vm543_vm0, %v6156_v1, %v6170_v14  ;;  %v6863_v1 = vsel %vm543_vm0, %v6192_v27, %v6190_v26  ;;  %v6880_v26 = vsel %vm543_vm0, %v6185_v23, %v6205_v31  ;;  %v653_v27 = vsel %vm648_vm1, %v6233_v42, %v6239_v46 }
 0x274   : > { %8549 = vst [vmem:[#allocation121_spill] sm:$0xff] %v6825_v41  ;;  %v6848_v41 = vsel %vm543_vm0, %v6170_v14, %v6168_v13  ;;  %v1811_v13 = vmul.f32 %v6317_v0, %v6080_v24  ;;  %v1231_v14 = vmul.f32 %v6731_v54, %v6308_v48  ;;  %v554_v48 = vsel %vm543_vm0, %v6205_v31, %v6203_v3 }
 0x275   : > { %8550 = vst [vmem:[#allocation122_spill] sm:$0xff] %v6880_v26  ;;  %v679_v0 = vadd.f32 %v653_v27, %v574_v58  ;;  %v863_v58 = vsel %vm858_vm3, %v8553_v33, %v6617_v25  ;;  %v581_v27 = vadd.f32 %v554_v48, %v462_v35  ;;  %v8558_v33 = vld [vmem:[#allocation34_spill] sm:$0xff] }
 0x276   : > { %1964 = vrot.lane.b32.xlu0 %v1923_v36, %s5854_s1  ;;  %v758_v36 = vsel %vm753_vm2, %v6392_v57, %v6604_v63  ;;  %v8552_v57 = vld [vmem:[#allocation30_spill] sm:$0xff] }
 0x277   : > { %v6906_v3 = vsel %vm648_vm1, %v6224_v38, %v8552_v57  ;;  %v6911_v31 = vsel %vm648_vm1, %v8552_v57, %v6233_v42  ;;  %v784_v38 = vadd.f32 %v758_v36, %v679_v0  ;;  %v8557_v42 = vld [vmem:[#allocation32_spill] sm:$0xff]  ;;  %v8562_v0 = vld [vmem:[#allocation75_spill] sm:$0xff]  ;;  %v8563_v36 = vld [vmem:[#allocation33_spill] sm:$0xff] }
 0x278   : > { %1855 = vrot.lane.b32.xlu2 %v1811_v13, %s5853_s18  ;;  %1270 = vrot.lane.b32.xlu1 %v1231_v14, %s5848_s25  ;;  %v6896_v23 = vpop.permute.xlu0 %1625  ;;  %v8554_v13 = vld [vmem:[#allocation31_spill] sm:$0xff]  ;;  %v6930_v57 = vsel %vm648_vm1, %v6254_v53, %v8557_v42  ;;  %v6935_v51 = vsel %vm648_vm1, %v8557_v42, %v8558_v33  ;;  %v968_v35 = vsel %vm963_vm4, %v8562_v0, %v6711_v52  ;;  %v8564_v53 = vld [vmem:[#allocation36_spill] sm:$0xff] }
 0x279   : > { %8551 = vst [vmem:[#allocation123_spill] sm:$0xff] %v6896_v23  ;;  %v6919_v14 = vsel %vm648_vm1, %v6239_v46, %v8554_v13  ;;  %v8560_v46 = vld [vmem:[#allocation35_spill] sm:$0xff]  ;;  %v889_v42 = vadd.f32 %v863_v58, %v784_v38  ;;  %v1468_v52 = vmul.f32 %v6304_v47, %v6065_v17  ;;  %v8569_v38 = vld [vmem:[#allocation41_spill] sm:$0xff] }
 0x27a   : > { %v6923_v23 = vpop.permute.xlu1 %1050  ;;  %v6925_v56 = vpop.permute.xlu2 %1494  ;;  %8559 = vst [vmem:[#allocation32_spill] sm:$0xff] %v6935_v51  ;;  %v6940_v44 = vsel %vm648_vm1, %v8558_v33, %v8560_v46  ;;  %v659_v48 = vsel %vm648_vm1, %v8560_v46, %v8563_v36  ;;  %v1926_v51 = vmul.f32 %v6351_v32, %v6080_v24  ;;  %v8567_v33 = vld [vmem:[#allocation53_spill] sm:$0xff]  ;;  %v1353_v46 = vmul.f32 %v6284_v30, %v6065_v17  ;;  %v8570_v24 = vld [vmem:[#allocation90_spill] sm:$0xff] }
 0x27b   : > { %8555 = vst [vmem:[#allocation30_spill] sm:$0xff] %v6923_v23  ;;  %v1073_v0 = vsel %vm1068_vm5, %v8568_v2, %v6923_v23  ;;  %v994_v58 = vadd.f32 %v968_v35, %v889_v42  ;;  %v1467_v2 = vmul.f32 %v6304_v47, %v6068_v18  ;;  %v6975_v30 = vmul.f32 %v6297_v39, %v6068_v18  ;;  %v8575_v42 = vld [vmem:[#allocation37_spill] sm:$0xff]  ;;  %v8576_v23 = vld [vmem:[#allocation92_spill] sm:$0xff] }
 0x27c   : > { %8556 = vst [vmem:[#allocation31_spill] sm:$0xff] %v6925_v56  ;;  %v6951_v56 = vsel %vm648_vm1, %v8563_v36, %v8564_v53  ;;  %v570_v36 = vadd.f32 %v544_v16, %v451_v4  ;;  %v686_v53 = vadd.f32 %v659_v48, %v581_v27  ;;  %v6979_v16 = vmul.f32 %v6304_v47, %v6731_v54  ;;  %v8574_v48 = vld [vmem:[#allocation48_spill] sm:$0xff] }
 0x27d   : > { %8561 = vst [vmem:[#allocation34_spill] sm:$0xff] %v6940_v44  ;;  %v764_v44 = vsel %vm753_vm2, %v8567_v33, %v8566_v34  ;;  %v8571_v33 = vld [vmem:[#allocation64_spill] sm:$0xff]  ;;  %v1099_v27 = vadd.f32 %v1073_v0, %v994_v58  ;;  %vm2276_vm1 = vcmask 130048  }
 0x27e   : > { %8565 = vst [vmem:[#allocation35_spill] sm:$0xff] %v6951_v56  ;;  %1970 = vrot.lane.b32.xlu0 %v1926_v51, %s5854_s1  ;;  %v1339_v56 = vmul.f32 %v8569_v38, %v6056_v12  ;;  %v869_v34 = vsel %vm858_vm3, %v8571_v33, %v8570_v24  ;;  %v453_v51 = vmul.f32 %v6053_v11, %v6349_v15  ;;  %v8577_v24 = vld [vmem:[#allocation61_spill] sm:$0xff] }
 0x27f   : > { %8572 = vst [vmem:[#allocation33_spill] sm:$0xff] %v6979_v16  ;;  %v791_v4 = vadd.f32 %v764_v44, %v686_v53  ;;  %v754_v33 = vsel %vm753_vm2, %v8575_v42, %v8574_v48  ;;  %v974_v47 = vsel %vm963_vm4, %v8577_v24, %v8576_v23  ;;  %v8578_v16 = vld [vmem:[#allocation89_spill] sm:$0xff]  ;;  %v6998_v44 = vmul.f32 %v6297_v39, %v6731_v54  ;;  %v8582_v23 = vld [vmem:[#allocation60_spill] sm:$0xff] }
 0x280   : > { %1399 = vrot.lane.b32.xlu2 %v1353_v46, %s5849_s26  ;;  %1371 = vrot.lane.b32.xlu1 %v1339_v56, %s5849_s26  ;;  %v6985_v35 = vpop.permute.xlu0 %1155  ;;  %v675_v0 = vadd.f32 %v649_v40, %v570_v36  ;;  %v454_v56 = vmul.f32 %v6050_v10, %v6349_v15  ;;  %v452_v24 = vmul.f32 %v6071_v19, %v6349_v15  ;;  %v8584_v36 = vld [vmem:[#allocation73_spill] sm:$0xff] }
 0x281   : > { %8573 = vst [vmem:[#allocation41_spill] sm:$0xff] %v6985_v35  ;;  %v1178_v26 = vsel %vm1173_vm6, %v8578_v16, %v6985_v35  ;;  %v896_v53 = vadd.f32 %v869_v34, %v791_v4  ;;  %v8583_v35 = vld [vmem:[#allocation94_spill] sm:$0xff]  ;;  %v456_v40 = vmul.f32 %v6068_v18, %v6349_v15  ;;  %v1079_v34 = vsel %vm1068_vm5, %v8584_v36, %v6726_v6  ;;  %v8587_v36 = vld [vmem:[#allocation77_spill] sm:$0xff]  ;;  %v8590_v6 = vld [vmem:[#allocation76_spill] sm:$0xff] }
 0x282   : > { %8579 = vst [vmem:[#allocation37_spill] sm:$0xff] %v6998_v44  ;;  %v7002_v46 = vadd.f32 %v1178_v26, %v1099_v27  ;;  %v7004_v58 = vpop.permute.xlu1 %1169  ;;  %v7006_v42 = vpop.permute.xlu2 %1623  ;;  %v859_v16 = vsel %vm858_vm3, %v8583_v35, %v8582_v23  ;;  %v780_v26 = vadd.f32 %v754_v33, %v675_v0  ;;  %v572_v4 = vadd.f32 %v6848_v41, %v453_v51  ;;  %v8586_v23 = vld [vmem:[#allocation72_spill] sm:$0xff] }
 0x283   : > { %8581 = vst [vmem:[#allocation125_spill] sm:$0xff] %v7006_v42  ;;  %v1001_v27 = vadd.f32 %v974_v47, %v896_v53  ;;  %v459_v44 = vmul.f32 %v6071_v19, %v6364_v55  ;;  %v457_v35 = vmul.f32 %v6065_v17, %v6349_v15  ;;  %v964_v48 = vsel %vm963_vm4, %v6744_v9, %v8586_v23  ;;  %v8588_v15 = vld [vmem:[#allocation55_spill] sm:$0xff] }
 0x284   : > { %8580 = vst [vmem:[#allocation124_spill] sm:$0xff] %v7002_v46  ;;  %v7021_v46 = vmul.f32 %v6297_v39, %v6056_v12  ;;  %v1184_v33 = vsel %vm1173_vm6, %v8587_v36, %v7004_v58  ;;  %v573_v41 = vadd.f32 %v6836_v59, %v454_v56  ;;  %v885_v51 = vadd.f32 %v859_v16, %v780_v26  ;;  %v8589_v39 = vld [vmem:[#allocation59_spill] sm:$0xff] }
 0x285   : > { %v1106_v47 = vadd.f32 %v1079_v34, %v1001_v27  ;;  %v1344_v0 = vmul.f32 %v8569_v38, %v6068_v18  ;;  %v571_v53 = vadd.f32 %v6843_v60, %v452_v24  ;;  %v575_v9 = vadd.f32 %v6853_v61, %v456_v40  ;;  %v8591_v56 = vld [vmem:[#allocation67_spill] sm:$0xff]  ;;  %v8592_v34 = vld [vmem:[#allocation56_spill] sm:$0xff] }
 0x286   : > { %8585 = vst [vmem:[#allocation94_spill] sm:$0xff] %v7021_v46  ;;  %1514 = vrot.lane.b32.xlu0 %v1468_v52, %s5850_s29  ;;  %v756_v46 = vsel %vm753_vm2, %v8589_v39, %v8588_v15  ;;  %v1069_v36 = vsel %vm1068_vm5, %v6766_v5, %v8590_v6  ;;  %v677_v59 = vadd.f32 %v6906_v3, %v572_v4  ;;  %v8593_v5 = vld [vmem:[#allocation88_spill] sm:$0xff] }
 0x287   : > { %v990_v16 = vadd.f32 %v964_v48, %v885_v51  ;;  %v1211_v52 = vadd.f32 %v1184_v33, %v1106_v47  ;;  %v578_v60 = vadd.f32 %v6863_v1, %v459_v44  ;;  %v861_v61 = vsel %vm858_vm3, %v8592_v34, %v8591_v56  ;;  %v8596_v44 = vld [vmem:[#allocation87_spill] sm:$0xff] }
 0x288   : > { %1381 = vrot.lane.b32.xlu2 %v1344_v0, %s5849_s26  ;;  %1512 = vrot.lane.b32.xlu1 %v1467_v2, %s5850_s29  ;;  %v7048_v24 = vpop.permute.xlu0 %1282  ;;  %v576_v40 = vadd.f32 %v6179_v20, %v457_v35  ;;  %v782_v48 = vadd.f32 %v756_v46, %v677_v59  ;;  %v7071_v35 = vmul.f32 %v8569_v38, %v6065_v17  ;;  %v8598_v0 = vld [vmem:[#allocation50_spill] sm:$0xff] }
 0x289   : > { %v1300_v3 = vsel %vm1288_vm7, %v8593_v5, %v7048_v24  ;;  %v1095_v26 = vadd.f32 %v1069_v36, %v990_v16  ;;  %v7075_v46 = vmul.f32 %v6319_v7, %v6056_v12  ;;  %v7078_v36 = vadd.f32 %v6911_v31, %v573_v41  ;;  %v8609_v5 = vld [vmem:[#allocation99_spill] sm:$0xff] }
 0x28a   : > { %v7058_v4 = vadd.f32 %v1300_v3, %v1211_v52  ;;  %v7060_v2 = vpop.permute.xlu1 %1492  ;;  %v1146_v27 = vpop.permute.xlu2 %1145  ;;  %v887_v33 = vadd.f32 %v861_v61, %v782_v48  ;;  %v7084_v47 = vmul.f32 %v8569_v38, %v6731_v54  ;;  %v761_v59 = vsel %vm753_vm2, %v6409_v22, %v8598_v0 }
 0x28b   : > { %8595 = vst [vmem:[#allocation55_spill] sm:$0xff] %v7060_v2  ;;  %v7065_v1 = vsel %vm1518_vm8, %v6804_v43, %v7060_v2  ;;  %v1174_v20 = vsel %vm1173_vm6, %v1146_v27, %v8596_v44  ;;  %v676_v16 = vadd.f32 %v6901_v29, %v571_v53  ;;  %v7091_v52 = vadd.f32 %v8554_v13, %v576_v40  ;;  %v8599_v29 = vld [vmem:[#allocation58_spill] sm:$0xff]  ;;  %v8600_v53 = vld [vmem:[#allocation63_spill] sm:$0xff] }
 0x28c   : > { %8594 = vst [vmem:[#allocation72_spill] sm:$0xff] %v7058_v4  ;;  %v7080_v51 = vadd.f32 %v1174_v20, %v1095_v26  ;;  %v680_v3 = vadd.f32 %v6919_v14, %v575_v9  ;;  %v683_v31 = vadd.f32 %v6930_v57, %v578_v60  ;;  %v1800_v38 = vmul.f32 %v6379_v45, %v6071_v19  ;;  %v8601_v14 = vld [vmem:[#allocation68_spill] sm:$0xff]  ;;  %v8602_v9 = vld [vmem:[#allocation83_spill] sm:$0xff]  ;;  %v8604_v20 = vld [vmem:[#allocation69_spill] sm:$0xff] }
 0x28d   : > { %8597 = vst [vmem:[#allocation59_spill] sm:$0xff] %v7075_v46  ;;  %v1802_v41 = vmul.f32 %v6379_v45, %v6050_v10  ;;  %v1924_v22 = vmul.f32 %v6351_v32, %v6053_v11  ;;  %v866_v13 = vsel %vm858_vm3, %v6454_v50, %v8599_v29  ;;  %v966_v57 = vsel %vm963_vm4, %v8601_v14, %v8600_v53  ;;  %v8603_v60 = vld [vmem:[#allocation71_spill] sm:$0xff] }
 0x28e   : > { %1496 = vrot.lane.b32.xlu0 %v6975_v30, %s5850_s29  ;;  %v1071_v30 = vsel %vm1068_vm5, %v8603_v60, %v8602_v9  ;;  %v7114_v61 = vmul.f32 %v6351_v32, %v6050_v10  ;;  %v788_v40 = vadd.f32 %v761_v59, %v683_v31  ;;  %v460_v48 = vmul.f32 %v6053_v11, %v6364_v55  ;;  %v8605_v31 = vld [vmem:[#allocation93_spill] sm:$0xff]  ;;  %v8606_v32 = vld [vmem:[#allocation82_spill] sm:$0xff]  ;;  %v8607_v11 = vld [vmem:[#allocation52_spill] sm:$0xff] }
 0x28f   : > { %v992_v26 = vadd.f32 %v966_v57, %v887_v33  ;;  %v461_v27 = vmul.f32 %v6050_v10, %v6364_v55  ;;  %v971_v7 = vsel %vm963_vm4, %v6437_v37, %v8604_v20  ;;  %v463_v59 = vmul.f32 %v6068_v18, %v6364_v55  ;;  %v8608_v37 = vld [vmem:[#allocation95_spill] sm:$0xff] }
 0x290   : > { %1833 = vrot.lane.b32.xlu2 %v1800_v38, %s5853_s18  ;;  %1837 = vrot.lane.b32.xlu1 %v1802_v41, %s5853_s18  ;;  %v7120_v50 = vpop.permute.xlu0 %1607  ;;  %v1176_v33 = vsel %vm1173_vm6, %v8606_v32, %v8605_v31  ;;  %v893_v57 = vadd.f32 %v866_v13, %v788_v40  ;;  %v1915_v46 = vmul.f32 %v8607_v11, %v6071_v19  ;;  %v8611_v13 = vld [vmem:[#allocation85_spill] sm:$0xff] }
 0x291   : > { %v1097_v38 = vadd.f32 %v1071_v30, %v992_v26  ;;  %v759_v4 = vsel %vm753_vm2, %v6604_v63, %v6664_v49  ;;  %v1291_v18 = vsel %vm1288_vm7, %v8609_v5, %v8608_v37  ;;  %v7150_v12 = vadd.f32 %v6858_v8, %v460_v48  ;;  %v8613_v49 = vld [vmem:[#allocation100_spill] sm:$0xff] }
 0x292   : > { %v1622_v41 = vpop.permute.xlu1 %1621  ;;  %v1273_v54 = vpop.permute.xlu2 %1272  ;;  %v998_v40 = vadd.f32 %v971_v7, %v893_v57  ;;  %v582_v63 = vadd.f32 %v6875_v21, %v463_v59  ;;  %v864_v37 = vsel %vm858_vm3, %v6617_v25, %v8613_v49  ;;  %v8617_v48 = vld [vmem:[#allocation48_spill] sm:$0xff]  ;;  %v8618_v59 = vld [vmem:[#allocation66_spill] sm:$0xff] }
 0x293   : > { %v7142_v2 = vsel %vm1633_vm9, %v1622_v41, %v7006_v42  ;;  %v1296_v30 = vsel %vm1288_vm7, %v1273_v54, %v8611_v13  ;;  %v1202_v26 = vadd.f32 %v1176_v33, %v1097_v38  ;;  %v8614_v42 = vld [vmem:[#allocation114_spill] sm:$0xff]  ;;  %v785_v33 = vadd.f32 %v759_v4, %v680_v3  ;;  %v8623_v4 = vld [vmem:[#allocation108_spill] sm:$0xff] }
 0x294   : > { %8610 = vst [vmem:[#allocation76_spill] sm:$0xff] %v7142_v2  ;;  %v7147_v19 = vadd.f32 %v1296_v30, %v6789_v62  ;;  %v1406_v2 = vsel %vm1403_vm10, %v6791_v28, %v8614_v42  ;;  %v8615_v54 = vld [vmem:[#allocation122_spill] sm:$0xff]  ;;  %v8616_v62 = vld [vmem:[#allocation28_spill] sm:$0xff]  ;;  %v755_v21 = vsel %vm753_vm2, %v8617_v48, %v8589_v39 }
 0x295   : > { %v580_v7 = vadd.f32 %v8615_v54, %v461_v27  ;;  %v1319_v57 = vadd.f32 %v1291_v18, %v1202_v26  ;;  %v1803_v8 = vmul.f32 %v6379_v45, %v8616_v62  ;;  %v8619_v38 = vld [vmem:[#allocation70_spill] sm:$0xff]  ;;  %v8622_v27 = vld [vmem:[#allocation116_spill] sm:$0xff]  ;;  %v890_v3 = vadd.f32 %v864_v37, %v785_v33  ;;  %v8624_v54 = vld [vmem:[#allocation35_spill] sm:$0xff] }
 0x296   : > { %8612 = vst [vmem:[#allocation67_spill] sm:$0xff] %v7147_v19  ;;  %1948 = vrot.lane.b32.xlu0 %v1915_v46, %s5854_s1  ;;  %v1076_v25 = vsel %vm1068_vm5, %v8619_v38, %v8618_v59  ;;  %v8620_v30 = vld [vmem:[#allocation86_spill] sm:$0xff]  ;;  %v969_v18 = vsel %vm963_vm4, %v8623_v4, %v8622_v27  ;;  %v687_v48 = vadd.f32 %v8624_v54, %v582_v63  ;;  %v8625_v38 = vld [vmem:[#allocation84_spill] sm:$0xff]  ;;  %v8628_v63 = vld [vmem:[#allocation101_spill] sm:$0xff] }
 0x297   : > { %v8621_v19 = vld [vmem:[#allocation74_spill] sm:$0xff]  ;;  %v1103_v46 = vadd.f32 %v1076_v25, %v998_v40  ;;  %v1434_v26 = vadd.f32 %v1406_v2, %v1319_v57  ;;  %v8626_v45 = vld [vmem:[#allocation80_spill] sm:$0xff]  ;;  %v1918_v37 = vmul.f32 %v8607_v11, %v8616_v62  ;;  %v781_v2 = vadd.f32 %v755_v21, %v676_v16  ;;  %v8630_v4 = vld [vmem:[#allocation97_spill] sm:$0xff] }
 0x298   : > { %v1181_v42 = vsel %vm1173_vm6, %v8621_v19, %v8620_v30  ;;  %1839 = vrot.lane.b32.xlu2 %v1803_v8, %s5853_s18  ;;  %1966 = vrot.lane.b32.xlu1 %v1924_v22, %s5854_s1  ;;  %v7177_v39 = vpop.permute.xlu0 %1736  ;;  %v765_v49 = vsel %vm753_vm2, %v8626_v45, %v8625_v38  ;;  %v8627_v19 = vld [vmem:[#allocation96_spill] sm:$0xff]  ;;  %v995_v33 = vadd.f32 %v969_v18, %v890_v3  ;;  %v8629_v25 = vld [vmem:[#allocation90_spill] sm:$0xff]  ;;  %v8635_v62 = vld [vmem:[#allocation103_spill] sm:$0xff] }
 0x299   : > { %v1297_v30 = vsel %vm1288_vm7, %v8611_v13, %v8627_v19  ;;  %v1208_v40 = vadd.f32 %v1181_v42, %v1103_v46  ;;  %v1549_v22 = vadd.f32 %v7065_v1, %v1434_v26  ;;  %v870_v45 = vsel %vm858_vm3, %v8629_v25, %v8628_v63  ;;  %v8631_v54 = vld [vmem:[#allocation102_spill] sm:$0xff]  ;;  %v8634_v3 = vld [vmem:[#allocation60_spill] sm:$0xff]  ;;  %v8638_v11 = vld [vmem:[#allocation117_spill] sm:$0xff] }
 0x29a   : > { %v7189_v57 = vpop.permute.xlu1 %1052  ;;  %v7191_v8 = vpop.permute.xlu2 %1605  ;;  %v1412_v13 = vsel %vm1403_vm10, %v8631_v54, %v8630_v4  ;;  %v8632_v38 = vld [vmem:[#allocation30_spill] sm:$0xff]  ;;  %v792_v1 = vadd.f32 %v765_v49, %v687_v48  ;;  %v860_v26 = vsel %vm858_vm3, %v8634_v3, %v8592_v34  ;;  %v965_v25 = vsel %vm963_vm4, %v8586_v23, %v8601_v14  ;;  %v8637_v54 = vld [vmem:[#allocation115_spill] sm:$0xff] }
 0x29b   : > { %v1074_v16 = vsel %vm1068_vm5, %v8632_v38, %v7189_v57  ;;  %v1636_v42 = vsel %vm1633_vm9, %v7191_v8, %v7120_v50  ;;  %v1325_v21 = vadd.f32 %v1297_v30, %v1208_v40  ;;  %v8636_v38 = vld [vmem:[#allocation92_spill] sm:$0xff]  ;;  %v1527_v49 = vsel %vm1518_vm8, %v8638_v11, %v8637_v54  ;;  %v8639_v30 = vld [vmem:[#allocation51_spill] sm:$0xff]  ;;  %v8640_v34 = vld [vmem:[#allocation34_spill] sm:$0xff] }
 0x29c   : > { %v7205_v18 = vadd.f32 %v1074_v16, %v995_v33  ;;  %v7207_v46 = vadd.f32 %v1636_v42, %v1549_v22  ;;  %v975_v63 = vsel %vm963_vm4, %v8636_v38, %v8635_v62  ;;  %v757_v48 = vsel %vm753_vm2, %v8588_v15, %v8639_v30  ;;  %v8641_v14 = vld [vmem:[#allocation118_spill] sm:$0xff]  ;;  %v8642_v42 = vld [vmem:[#allocation111_spill] sm:$0xff] }
 0x29d   : > { %v886_v40 = vadd.f32 %v860_v26, %v781_v2  ;;  %v897_v33 = vadd.f32 %v870_v45, %v792_v1  ;;  %v1440_v22 = vadd.f32 %v1412_v13, %v1325_v21  ;;  %v685_v16 = vadd.f32 %v8640_v34, %v580_v7  ;;  %v8643_v38 = vld [vmem:[#allocation119_spill] sm:$0xff]  ;;  %v8646_v45 = vld [vmem:[#allocation57_spill] sm:$0xff] }
 0x29e   : > { %8633 = vst [vmem:[#allocation56_spill] sm:$0xff] %v7207_v46  ;;  %1954 = vrot.lane.b32.xlu0 %v1918_v37, %s5854_s1  ;;  %v1070_v23 = vsel %vm1068_vm5, %v8590_v6, %v8603_v60  ;;  %v1080_v3 = vsel %vm1068_vm5, %v8642_v42, %v8641_v14  ;;  %v1642_v11 = vsel %vm1633_vm9, %v8643_v38, %v1622_v41  ;;  %v8644_v37 = vld [vmem:[#allocation47_spill] sm:$0xff]  ;;  %v8653_v42 = vld [vmem:[#allocation106_spill] sm:$0xff] }
 0x29f   : > { %v991_v46 = vadd.f32 %v965_v25, %v886_v40  ;;  %v1002_v15 = vadd.f32 %v975_v63, %v897_v33  ;;  %v1555_v2 = vadd.f32 %v1527_v49, %v1440_v22  ;;  %v783_v6 = vadd.f32 %v757_v48, %v7078_v36  ;;  %v8647_v25 = vld [vmem:[#allocation62_spill] sm:$0xff] }
 0x2a0   : > { %1968 = vrot.lane.b32.xlu2 %v7114_v61, %s5854_s1  ;;  %1383 = vrot.lane.b32.xlu1 %v7071_v35, %s5849_s26  ;;  %v7238_v7 = vpop.permute.xlu0 %1284  ;;  %v1175_v60 = vsel %vm1173_vm6, %v8596_v44, %v8606_v32  ;;  %v2040_v63 = vmul.f32 %v8644_v37, %v6050_v10  ;;  %v8645_v61 = vld [vmem:[#allocation53_spill] sm:$0xff]  ;;  %v862_v32 = vsel %vm858_vm3, %v8591_v56, %v8647_v25  ;;  %v8649_v56 = vld [vmem:[#allocation32_spill] sm:$0xff]  ;;  %v8651_v22 = vld [vmem:[#allocation54_spill] sm:$0xff] }
 0x2a1   : > { %v1301_v41 = vsel %vm1288_vm7, %v7048_v24, %v7238_v7  ;;  %v763_v35 = vsel %vm753_vm2, %v8646_v45, %v8645_v61  ;;  %v1096_v13 = vadd.f32 %v1070_v23, %v991_v46  ;;  %v1107_v1 = vadd.f32 %v1080_v3, %v1002_v15  ;;  %v8648_v24 = vld [vmem:[#allocation104_spill] sm:$0xff]  ;;  %v8654_v61 = vld [vmem:[#allocation79_spill] sm:$0xff]  ;;  %v8659_v25 = vld [vmem:[#allocation89_spill] sm:$0xff] }
 0x2a2   : > { %v1670_v21 = vadd.f32 %v1642_v11, %v1555_v2  ;;  %v7252_v26 = vpop.permute.xlu1 %1171  ;;  %v7254_v36 = vpop.permute.xlu2 %1734  ;;  %v1290_v44 = vsel %vm1288_vm7, %v8648_v24, %v8609_v5  ;;  %v762_v46 = vsel %vm753_vm2, %v8598_v0, %v8646_v45  ;;  %v684_v33 = vadd.f32 %v8649_v56, %v7150_v12  ;;  %v8650_v5 = vld [vmem:[#allocation64_spill] sm:$0xff]  ;;  %v8662_v56 = vld [vmem:[#allocation98_spill] sm:$0xff] }
 0x2a3   : > { %v1185_v49 = vsel %vm1173_vm6, %v7004_v58, %v7252_v26  ;;  %v1757_v11 = vsel %vm1748_vm11, %v7254_v36, %v7177_v39  ;;  %v1201_v30 = vadd.f32 %v1175_v60, %v1096_v13  ;;  %v868_v34 = vsel %vm858_vm3, %v8651_v22, %v8650_v5  ;;  %v8652_v58 = vld [vmem:[#allocation75_spill] sm:$0xff]  ;;  %v8655_v13 = vld [vmem:[#allocation121_spill] sm:$0xff] }
 0x2a4   : > { %v1212_v48 = vadd.f32 %v1185_v49, %v1107_v1  ;;  %v7271_v40 = vadd.f32 %v1757_v11, %v1670_v21  ;;  %v967_v23 = vsel %vm963_vm4, %v8600_v53, %v8652_v58  ;;  %v1405_v3 = vsel %vm1403_vm10, %v8653_v42, %v6791_v28  ;;  %v8657_v1 = vld [vmem:[#allocation61_spill] sm:$0xff]  ;;  %v8664_v5 = vld [vmem:[#allocation95_spill] sm:$0xff] }
 0x2a5   : > { %v790_v0 = vadd.f32 %v763_v35, %v685_v16  ;;  %v888_v15 = vadd.f32 %v862_v32, %v783_v6  ;;  %v1318_v2 = vadd.f32 %v1290_v44, %v1201_v30  ;;  %v789_v12 = vadd.f32 %v762_v46, %v684_v33  ;;  %v8660_v30 = vld [vmem:[#allocation73_spill] sm:$0xff]  ;;  %v8663_v33 = vld [vmem:[#allocation107_spill] sm:$0xff] }
 0x2a6   : > { %2083 = vrot.lane.b32.xlu0 %v2040_v63, %s5855_s21  ;;  %v7285_v60 = vadd.f32 %v1301_v41, %v1212_v48  ;;  %v1072_v45 = vsel %vm1068_vm5, %v8602_v9, %v8654_v61  ;;  %v464_v53 = vmul.f32 %v6065_v17, %v6364_v55  ;;  %v1520_v28 = vsel %vm1518_vm8, %v8655_v13, %v6804_v43  ;;  %v8656_v41 = vld [vmem:[#allocation33_spill] sm:$0xff]  ;;  %v8661_v48 = vld [vmem:[#allocation78_spill] sm:$0xff] }
 0x2a7   : > { %v895_v16 = vadd.f32 %v868_v34, %v790_v0  ;;  %v993_v6 = vadd.f32 %v967_v23, %v888_v15  ;;  %v1433_v35 = vadd.f32 %v1405_v3, %v1318_v2  ;;  %v867_v9 = vsel %vm858_vm3, %v8599_v29, %v8651_v22  ;;  %v8658_v55 = vld [vmem:[#allocation65_spill] sm:$0xff]  ;;  %v8667_v2 = vld [vmem:[#allocation100_spill] sm:$0xff] }
 0x2a8   : > { %1385 = vrot.lane.b32.xlu2 %v7084_v47, %s5849_s26  ;;  %1516 = vrot.lane.b32.xlu1 %v8656_v41, %s5850_s29  ;;  %v1257_v63 = vpop.permute.xlu0 %1256  ;;  %v973_v21 = vsel %vm963_vm4, %v8658_v55, %v8657_v1  ;;  %v1177_v43 = vsel %vm1173_vm6, %v8605_v31, %v8659_v25  ;;  %v972_v47 = vsel %vm963_vm4, %v8604_v20, %v8658_v55  ;;  %v8665_v0 = vld [vmem:[#allocation77_spill] sm:$0xff]  ;;  %v8674_v55 = vld [vmem:[#allocation86_spill] sm:$0xff]  ;;  %vm3001_vm2 = vcmask 392192  }
 0x2a9   : > { %v1289_v32 = vsel %vm1288_vm7, %v1257_v63, %v8648_v24  ;;  %v1098_v44 = vadd.f32 %v1072_v45, %v993_v6  ;;  %v1548_v49 = vadd.f32 %v1520_v28, %v1433_v35  ;;  %v1078_v31 = vsel %vm1068_vm5, %v8661_v48, %v8660_v30  ;;  %v8666_v15 = vld [vmem:[#allocation81_spill] sm:$0xff]  ;;  %v8669_v28 = vld [vmem:[#allocation114_spill] sm:$0xff]  ;;  %v8672_v63 = vld [vmem:[#allocation44_spill] sm:$0xff] }
 0x2aa   : > { %v7314_v11 = vadd.f32 %v1289_v32, %v7080_v51  ;;  %v7316_v29 = vpop.permute.xlu1 %1603  ;;  %v7318_v46 = vpop.permute.xlu2 %1740  ;;  %v786_v24 = vadd.f32 %v8662_v56, %v7091_v52  ;;  %v1292_v20 = vsel %vm1288_vm7, %v8664_v5, %v8663_v33  ;;  %v894_v22 = vadd.f32 %v867_v9, %v789_v12  ;;  %v8668_v45 = vld [vmem:[#allocation109_spill] sm:$0xff]  ;;  %v8676_v32 = vld [vmem:[#allocation55_spill] sm:$0xff] }
 0x2ab   : > { %v1635_v51 = vsel %vm1633_vm9, %v7316_v29, %v7191_v8  ;;  %v1000_v34 = vadd.f32 %v973_v21, %v895_v16  ;;  %v1203_v58 = vadd.f32 %v1177_v43, %v1098_v44  ;;  %v1077_v3 = vsel %vm1068_vm5, %v8618_v59, %v8661_v48  ;;  %v8670_v35 = vld [vmem:[#allocation37_spill] sm:$0xff]  ;;  %v8675_v43 = vld [vmem:[#allocation31_spill] sm:$0xff]  ;;  %v8677_v48 = vld [vmem:[#allocation94_spill] sm:$0xff] }
 0x2ac   : > { %v7331_v23 = vadd.f32 %v1635_v51, %v1548_v49  ;;  %v1183_v52 = vsel %vm1173_vm6, %v8666_v15, %v8665_v0  ;;  %v891_v61 = vadd.f32 %v8667_v2, %v786_v24  ;;  %v1407_v6 = vsel %vm1403_vm10, %v8669_v28, %v8668_v45  ;;  %v8671_v41 = vld [vmem:[#allocation25_spill] sm:$0xff]  ;;  %v8679_v56 = vld [vmem:[#allocation91_spill] sm:$0xff]  ;;  %v8682_v0 = vld [vmem:[#allocation72_spill] sm:$0xff] }
 0x2ad   : > { %v999_v8 = vadd.f32 %v972_v47, %v894_v22  ;;  %v1105_v12 = vadd.f32 %v1078_v31, %v1000_v34  ;;  %v1320_v16 = vadd.f32 %v1292_v20, %v1203_v58  ;;  %v1577_v9 = vmul.f32 %v8672_v63, %v8671_v41  ;;  %v8673_v59 = vld [vmem:[#allocation29_spill] sm:$0xff]  ;;  %v8681_v34 = vld [vmem:[#allocation110_spill] sm:$0xff] }
 0x2ae   : > { %1500 = vrot.lane.b32.xlu0 %v8670_v35, %s5850_s29  ;;  %v583_v1 = vadd.f32 %v8673_v59, %v464_v53  ;;  %v1182_v21 = vsel %vm1173_vm6, %v8674_v55, %v8666_v15  ;;  %v996_v25 = vadd.f32 %v8622_v27, %v891_v61  ;;  %v1522_v47 = vsel %vm1518_vm8, %v8676_v32, %v8675_v43  ;;  %v8678_v53 = vld [vmem:[#allocation88_spill] sm:$0xff]  ;;  %v8680_v20 = vld [vmem:[#allocation105_spill] sm:$0xff] }
 0x2af   : > { %v1104_v44 = vadd.f32 %v1077_v3, %v999_v8  ;;  %v1210_v49 = vadd.f32 %v1183_v52, %v1105_v12  ;;  %v1435_v30 = vadd.f32 %v1407_v6, %v1320_v16  ;;  %v1299_v24 = vsel %vm1288_vm7, %v8679_v56, %v8678_v53  ;;  %v8683_v61 = vld [vmem:[#allocation41_spill] sm:$0xff]  ;;  %v8685_v59 = vld [vmem:[#allocation120_spill] sm:$0xff] }
 0x2b0   : > { %1486 = vrot.lane.b32.xlu2 %v8677_v48, %s5850_s29  ;;  %1617 = vrot.lane.b32.xlu1 %v1577_v9, %s5851_s3  ;;  %v7358_v31 = vpop.permute.xlu0 %1397  ;;  %v1298_v27 = vsel %vm1288_vm7, %v8627_v19, %v8679_v56  ;;  %v1101_v5 = vadd.f32 %v7189_v57, %v996_v25  ;;  %v1413_v58 = vsel %vm1403_vm10, %v8630_v4, %v8681_v34  ;;  %v8684_v35 = vld [vmem:[#allocation113_spill] sm:$0xff]  ;;  %v8686_v25 = vld [vmem:[#allocation59_spill] sm:$0xff]  ;;  %v8687_v32 = vld [vmem:[#allocation24_spill] sm:$0xff] }
 0x2b1   : > { %v1415_v51 = vsel %vm1403_vm10, %v8680_v20, %v7358_v31  ;;  %v1209_v22 = vadd.f32 %v1182_v21, %v1104_v44  ;;  %v1550_v3 = vadd.f32 %v1522_v47, %v1435_v30  ;;  %v1414_v19 = vsel %vm1403_vm10, %v8681_v34, %v8680_v20  ;;  %v8688_v47 = vld [vmem:[#allocation52_spill] sm:$0xff]  ;;  %v8691_v48 = vld [vmem:[#allocation125_spill] sm:$0xff] }
 0x2b2   : > { %v7374_v15 = vadd.f32 %v1415_v51, %v8682_v0  ;;  %v7376_v52 = vpop.permute.xlu1 %1609  ;;  %v1158_v2 = vpop.permute.xlu2 %1157  ;;  %v1327_v4 = vadd.f32 %v1299_v24, %v1210_v49  ;;  %v1528_v9 = vsel %vm1518_vm8, %v8637_v54, %v8684_v35  ;;  %v1529_v55 = vsel %vm1518_vm8, %v8684_v35, %v8685_v59  ;;  %v8689_v49 = vld [vmem:[#allocation26_spill] sm:$0xff]  ;;  %v8692_v54 = vld [vmem:[#allocation36_spill] sm:$0xff] }
 0x2b3   : > { %v1637_v57 = vsel %vm1633_vm9, %v7120_v50, %v7376_v52  ;;  %v1179_v28 = vsel %vm1173_vm6, %v8683_v61, %v1158_v2  ;;  %v7386_v6 = vadd.f32 %v1158_v2, %v1101_v5  ;;  %v1326_v8 = vadd.f32 %v1298_v27, %v1209_v22  ;;  %v8693_v20 = vld [vmem:[#allocation84_spill] sm:$0xff]  ;;  %v8696_v61 = vld [vmem:[#allocation46_spill] sm:$0xff] }
 0x2b4   : > { %v7388_v12 = vadd.f32 %v1637_v57, %v1550_v3  ;;  %v1205_v16 = vadd.f32 %v1179_v28, %v7205_v18  ;;  %v1442_v21 = vadd.f32 %v1414_v19, %v1327_v4  ;;  %v1916_v44 = vmul.f32 %v8688_v47, %v8687_v32  ;;  %v8690_v18 = vld [vmem:[#allocation123_spill] sm:$0xff]  ;;  %v8694_v34 = vld [vmem:[#allocation76_spill] sm:$0xff]  ;;  %v8695_v19 = vld [vmem:[#allocation102_spill] sm:$0xff] }
 0x2b5   : > { %v1441_v50 = vadd.f32 %v1413_v58, %v1326_v8  ;;  %v1582_v30 = vmul.f32 %v8672_v63, %v8689_v49  ;;  %v1644_v53 = vsel %vm1633_vm9, %v8691_v48, %v8690_v18  ;;  %v688_v56 = vadd.f32 %v8692_v54, %v583_v1  ;;  %v8697_v4 = vld [vmem:[#allocation101_spill] sm:$0xff] }
 0x2b6   : > { %1601 = vrot.lane.b32.xlu0 %v8686_v25, %s5851_s3  ;;  %v1557_v27 = vadd.f32 %v1529_v55, %v1442_v21  ;;  %v1697_v28 = vmul.f32 %v8696_v61, %v8689_v49  ;;  %v8698_v55 = vld [vmem:[#allocation67_spill] sm:$0xff] }
 0x2b7   : > { %v1556_v24 = vadd.f32 %v1528_v9, %v1441_v50  ;;  %v793_v51 = vadd.f32 %v8693_v20, %v688_v56  ;;  %v8700_v20 = vld [vmem:[#allocation56_spill] sm:$0xff] }
 0x2b8   : > { %1950 = vrot.lane.b32.xlu1 %v1916_v44, %s5854_s1  ;;  %1627 = vrot.lane.b32.xlu2 %v1582_v30, %s5851_s3  ;;  %v7409_v5 = vpop.permute.xlu0 %1722  ;;  %v1672_v22 = vadd.f32 %v1644_v53, %v1557_v27  ;;  %v1917_v44 = vmul.f32 %v8688_v47, %v6050_v10 }
 0x2b9   : > { %v1671_v58 = vadd.f32 %v8694_v34, %v1556_v24  ;;  %v898_v8 = vadd.f32 %v8697_v4, %v793_v51  ;;  %v8702_v34 = vld [vmem:[#allocation28_spill] sm:$0xff] }
 0x2ba   : > { %v1739_v3 = vpop.permute.xlu1 %1738  ;;  %v1388_v0 = vpop.permute.xlu2 %1387 }
 0x2bb   : > { %v1758_v2 = vsel %vm1748_vm11, %v7177_v39, %v1739_v3  ;;  %v1759_v1 = vsel %vm1748_vm11, %v1739_v3, %v7318_v46  ;;  %v1411_v57 = vsel %vm1403_vm10, %v1388_v0, %v8695_v19  ;;  %v1003_v21 = vadd.f32 %v8635_v62, %v898_v8  ;;  %v8699_v39 = vld [vmem:[#allocation27_spill] sm:$0xff]  ;;  %v8703_v19 = vld [vmem:[#allocation124_spill] sm:$0xff] }
 0x2bc   : > { %v7422_v35 = vadd.f32 %v1758_v2, %v1671_v58  ;;  %v7424_v9 = vadd.f32 %v1759_v1, %v1672_v22  ;;  %v1439_v50 = vadd.f32 %v1411_v57, %v8698_v55  ;;  %v2038_v25 = vmul.f32 %v8644_v37, %v8699_v39  ;;  %v8704_v8 = vld [vmem:[#allocation112_spill] sm:$0xff] }
 0x2bd   : > { %v1108_v30 = vadd.f32 %v8641_v14, %v1003_v21  ;;  %v8701_v14 = vld [vmem:[#allocation42_spill] sm:$0xff]  ;;  %v2039_v58 = vmul.f32 %v8644_v37, %v8687_v32  ;;  %v8705_v55 = vld [vmem:[#allocation40_spill] sm:$0xff] }
 0x2be   : > { %1742 = vrot.lane.b32.xlu0 %v1697_v28, %s5852_s15  ;;  %v2032_v22 = vmul.f32 %v8701_v14, %v6050_v10  ;;  %v1576_v21 = vmul.f32 %v8705_v55, %v8704_v8 }
 0x2bf   : > { %v1213_v53 = vadd.f32 %v7252_v26, %v1108_v30  ;;  %v2041_v26 = vmul.f32 %v8644_v37, %v8702_v34 }
 0x2c0   : > { %2079 = vrot.lane.b32.xlu1 %v2038_v25, %s5855_s21  ;;  %1952 = vrot.lane.b32.xlu2 %v1917_v44, %s5854_s1  ;;  %v1852_v48 = vpop.permute.xlu0 %1851  ;;  %v8706_v25 = vld [vmem:[#allocation38_spill] sm:$0xff] }
 0x2c1   : > { %v1460_v44 = vmul.f32 %v8706_v25, %v6065_v17 }
 0x2c2   : > { %v1287_v54 = vpop.permute.xlu1 %1286  ;;  %v1721_v56 = vpop.permute.xlu2 %1720 }
 0x2c3   : > { %v1302_v62 = vsel %vm1288_vm7, %v7238_v7, %v1287_v54  ;;  %v1751_v24 = vsel %vm1748_vm11, %v1721_v56, %v7409_v5  ;;  %v2137_v54 = vld [vmem:[%s8310_s2 + $0x8] sm:$0xff] }
 0x2c4   : > { %v1330_v27 = vadd.f32 %v1302_v62, %v1213_v53  ;;  %v7442_v51 = vadd.f32 %v1751_v24, %v8700_v20  ;;  %v1574_v24 = vmul.f32 %v8705_v55, %v8689_v49  ;;  %v1584_v20 = vmul.f32 %v8672_v63, %v8704_v8 }
 0x2c6   : > { %2067 = vrot.lane.b32.xlu0 %v2032_v22, %s5855_s21 }
 0x2c8   : > { %2085 = vrot.lane.b32.xlu1 %v2041_v26, %s5855_s21  ;;  %2081 = vrot.lane.b32.xlu2 %v2039_v58, %s5855_s21  ;;  %v7453_v7 = vpop.permute.xlu0 %1268  ;;  %v8707_v26 = vld [vmem:[#allocation117_spill] sm:$0xff] }
 0x2ca   : > { %v1267_v3 = vpop.permute.xlu1 %1266  ;;  %v7455_v0 = vpop.permute.xlu2 %1849 }
 0x2cb   : > { %v1293_v10 = vsel %vm1288_vm7, %v8663_v33, %v1267_v3  ;;  %v1294_v2 = vsel %vm1288_vm7, %v1267_v3, %v7453_v7  ;;  %v1872_v1 = vsel %vm1863_vm12, %v7455_v0, %v1852_v48  ;;  %v1583_v33 = vmul.f32 %v8672_v63, %v6065_v17 }
 0x2cc   : > { %v1321_v57 = vadd.f32 %v1293_v10, %v8703_v19  ;;  %v7464_v28 = vadd.f32 %v1294_v2, %v1205_v16  ;;  %v7467_v4 = vadd.f32 %v1872_v1, %v7271_v40 }
 0x2ce   : > { %1615 = vrot.lane.b32.xlu0 %v1576_v21, %s5851_s3 }
 0x2d0   : > { %1629 = vrot.lane.b32.xlu1 %v1583_v33, %s5851_s3  ;;  %1498 = vrot.lane.b32.xlu2 %v1460_v44, %s5850_s29  ;;  %v1402_v16 = vpop.permute.xlu0 %1401  ;;  %s5094_s29 = sshll.u32 %s5090_s11, 4  ;;  %s5095_s29 = int_to_ptr.hbm [resolvable:$true] %s5094_s29 }
 0x2d2   : > { %v7478_v30 = vpop.permute.xlu1 %1718  ;;  %v7480_v40 = vpop.permute.xlu2 %1855 }
 0x2d3   : > { %v1750_v53 = vsel %vm1748_vm11, %v7478_v30, %v1721_v56 }
 0x2d4   : > { %v1778_v62 = vadd.f32 %v1750_v53, %v7331_v23 }
 0x2d6   : > { %2145 = vperm.xlu0 %5428, %v2137_v54  }
 0x2d8   : > { %1611 = vrot.lane.b32.xlu1 %v1574_v24, %s5851_s3  ;;  %1631 = vrot.lane.b32.xlu2 %v1584_v20, %s5851_s3  ;;  %v1503_v22 = vpop.permute.xlu0 %1502  ;;  %v8709_v24 = vld [vmem:[#allocation39_spill] sm:$0xff] }
 0x2d9   : > { %v1526_v56 = vsel %vm1518_vm8, %v1503_v22, %v8707_v26  ;;  %v1814_v20 = vmul.f32 %v8709_v24, %v8704_v8  ;;  %v2031_v22 = vmul.f32 %v8701_v14, %v8687_v32  ;;  %v8710_v32 = vld [vmem:[#allocation49_spill] sm:$0xff] }
 0x2da   : > { %v7496_v58 = vadd.f32 %v1526_v56, %v1439_v50  ;;  %v7498_v3 = vpop.permute.xlu1 %1724  ;;  %v1400_v23 = vpop.permute.xlu2 %1399  ;;  %v8708_v50 = vld [vmem:[#allocation43_spill] sm:$0xff] }
 0x2db   : > { %v1752_v10 = vsel %vm1748_vm11, %v7409_v5, %v7498_v3  ;;  %v1416_v63 = vsel %vm1403_vm10, %v7358_v31, %v1400_v23  ;;  %v1417_v2 = vsel %vm1403_vm10, %v1400_v23, %v1402_v16  ;;  %v1690_v33 = vmul.f32 %v8708_v50, %v6065_v17 }
 0x2dc   : > { %v7507_v1 = vadd.f32 %v1752_v10, %v7388_v12  ;;  %v1444_v19 = vadd.f32 %v1416_v63, %v7285_v60  ;;  %v7510_v21 = vadd.f32 %v1417_v2, %v1330_v27  ;;  %v2030_v5 = vmul.f32 %v8701_v14, %v8699_v39 }
 0x2dd   : > { %v1692_v31 = vmul.f32 %v8696_v61, %v8671_v41  ;;  %v1804_v23 = vmul.f32 %v8710_v32, %v8689_v49  ;;  %v1698_v10 = vmul.f32 %v8696_v61, %v6065_v17  ;;  %v1575_v63 = vmul.f32 %v8705_v55, %v6065_v17 }
 0x2de   : > { %1728 = vrot.lane.b32.xlu0 %v1690_v33, %s5852_s15  ;;  %v1684_v55 = vmul.f32 %v8708_v50, %v8671_v41 }
 0x2e0   : > { %2063 = vrot.lane.b32.xlu1 %v2030_v5, %s5855_s21  ;;  %1732 = vrot.lane.b32.xlu2 %v1692_v31, %s5852_s15  ;;  %v1836_v12 = vpop.permute.xlu0 %1835  ;;  %v1805_v5 = vmul.f32 %v8710_v32, %v6065_v17  ;;  %v1699_v31 = vmul.f32 %v8696_v61, %v8704_v8 }
 0x2e2   : > { %v1854_v25 = vpop.permute.xlu1 %1853  ;;  %v7521_v60 = vpop.permute.xlu2 %1381 }
 0x2e3   : > { %v1873_v27 = vsel %vm1863_vm12, %v1852_v48, %v1854_v25  ;;  %v1874_v44 = vsel %vm1863_vm12, %v1854_v25, %v7480_v40  ;;  %v1408_v39 = vsel %vm1403_vm10, %v8668_v45, %v7521_v60  ;;  %v2033_v48 = vmul.f32 %v8701_v14, %v8702_v34 }
 0x2e4   : > { %v7530_v16 = vadd.f32 %v1873_v27, %v7422_v35  ;;  %v1902_v53 = vadd.f32 %v1874_v44, %v7424_v9  ;;  %v1436_v54 = vadd.f32 %v1408_v39, %v1321_v57 }
 0x2e6   : > { %1861 = vrot.lane.b32.xlu0 %v1814_v20, %s5853_s18 }
 0x2e8   : > { %2069 = vrot.lane.b32.xlu1 %v2033_v48, %s5855_s21  ;;  %2065 = vrot.lane.b32.xlu2 %v2031_v22, %s5855_s21  ;;  %v7542_v45 = vpop.permute.xlu0 %1964  ;;  %v8711_v22 = vld [vmem:[#allocation45_spill] sm:$0xff] }
 0x2ea   : > { %v1271_v35 = vpop.permute.xlu1 %1270  ;;  %v7544_v9 = vpop.permute.xlu2 %1833 }
 0x2eb   : > { %v1295_v57 = vsel %vm1288_vm7, %v7453_v7, %v1271_v35  ;;  %v1865_v26 = vsel %vm1863_vm12, %v7544_v9, %v1836_v12  ;;  %v1929_v35 = vmul.f32 %v8711_v22, %v8704_v8 }
 0x2ec   : > { %v7551_v34 = vadd.f32 %v1295_v57, %v7386_v6  ;;  %v7553_v56 = vadd.f32 %v1865_v26, %v1778_v62  ;;  %v1689_v57 = vmul.f32 %v8708_v50, %v8689_v49 }
 0x2ee   : > { %1841 = vrot.lane.b32.xlu0 %v1804_v23, %s5853_s18 }
 0x2f0   : > { %1744 = vrot.lane.b32.xlu1 %v1698_v10, %s5852_s15  ;;  %1613 = vrot.lane.b32.xlu2 %v1575_v63, %s5851_s3  ;;  %v7564_v7 = vpop.permute.xlu0 %1970 }
 0x2f2   : > { %v1372_v6 = vpop.permute.xlu1 %1371  ;;  %v7566_v62 = vpop.permute.xlu2 %1839 }
 0x2f3   : > { %v1404_v2 = vsel %vm1403_vm10, %v1372_v6, %v8653_v42 }
 0x2f4   : > { %v1432_v33 = vadd.f32 %v1404_v2, %v7314_v11 }
 0x2f6   : > { %1843 = vrot.lane.b32.xlu0 %v1805_v5, %s5853_s18  ;;  %v2037_v5 = vmul.f32 %v8644_v37, %v8671_v41 }
 0x2f8   : > { %1716 = vrot.lane.b32.xlu1 %v1684_v55, %s5852_s15  ;;  %1746 = vrot.lane.b32.xlu2 %v1699_v31, %s5852_s15  ;;  %v7580_v25 = vpop.permute.xlu0 %1514 }
 0x2fa   : > { %v1513_v42 = vpop.permute.xlu1 %1512  ;;  %v1969_v11 = vpop.permute.xlu2 %1968 }
 0x2fb   : > { %v1530_v27 = vsel %vm1518_vm8, %v8685_v59, %v1513_v42  ;;  %v1531_v44 = vsel %vm1518_vm8, %v1513_v42, %v7580_v25  ;;  %v1989_v39 = vsel %vm1978_vm13, %v1969_v11, %v7564_v7  ;;  %v1807_v59 = vmul.f32 %v8709_v24, %v8671_v41 }
 0x2fc   : > { %v1558_v61 = vadd.f32 %v1530_v27, %v7374_v15  ;;  %v7589_v20 = vadd.f32 %v1531_v44, %v1444_v19  ;;  %v7591_v48 = vadd.f32 %v1989_v39, %v1902_v53  ;;  %v1921_v27 = vmul.f32 %v8688_v47, %v8704_v8  ;;  %v2136_v44 = vld [vmem:[%s8310_s2] sm:$0xff] }
 0x2fd   : > { %v1813_v39 = vmul.f32 %v8709_v24, %v6065_v17 }
 0x2fe   : > { %1976 = vrot.lane.b32.xlu0 %v1929_v35, %s5854_s1 }
 0x300   : > { %1847 = vrot.lane.b32.xlu1 %v1807_v59, %s5853_s18  ;;  %1726 = vrot.lane.b32.xlu2 %v1689_v57, %s5852_s15  ;;  %v7602_v15 = vpop.permute.xlu0 %1496 }
 0x301   : > { %v1523_v19 = vsel %vm1518_vm8, %v8675_v43, %v7602_v15  ;;  %v1691_v43 = vmul.f32 %v8708_v50, %v8704_v8 }
 0x302   : > { %v7607_v53 = vadd.f32 %v1523_v19, %v1436_v54  ;;  %v1838_v26 = vpop.permute.xlu1 %1837  ;;  %v1386_v23 = vpop.permute.xlu2 %1385  ;;  %v1812_v54 = vmul.f32 %v8709_v24, %v8689_v49 }
 0x303   : > { %v1866_v10 = vsel %vm1863_vm12, %v1836_v12, %v1838_v26  ;;  %v1867_v63 = vsel %vm1863_vm12, %v1838_v26, %v7566_v62  ;;  %v2029_v26 = vmul.f32 %v8701_v14, %v8671_v41 }
 0x304   : > { %v7613_v6 = vadd.f32 %v1866_v10, %v7442_v51  ;;  %v1895_v2 = vadd.f32 %v1867_v63, %v7507_v1  ;;  %v1922_v10 = vmul.f32 %v8711_v22, %v8671_v41 }
 0x306   : > { %2077 = vrot.lane.b32.xlu0 %v2037_v5, %s5855_s21 }
 0x308   : > { %1730 = vrot.lane.b32.xlu1 %v1691_v43, %s5852_s15  ;;  %1857 = vrot.lane.b32.xlu2 %v1812_v54, %s5853_s18  ;;  %v7625_v12 = vpop.permute.xlu0 %1948  ;;  %v2036_v43 = vmul.f32 %v8701_v14, %v8704_v8  ;;  %v1806_v54 = vmul.f32 %v8710_v32, %v8704_v8  ;;  %s5749_s15 = sshra.s32 %s5095_s29, 4  ;;  %s5750_s15 = int_to_ptr.hbm [resolvable:$true] %s5749_s15 }
 0x309   : > { %p5756_p3 = scmp.lt.s32.totalorder %s5750_s15, %s8317_s9 }
 0x30a   : > { %v7627_v51 = vpop.permute.xlu1 %1966  ;;  %v1487_v1 = vpop.permute.xlu2 %1486 }
 0x30b   : > { %v1988_v55 = vsel %vm1978_vm13, %v7627_v51, %v1969_v11  ;;  %v1519_v31 = vsel %vm1518_vm8, %v1487_v1, %v8655_v13  ;;  %v1927_v1 = vmul.f32 %v8711_v22, %v8689_v49 }
 0x30c   : > { %v7634_v50 = vadd.f32 %v1988_v55, %v7530_v16  ;;  %v1547_v42 = vadd.f32 %v1519_v31, %v1432_v33 }
 0x30e   : > { %1960 = vrot.lane.b32.xlu0 %v1921_v27, %s5854_s1  ;;  %v1914_v27 = vmul.f32 %v8688_v47, %v8671_v41 }
 0x310   : > { %2140 = vperm.xlu1 %5429, %v2136_v44   ;;  %1859 = vrot.lane.b32.xlu2 %v1813_v39, %s5853_s18  ;;  %v7645_v13 = vpop.permute.xlu0 %1954 }
 0x312   : > { %v1384_v16 = vpop.permute.xlu1 %1383  ;;  %v7647_v11 = vpop.permute.xlu2 %1627 }
 0x313   : > { %v1409_v33 = vsel %vm1403_vm10, %v7521_v60, %v1384_v16  ;;  %v1410_v35 = vsel %vm1403_vm10, %v1384_v16, %v1386_v23  ;;  %v1645_v59 = vsel %vm1633_vm9, %v8690_v18, %v7647_v11  ;;  %v1799_v60 = vmul.f32 %v8710_v32, %v8671_v41 }
 0x314   : > { %v1437_v57 = vadd.f32 %v1409_v33, %v7464_v28  ;;  %v1438_v24 = vadd.f32 %v1410_v35, %v7551_v34  ;;  %v1673_v19 = vadd.f32 %v1645_v59, %v1558_v61  ;;  %v1928_v32 = vmul.f32 %v8711_v22, %v6065_v17 }
 0x316   : > { %2061 = vrot.lane.b32.xlu0 %v2029_v26, %s5855_s21 }
 0x318   : > { %1962 = vrot.lane.b32.xlu1 %v1922_v10, %s5854_s1  ;;  %1831 = vrot.lane.b32.xlu2 %v1799_v60, %s5853_s18  ;;  %v7666_v18 = vpop.permute.xlu0 %2083  ;;  %v2042_v10 = vmul.f32 %v8644_v37, %v8689_v49  ;;  %v1919_v60 = vmul.f32 %v8688_v47, %v8689_v49 }
 0x31a   : > { %v1517_v28 = vpop.permute.xlu1 %1516  ;;  %v1953_v34 = vpop.permute.xlu2 %1952 }
 0x31b   : > { %v1532_v61 = vsel %vm1518_vm8, %v7580_v25, %v1517_v28  ;;  %v1982_v23 = vsel %vm1978_vm13, %v1953_v34, %v7645_v13 }
 0x31c   : > { %v7673_v63 = vadd.f32 %v1532_v61, %v7510_v21  ;;  %v7675_v5 = vadd.f32 %v1982_v23, %v1895_v2 }
 0x31e   : > { %2075 = vrot.lane.b32.xlu0 %v2036_v43, %s5855_s21 }
 0x320   : > { %1845 = vrot.lane.b32.xlu1 %v1806_v54, %s5853_s18  ;;  %1972 = vrot.lane.b32.xlu2 %v1927_v1, %s5854_s1  ;;  %v1501_v25 = vpop.permute.xlu0 %1500  ;;  %v2034_v54 = vmul.f32 %v8701_v14, %v8689_v49  ;;  %v2044_v1 = vmul.f32 %v8644_v37, %v8704_v8  ;;  %s5751_s18 = scalar_lea.hbm %s5750_s15, 1 }
 0x321   : > { %p5752_p0 = scmp.ne.s32.totalorder %s5750_s15, %s5751_s18  ;;  %p5757_p4 = scmp.lt.s32.totalorder %s5755_s13, %s5751_s18 }
 0x322   : > { %v1618_v21 = vpop.permute.xlu1 %1617  ;;  %v2082_v55 = vpop.permute.xlu2 %2081 }
 0x323   : > { %v1641_v2 = vsel %vm1633_vm9, %v1618_v21, %v8643_v38  ;;  %p5753_p1 = pnand %p5752_p0, %p5944_p5  ;;  %p5758_p7 = por %p5757_p4, %p5756_p3 }
 0x324   : > { %v1669_v31 = vadd.f32 %v1641_v2, %v7496_v58 }
 0x325   : > { %p5754_p2 = pneg %p5753_p1 }
 0x327   : > { %p5759_p8 = pnand %p5758_p7, %p5754_p2 }
 0x328   : > { %1946 = vrot.lane.b32.xlu1 %v1914_v27, %s5854_s1  ;;  %1974 = vrot.lane.b32.xlu2 %v1928_v32, %s5854_s1  ;;  %v1602_v44 = vpop.permute.xlu0 %1601 }
 0x329   : > { %v1634_v39 = vsel %vm1633_vm9, %v1602_v44, %v7316_v29 }
 0x32a   : > { %v7697_v16 = vadd.f32 %v1634_v39, %v1547_v42  ;;  %v1951_v33 = vpop.permute.xlu1 %1950  ;;  %v1499_v38 = vpop.permute.xlu2 %1498 }
 0x32b   : > { %v1980_v58 = vsel %vm1978_vm13, %v7625_v12, %v1951_v33  ;;  %v1981_v41 = vsel %vm1978_vm13, %v1951_v33, %v1953_v34  ;;  %v1524_v22 = vsel %vm1518_vm8, %v7602_v15, %v1499_v38  ;;  %v1525_v35 = vsel %vm1518_vm8, %v1499_v38, %v1501_v25 }
 0x32c   : > { %v7706_v59 = vadd.f32 %v1980_v58, %v7553_v56  ;;  %v2009_v26 = vadd.f32 %v1981_v41, %v7613_v6  ;;  %v1552_v29 = vadd.f32 %v1524_v22, %v1437_v57  ;;  %v1553_v42 = vadd.f32 %v1525_v35, %v1438_v24 }
 0x32d   : > { %v2043_v24 = vmul.f32 %v8644_v37, %v6065_v17  ;;  %v1920_v34 = vmul.f32 %v8688_v47, %v6065_v17  ;;  %v1987_v25 = vsel %vm1978_vm13, %v7542_v45, %v7627_v51 }
 0x32e   : > { %v2015_v39 = vadd.f32 %v1987_v25, %v7467_v4 }
 0x330   : > { %2087 = vrot.lane.b32.xlu1 %v2042_v10, %s5855_s21  ;;  %1956 = vrot.lane.b32.xlu2 %v1919_v60, %s5854_s1  ;;  %v7715_v15 = vpop.permute.xlu0 %1742 }
 0x331   : > { %v1760_v56 = vsel %vm1748_vm11, %v7318_v46, %v7715_v15 }
 0x332   : > { %v7720_v28 = vadd.f32 %v1760_v56, %v1673_v19  ;;  %v7722_v6 = vpop.permute.xlu1 %2079  ;;  %v1632_v57 = vpop.permute.xlu2 %1631 }
 0x333   : > { %v2102_v49 = vsel %vm2093_vm14, %v7722_v6, %v2082_v55 }
 0x334   : > { %v2130_v33 = vadd.f32 %v2102_v49, %v2015_v39 }
 0x338   : > { %2089 = vrot.lane.b32.xlu1 %v2043_v24, %s5855_s21  ;;  %1958 = vrot.lane.b32.xlu2 %v1920_v34, %s5854_s1  ;;  %v2068_v61 = vpop.permute.xlu0 %2067 }
 0x33a   : > { %v7730_v23 = vpop.permute.xlu1 %2085  ;;  %v1733_v43 = vpop.permute.xlu2 %1732 }
 0x33b   : > { %v1756_v46 = vsel %vm1748_vm11, %v1733_v43, %v7254_v36  ;;  %v2103_v36 = vsel %vm2093_vm14, %v2082_v55, %v7666_v18  ;;  %v2104_v27 = vsel %vm2093_vm14, %v7666_v18, %v7730_v23  ;;  %v2035_v55 = vmul.f32 %v8701_v14, %v6065_v17 }
 0x33c   : > { %v7734_v19 = vadd.f32 %v1756_v46, %v1669_v31  ;;  %v2132_v38 = vadd.f32 %v2104_v27, %v7591_v48 }
 0x340   : > { %2071 = vrot.lane.b32.xlu1 %v2034_v54, %s5855_s21  ;;  %2091 = vrot.lane.b32.xlu2 %v2044_v1, %s5855_s21  ;;  %v1616_v47 = vpop.permute.xlu0 %1615 }
 0x342   : > { %v1630_v21 = vpop.permute.xlu1 %1629  ;;  %v2066_v2 = vpop.permute.xlu2 %2065 }
 0x343   : > { %v1646_v37 = vsel %vm1633_vm9, %v7647_v11, %v1630_v21  ;;  %v1647_v8 = vsel %vm1633_vm9, %v1630_v21, %v1632_v57  ;;  %v2096_v31 = vsel %vm2093_vm14, %v2066_v2, %v2068_v61  ;;  %v2131_v11 = vadd.f32 %v2103_v36, %v7634_v50 }
 0x344   : > { %v1674_v51 = vadd.f32 %v1646_v37, %v7589_v20  ;;  %v1675_v32 = vadd.f32 %v1647_v8, %v7673_v63  ;;  %v2124_v44 = vadd.f32 %v2096_v31, %v2009_v26 }
 0x348   : > { %2073 = vrot.lane.b32.xlu2 %v2035_v55, %s5855_s21  ;;  %v7764_v58 = vpop.permute.xlu0 %2145 }
 0x349   : > { %v2156_v18 = vadd.f32 %v7764_v58, %v2130_v33  ;;  %v2157_v20 = vadd.f32 %v7764_v58, %v2131_v11  ;;  %v2158_v63 = vadd.f32 %v7764_v58, %v2132_v38 }
 0x34a   : > { %v1612_v41 = vpop.permute.xlu1 %1611  ;;  %v1614_v4 = vpop.permute.xlu2 %1613 }
 0x34b   : > { %v7769_v22 = vmax.f32 %v2156_v18, 0.0  ;;  %v7771_v17 = vmax.f32 %v2157_v20, 0.0  ;;  %v7773_v14 = vmax.f32 %v2158_v63, 0.0  ;;  %v1638_v48 = vsel %vm1633_vm9, %v7376_v52, %v1612_v41 }
 0x34c   : > { %v1666_v50 = vadd.f32 %v1638_v48, %v7607_v53  ;;  %v1639_v35 = vsel %vm1633_vm9, %v1612_v41, %v1614_v4  ;;  %v1640_v26 = vsel %vm1633_vm9, %v1614_v4, %v1616_v47 }
 0x34d   : > { %v1667_v10 = vadd.f32 %v1639_v35, %v1552_v29  ;;  %v7780_v60 = vadd.f32 %v1640_v26, %v1553_v42  ;;  %v5430_v56 = vpack.i.bf16 %v7771_v17, %v7769_v22 }
 0x34f   : > { %5431 = vrot.lane.b32.xlu1 %v5430_v56, %s5832_s24 }
 0x350   : > { %v1729_v57 = vpop.permute.xlu0 %1728 }
 0x352   : > { %v7785_v24 = vpop.permute.xlu1 %2063  ;;  %v1747_v34 = vpop.permute.xlu2 %1746 }
 0x358   : > { %v7789_v53 = vpop.permute.xlu0 %1861 }
 0x35a   : > { %v7787_v43 = vpop.permute.xlu1 %2069  ;;  %v1727_v52 = vpop.permute.xlu2 %1726 }
 0x35b   : > { %v2097_v46 = vsel %vm2093_vm14, %v2068_v61, %v7787_v43  ;;  %v1753_v29 = vsel %vm1748_vm11, %v7498_v3, %v1727_v52  ;;  %v1754_v42 = vsel %vm1748_vm11, %v1727_v52, %v1729_v57 }
 0x35c   : > { %v2125_v54 = vadd.f32 %v2097_v46, %v7675_v5  ;;  %v7797_v1 = vadd.f32 %v1753_v29, %v1666_v50  ;;  %v7799_v47 = vadd.f32 %v1754_v42, %v1667_v10 }
 0x360   : > { %v7806_v8 = vpop.permute.xlu0 %1841 }
 0x362   : > { %v1745_v25 = vpop.permute.xlu1 %1744  ;;  %v1858_v36 = vpop.permute.xlu2 %1857 }
 0x363   : > { %v1761_v21 = vsel %vm1748_vm11, %v7715_v15, %v1745_v25  ;;  %v1762_v49 = vsel %vm1748_vm11, %v1745_v25, %v1747_v34 }
 0x364   : > { %v1789_v37 = vadd.f32 %v1761_v21, %v1674_v51  ;;  %v7804_v61 = vadd.f32 %v1762_v49, %v1675_v32  ;;  %v2095_v32 = vsel %vm2093_vm14, %v7785_v24, %v2066_v2 }
 0x365   : > { %v2123_v38 = vadd.f32 %v2095_v32, %v7706_v59 }
 0x368   : > { %v7814_v39 = vpop.permute.xlu0 %1843 }
 0x36a   : > { %v1717_v3 = vpop.permute.xlu1 %1716  ;;  %v7808_v31 = vpop.permute.xlu2 %1859 }
 0x36b   : > { %v1876_v5 = vsel %vm1863_vm12, %v1858_v36, %v7808_v31 }
 0x36c   : > { %v7812_v27 = vadd.f32 %v1876_v5, %v1789_v37 }
 0x370   : > { %v7816_v15 = vpop.permute.xlu0 %1976 }
 0x372   : > { %v1848_v55 = vpop.permute.xlu1 %1847  ;;  %v1832_v11 = vpop.permute.xlu2 %1831 }
 0x373   : > { %v1871_v2 = vsel %vm1863_vm12, %v1848_v55, %v7455_v0  ;;  %v1864_v37 = vsel %vm1863_vm12, %v1832_v11, %v7544_v9  ;;  %v1875_v9 = vsel %vm1863_vm12, %v7480_v40, %v1858_v36 }
 0x378   : > { %v2078_v63 = vpop.permute.xlu0 %2077 }
 0x379   : > { %v2101_v0 = vsel %vm2093_vm14, %v2078_v63, %v7722_v6 }
 0x37a   : > { %v1731_v33 = vpop.permute.xlu1 %1730  ;;  %v7818_v51 = vpop.permute.xlu2 %1972 }
 0x37b   : > { %v1755_v55 = vsel %vm1748_vm11, %v1729_v57, %v1731_v33  ;;  %v1990_v11 = vsel %vm1978_vm13, %v7564_v7, %v7818_v51  ;;  %v1903_v33 = vadd.f32 %v1875_v9, %v7720_v28  ;;  %v1877_v28 = vsel %vm1863_vm12, %v7808_v31, %v7789_v53 }
 0x380   : > { %v1961_v29 = vpop.permute.xlu0 %1960 }
 0x382   : > { %v7823_v18 = vpop.permute.xlu1 %2140  ;;  %v1975_v20 = vpop.permute.xlu2 %1974 }
 0x383   : > { %v2149_v41 = vadd.f32 %v7823_v18, %v2123_v38  ;;  %v2150_v4 = vadd.f32 %v7823_v18, %v2124_v44  ;;  %v2151_v48 = vadd.f32 %v7823_v18, %v2125_v54  ;;  %v1899_v44 = vadd.f32 %v1871_v2, %v7734_v19 }
 0x384   : > { %v1749_v19 = vsel %vm1748_vm11, %v1717_v3, %v7478_v30  ;;  %v2018_v2 = vadd.f32 %v1990_v11, %v1903_v33 }
 0x385   : > { %v7828_v50 = vmax.f32 %v2149_v41, 0.0  ;;  %v7830_v35 = vmax.f32 %v2150_v4, 0.0  ;;  %v7832_v26 = vmax.f32 %v2151_v48, 0.0  ;;  %v1783_v4 = vadd.f32 %v1755_v55, %v7780_v60 }
 0x387   : > { %v5440_v59 = vpack.i.bf16 %v7832_v26, %v7830_v35  ;;  %v5435_v10 = vpack.i.bf16 %v7828_v50, %v7773_v14 }
 0x388   : > { %v2062_v5 = vpop.permute.xlu0 %2061 }
 0x389   : > { %5441 = vrot.lane.b32.xlu0 %v5440_v59, %s5832_s24  ;;  %5436 = vrot.lane.b32.xlu2 %v5435_v10, %s5832_s24 }
 0x38a   : > { %v1963_v56 = vpop.permute.xlu1 %1962  ;;  %v7843_v34 = vpop.permute.xlu2 %1956 }
 0x38b   : > { %v1986_v52 = vsel %vm1978_vm13, %v1963_v56, %v7542_v45  ;;  %v1777_v45 = vadd.f32 %v1749_v19, %v7697_v16  ;;  %v2094_v16 = vsel %vm2093_vm14, %v2062_v5, %v7785_v24  ;;  %v1983_v55 = vsel %vm1978_vm13, %v7645_v13, %v7843_v34 }
 0x38c   : > { %v2014_v46 = vadd.f32 %v1986_v52, %v1899_v44 }
 0x38d   : > { %v1892_v6 = vadd.f32 %v1864_v37, %v1777_v45  ;;  %v1869_v37 = vsel %vm1863_vm12, %v7806_v8, %v7814_v39 }
 0x38e   : > { %v2129_v42 = vadd.f32 %v2101_v0, %v2014_v46  ;;  %v1991_v0 = vsel %vm1978_vm13, %v7818_v51, %v1975_v20 }
 0x390   : > { %v2155_v54 = vadd.f32 %v7764_v58, %v2129_v42 }
 0x392   : > { %v7850_v25 = vmax.f32 %v2155_v54, 0.0  ;;  %v1846_v21 = vpop.permute.xlu1 %1845  ;;  %v1959_v49 = vpop.permute.xlu2 %1958 }
 0x393   : > { %v1870_v63 = vsel %vm1863_vm12, %v7814_v39, %v1846_v21  ;;  %v1985_v60 = vsel %vm1978_vm13, %v1959_v49, %v1961_v29  ;;  %v1992_v29 = vsel %vm1978_vm13, %v1975_v20, %v7816_v15  ;;  %v2019_v21 = vadd.f32 %v1991_v0, %v7812_v27 }
 0x394   : > { %v1898_v3 = vadd.f32 %v1870_v63, %v1783_v4  ;;  %v1868_v27 = vsel %vm1863_vm12, %v7566_v62, %v7806_v8 }
 0x396   : > { %v2013_v59 = vadd.f32 %v1985_v60, %v1898_v3  ;;  %v5465_v60 = vpack.i.bf16 %v7769_v22, %v7850_v25 }
 0x39a   : > { %v1947_v32 = vpop.permute.xlu1 %1946  ;;  %v2092_v38 = vpop.permute.xlu2 %2091 }
 0x39b   : > { %v1979_v41 = vsel %vm1978_vm13, %v1947_v32, %v7625_v12  ;;  %v2076_v12 = vpop.permute.xlu0 %2075  ;;  %v1896_v32 = vadd.f32 %v1868_v27, %v7797_v1  ;;  %v7986_v27 = vld [vmem:[#allocation7] sm:$0xff] }
 0x39c   : > { %v2007_v30 = vadd.f32 %v1979_v41, %v1892_v6  ;;  %v1984_v6 = vsel %vm1978_vm13, %v7843_v34, %v1959_v49 }
 0x39d   : > { %v2011_v41 = vadd.f32 %v1983_v55, %v1896_v32 }
 0x39e   : > { %v2122_v57 = vadd.f32 %v2094_v16, %v2007_v30 }
 0x3a0   : > { %v2148_v48 = vadd.f32 %v7823_v18, %v2122_v57 }
 0x3a2   : > { %v7873_v10 = vmax.f32 %v2148_v48, 0.0  ;;  %v2088_v40 = vpop.permute.xlu1 %2087  ;;  %v2074_v36 = vpop.permute.xlu2 %2073  ;;  %v5475_v48 = vpack.i.bf16 %v7830_v35, %v7771_v17 }
 0x3a3   : > { %v2105_v24 = vsel %vm2093_vm14, %v7730_v23, %v2088_v40  ;;  %v2100_v44 = vsel %vm2093_vm14, %v2074_v36, %v2076_v12  ;;  %v1905_v23 = vadd.f32 %v1877_v28, %v7804_v61  ;;  %v5510_v28 = vpack.i.bf16 %v7830_v35, %v7828_v50 }
 0x3a4   : > { %v2133_v56 = vadd.f32 %v2105_v24, %v2018_v2  ;;  %v2128_v7 = vadd.f32 %v2100_v44, %v2013_v59  ;;  %v5470_v12 = vpack.i.bf16 %v7828_v50, %v7873_v10  ;;  %v5505_v24 = vpack.i.bf16 %v7873_v10, %v7771_v17 }
 0x3a5   : > { %v2020_v19 = vadd.f32 %v1992_v29, %v1905_v23 }
 0x3a6   : > { %v2159_v52 = vadd.f32 %v7764_v58, %v2133_v56  ;;  %v2154_v46 = vadd.f32 %v7823_v18, %v2128_v7  ;;  %v5515_v7 = vpack.i.bf16 %v7832_v26, %v7773_v14 }
 0x3a8   : > { %v7888_v42 = vmax.f32 %v2159_v52, 0.0  ;;  %v2168_v54 = vmax.f32 %v2154_v46, 0.0  ;;  %v2975_v52 = vld [vmem:[%s8312_s4] sm:$0xff] }
 0x3aa   : > { %v2090_v53 = vpop.permute.xlu1 %2089  ;;  %2517 = vmatpush.msra.mxu3 %v7888_v42  ;;  %v5445_v31 = vpack.i.bf16 %v7888_v42, %v7850_v25  ;;  %2183 = vst.msk [vmem:[#allocation2 + $0x30] sm:$0xff] %vm2182_vm15, %v2168_v54 }
 0x3ab   : > { %v2106_v51 = vsel %vm2093_vm14, %v2088_v40, %v2090_v53  ;;  %v2107_v15 = vsel %vm2093_vm14, %v2090_v53, %v2092_v38  ;;  %v1897_v38 = vadd.f32 %v1869_v37, %v7799_v47 }
 0x3ac   : > { %v2134_v61 = vadd.f32 %v2106_v51, %v2019_v21  ;;  %v2135_v20 = vadd.f32 %v2107_v15, %v2020_v19  ;;  %5446 = vrot.lane.b32.xlu1 %v5445_v31, %s5832_s24  ;;  %v7980_v15 = vld [vmem:[#allocation7 + $0x8] sm:$0xff] }
 0x3ad   : > { %v2012_v8 = vadd.f32 %v1984_v6, %v1897_v38 }
 0x3ae   : > { %v2160_v5 = vadd.f32 %v7764_v58, %v2134_v61  ;;  %v2161_v45 = vadd.f32 %v7764_v58, %v2135_v20 }
 0x3b0   : > { %v7913_v62 = vmax.f32 %v2160_v5, 0.0  ;;  %v2175_v63 = vmax.f32 %v2161_v45, 0.0 }
 0x3b1   : > { %v7923_v9 = vld [vmem:[#allocation2 + $0x30] sm:$0xff] }
 0x3b2   : > { %v2072_v39 = vpop.permute.xlu1 %2071  ;;  %2190 = vst.msk [vmem:[#allocation2 + $0x68] sm:$0xff] %vm2182_vm15, %v2175_v63  ;;  %v5485_v40 = vpack.i.bf16 %v7832_v26, %v7913_v62  ;;  %v5520_v56 = vpack.i.bf16 %v7913_v62, %v7888_v42 }
 0x3b3   : > { %v2098_v58 = vsel %vm2093_vm14, %v7787_v43, %v2072_v39  ;;  %v2099_v13 = vsel %vm2093_vm14, %v2072_v39, %v2074_v36  ;;  %v5480_v36 = vpack.i.bf16 %v7888_v42, %v7773_v14 }
 0x3b4   : > { %v2126_v4 = vadd.f32 %v2098_v58, %v2011_v41  ;;  %v2127_v30 = vadd.f32 %v2099_v13, %v2012_v8 }
 0x3b6   : > { %v2152_v34 = vadd.f32 %v7823_v18, %v2126_v4  ;;  %v2153_v1 = vadd.f32 %v7823_v18, %v2127_v30 }
 0x3b8   : > { %v2166_v47 = vmax.f32 %v2152_v34, 0.0  ;;  %v7921_v49 = vmax.f32 %v2153_v1, 0.0 }
 0x3b9   : > { %v7925_v16 = vld [vmem:[#allocation2 + $0x68] sm:$0xff] }
 0x3ba   : > { %2518 = vmatpush.msra.mxu3 %v2166_v47  ;;  %v5455_v3 = vpack.i.bf16 %v7923_v9, %v2166_v47  ;;  %v5460_v43 = vpack.i.bf16 %v7921_v49, %v7913_v62  ;;  %v5450_v57 = vpack.i.bf16 %v7873_v10, %v7925_v16  ;;  %v5490_v59 = vpack.i.bf16 %v7921_v49, %v2166_v47 }
 0x3bb   : > { %v5495_v44 = vpack.i.bf16 %v7923_v9, %v7925_v16  ;;  %v5530_v46 = vpack.i.bf16 %v7923_v9, %v7921_v49  ;;  %v5525_v0 = vpack.i.bf16 %v2166_v47, %v7925_v16  ;;  %5237 = vmatmul.msk.f32.vlgmr.msra.gmra.mxu3 %vm2276_vm1, %v7986_v27 }
 0x3bc   : > { %5456 = vrot.lane.b32.xlu0 %v5455_v3, %s5832_s24  ;;  %5461 = vrot.lane.b32.xlu1 %v5460_v43, %s5832_s24 }
 0x3bd   : > { %5451 = vrot.lane.b32.xlu2 %v5450_v57, %s5832_s24 }
 0x3c1   : > { %v5432_v18 = vpop.permute.xlu1 %5431 }
 0x3c2   : > { %v5434_v11 = vunpack.i.h.bf16 %v5432_v18  ;;  %v5433_v33 = vunpack.i.l.bf16 %v5432_v18 }
 0x3c4   : > { %5476 = vrot.lane.b32.xlu1 %v5475_v48, %s5844_s27  ;;  %5471 = vrot.lane.b32.xlu0 %v5470_v12, %s5844_s27  ;;  %v2257_v2 = vsel %vm543_vm0, %v5433_v33, %v5434_v11 }
 0x3c5   : > { %5466 = vrot.lane.b32.xlu2 %v5465_v60, %s5844_s27  ;;  %2314 = vmatpush.msra.mxu1 %v2257_v2 }
 0x3cc   : > { %5491 = vrot.lane.b32.xlu1 %v5490_v59, %s5844_s27  ;;  %5486 = vrot.lane.b32.xlu0 %v5485_v40, %s5844_s27 }
 0x3cd   : > { %5481 = vrot.lane.b32.xlu2 %v5480_v36, %s5844_s27 }
 0x3d4   : > { %5506 = vrot.lane.b32.xlu1 %v5505_v24, %s5845_s6  ;;  %5501 = vrot.lane.b32.xlu0 %v5465_v60, %s5845_s6 }
 0x3d5   : > { %5496 = vrot.lane.b32.xlu2 %v5495_v44, %s5844_s27 }
 0x3dc   : > { %5521 = vrot.lane.b32.xlu1 %v5520_v56, %s5845_s6  ;;  %5516 = vrot.lane.b32.xlu0 %v5515_v7, %s5845_s6 }
 0x3dd   : > { %5511 = vrot.lane.b32.xlu2 %v5510_v28, %s5845_s6 }
 0x3e3   : > { %v5437_v29 = vpop.permute.xlu2 %5436 }
 0x3e4   : > { %v5438_v23 = vunpack.i.l.bf16 %v5437_v29  ;;  %2978 = vperm.xlu1 %5429, %v2975_v52   ;;  %5531 = vrot.lane.b32.xlu0 %v5530_v46, %s5845_s6  ;;  %v5439_v21 = vunpack.i.h.bf16 %v5437_v29 }
 0x3e5   : > { %5526 = vrot.lane.b32.xlu2 %v5525_v0, %s5845_s6 }
 0x3e6   : > { %v2258_v42 = vsel %vm543_vm0, %v5434_v11, %v5438_v23 }
 0x3e7   : > { %2334 = vmatpush.msra.mxu2 %v2258_v42 }
 0x3fb   : > { %v5442_v54 = vpop.permute.xlu0 %5441 }
 0x3fc   : > { %v5444_v19 = vunpack.i.h.bf16 %v5442_v54  ;;  %v5443_v53 = vunpack.i.l.bf16 %v5442_v54 }
 0x3fe   : > { %v2251_v31 = vsel %vm543_vm0, %v5439_v21, %v5443_v53  ;;  %v2252_v51 = vsel %vm543_vm0, %v5443_v53, %v5444_v19 }
 0x3ff   : > { %2315 = vmatpush.msra.mxu1 %v2251_v31  ;;  %2335 = vmatpush.msra.mxu2 %v2252_v51 }
 0x400   : > { %5228 = vmatmul.msk.f32.vlgmr.msra.gmra.mxu2 %vm2276_vm1, %v7980_v15  ;;  %5227 = vmatmul.msk.f32.vlgmr.msra.gmra.mxu1 %vm2276_vm1, %v7980_v15 }
 0x417   : > { %v5452_v61 = vpop.permute.xlu2 %5451 }
 0x418   : > { %v5453_v20 = vunpack.i.l.bf16 %v5452_v61  ;;  %v5454_v5 = vunpack.i.h.bf16 %v5452_v61 }
 0x41a   : > { %2414 = vmatpush.msrb.mxu2 %v5453_v20  ;;  %v2250_v63 = vsel %vm543_vm0, %v5454_v5, %v5439_v21 }
 0x41e   : > { %v5447_v37 = vpop.permute.xlu1 %5446 }
 0x41f   : > { %v5449_v45 = vunpack.i.h.bf16 %v5447_v37  ;;  %v5448_v55 = vunpack.i.l.bf16 %v5447_v37  ;;  %v5467_v38 = vpop.permute.xlu2 %5466 }
 0x420   : > { %v5469_v11 = vunpack.i.h.bf16 %v5467_v38 }
 0x421   : > { %v2256_v6 = vsel %vm543_vm0, %v5448_v55, %v5433_v33  ;;  %v2259_v32 = vsel %vm543_vm0, %v5438_v23, %v5449_v45  ;;  %v5468_v33 = vunpack.i.l.bf16 %v5467_v38 }
 0x422   : > { %2294 = vmatpush.msra.mxu0 %v2256_v6  ;;  %2354 = vmatpush.msrb.mxu1 %v2259_v32 }
 0x424   : > { %2295 = vmatpush.msra.mxu0 %v2250_v63 }
 0x425   : > { %5226 = vmatmul.msk.f32.vlgmr.msra.gmra.mxu0 %vm2276_vm1, %v7980_v15 }
 0x427   : > { %v7995_v41 = vpop.permute.xlu2 %5481 }
 0x42e   : > { %v5457_v8 = vpop.permute.xlu0 %5456  ;;  %v5462_v39 = vpop.permute.xlu1 %5461 }
 0x42f   : > { %v5458_v58 = vunpack.i.l.bf16 %v5457_v8  ;;  %v5463_v13 = vunpack.i.l.bf16 %v5462_v39  ;;  %v5459_v4 = vunpack.i.h.bf16 %v5457_v8  ;;  %v5464_v30 = vunpack.i.h.bf16 %v5462_v39  ;;  %v8010_v48 = vpop.permute.xlu2 %5496 }
 0x430   : > { %v5499_v44 = vunpack.i.h.bf16 %v8010_v48 }
 0x431   : > { %2415 = vmatpush.msrb.mxu2 %v5459_v4  ;;  %v2253_v34 = vsel %vm543_vm0, %v5444_v19, %v5458_v58  ;;  %v2260_v1 = vsel %vm543_vm0, %v5449_v45, %v5463_v13  ;;  %v2261_v47 = vsel %vm543_vm0, %v5463_v13, %v5453_v20  ;;  %v2254_v3 = vsel %vm543_vm0, %v5458_v58, %v5464_v30 }
 0x432   : > { %2355 = vmatpush.msrb.mxu1 %v2253_v34  ;;  %2374 = vmatpush.msrb.mxu0 %v2260_v1  ;;  %v2255_v43 = vsel %vm543_vm0, %v5464_v30, %v5459_v4  ;;  %v2770_v34 = vld [vmem:[#allocation7 + $0x18] sm:$0xff] }
 0x433   : > { %5232 = vmatmul.msk.f32.vlgmr.msrb.gmra.mxu2 %vm2276_vm1, %v7980_v15  ;;  %5229 = vmatmul.msk.f32.vlgmr.msrb.gmra.mxu1 %vm2276_vm1, %v7980_v15 }
 0x434   : > { %2437 = vmatpush.msra.mxu2 %v7850_v25  ;;  %2394 = vmatpush.msra.mxu1 %v2261_v47 }
 0x435   : > { %2375 = vmatpush.msrb.mxu0 %v2254_v3 }
 0x436   : > { %2438 = vmatpush.msra.mxu2 %v7873_v10  ;;  %5230 = vmatmul.msk.f32.vlgmr.msrb.gmra.mxu0 %vm2276_vm1, %v7980_v15  ;;  %v5477_v57 = vpop.permute.xlu1 %5476  ;;  %v5472_v18 = vpop.permute.xlu0 %5471 }
 0x437   : > { %2395 = vmatpush.msra.mxu1 %v2255_v43  ;;  %2457 = vmatpush.msra.mxu0 %v7769_v22  ;;  %v5478_v25 = vunpack.i.l.bf16 %v5477_v57  ;;  %v5474_v10 = vunpack.i.h.bf16 %v5472_v18  ;;  %v5473_v12 = vunpack.i.l.bf16 %v5472_v18  ;;  %v5479_v2 = vunpack.i.h.bf16 %v5477_v57  ;;  %v5512_v56 = vpop.permute.xlu2 %5511 }
 0x438   : > { %2497 = vmatpush.msrb.mxu2 %v7773_v14  ;;  %v2599_v22 = vsel %vm858_vm3, %v5468_v33, %v5469_v11  ;;  %v8027_v14 = vld [vmem:[#allocation7 + $0x10] sm:$0xff]  ;;  %v5514_v31 = vunpack.i.h.bf16 %v5512_v56  ;;  %v5513_v51 = vunpack.i.l.bf16 %v5512_v56 }
 0x439   : > { %2477 = vmatpush.msrb.mxu1 %v7771_v17  ;;  %2458 = vmatpush.msra.mxu0 %v7828_v50  ;;  %v2600_v60 = vsel %vm858_vm3, %v5469_v11, %v5478_v25  ;;  %v2593_v17 = vsel %vm858_vm3, %v5473_v12, %v5474_v10  ;;  %v5484_v50 = vunpack.i.h.bf16 %v7995_v41 }
 0x43a   : > { %2498 = vmatpush.msrb.mxu2 %v7832_v26  ;;  %2656 = vmatpush.msrb.mxu3 %v2600_v60  ;;  %v2594_v26 = vsel %vm858_vm3, %v5474_v10, %v5479_v2  ;;  %v2800_v5 = vsel %vm963_vm4, %v5513_v51, %v5514_v31 }
 0x43b   : > { %2478 = vmatpush.msrb.mxu1 %v7830_v35  ;;  %2537 = vmatpush.msrb.mxu0 %v7913_v62  ;;  %v5483_v35 = vunpack.i.l.bf16 %v7995_v41 }
 0x43c   : > { %5233 = vmatmul.msk.f32.vlgmr.msra.gmra.mxu2 %vm2276_vm1, %v7986_v27  ;;  %5231 = vmatmul.msk.f32.vlgmr.msra.gmra.mxu1 %vm2276_vm1, %v7980_v15 }
 0x43d   : > { %2636 = vmatpush.msra.mxu2 %v2599_v22  ;;  %2538 = vmatpush.msrb.mxu0 %v7921_v49  ;;  %v5498_v49 = vunpack.i.l.bf16 %v8010_v48  ;;  %v2602_v0 = vsel %vm858_vm3, %v5483_v35, %v5484_v50 }
 0x43e   : > { %2557 = vmatpush.msra.mxu1 %v7925_v16  ;;  %v5492_v62 = vpop.permute.xlu1 %5491  ;;  %v5487_v59 = vpop.permute.xlu0 %5486  ;;  %2657 = vmatpush.msrb.mxu3 %v2594_v26  ;;  %v2601_v16 = vsel %vm858_vm3, %v5478_v25, %v5483_v35 }
 0x43f   : > { %2637 = vmatpush.msra.mxu2 %v2593_v17  ;;  %5234 = vmatmul.msk.f32.vlgmr.msra.gmra.mxu0 %vm2276_vm1, %v7986_v27  ;;  %v5494_v40 = vunpack.i.h.bf16 %v5492_v62  ;;  %v5489_v36 = vunpack.i.h.bf16 %v5487_v59  ;;  %v5488_v24 = vunpack.i.l.bf16 %v5487_v59  ;;  %v5493_v7 = vunpack.i.l.bf16 %v5492_v62  ;;  %v5527_v20 = vpop.permute.xlu2 %5526  ;;  %v2520_v22 = vpop.f32.mrf.mxu3 }
 0x440   : > { %2558 = vmatpush.msra.mxu1 %v7923_v9  ;;  %5241 = vmatmul.msk.f32.vlgmr.msrb.gmra.mxu3 %vm2276_vm1, %v8027_v14  ;;  %v5528_v45 = vunpack.i.l.bf16 %v5527_v20  ;;  %v5529_v13 = vunpack.i.h.bf16 %v5527_v20 }
 0x441   : > { %2676 = vmatpush.msra.mxu0 %v2601_v16  ;;  %v2595_v28 = vsel %vm858_vm3, %v5479_v2, %v5489_v36  ;;  %v2603_v52 = vsel %vm858_vm3, %v5484_v50, %v5488_v24  ;;  %v2604_v46 = vsel %vm858_vm3, %v5488_v24, %v5498_v49  ;;  %v2598_v9 = vsel %vm858_vm3, %v5494_v40, %v5499_v44 }
 0x442   : > { %2736 = vmatpush.msra.mxu3 %v2604_v46  ;;  %v2597_v29 = vsel %vm858_vm3, %v5493_v7, %v5494_v40  ;;  %v2596_v54 = vsel %vm858_vm3, %v5489_v36, %v5493_v7 }
 0x443   : > { %2677 = vmatpush.msra.mxu0 %v2595_v28 }
 0x444   : > { %5236 = vmatmul.msk.f32.vlgmr.msrb.gmra.mxu2 %vm2276_vm1, %v7986_v27  ;;  %2737 = vmatpush.msra.mxu3 %v2598_v9 }
 0x445   : > { %2716 = vmatpush.msrb.mxu2 %v2603_v52  ;;  %5235 = vmatmul.msk.f32.vlgmr.msrb.gmra.mxu1 %vm2276_vm1, %v7986_v27 }
 0x446   : > { %2696 = vmatpush.msrb.mxu1 %v2602_v0  ;;  %v5507_v23 = vpop.permute.xlu1 %5506  ;;  %v5502_v42 = vpop.permute.xlu0 %5501 }
 0x447   : > { %2717 = vmatpush.msrb.mxu2 %v2597_v29  ;;  %5238 = vmatmul.msk.f32.vlgmr.msrb.gmra.mxu0 %vm2276_vm1, %v7986_v27  ;;  %v5508_v21 = vunpack.i.l.bf16 %v5507_v23  ;;  %v5504_v19 = vunpack.i.h.bf16 %v5502_v42  ;;  %v5503_v53 = vunpack.i.l.bf16 %v5502_v42  ;;  %v5509_v61 = vunpack.i.h.bf16 %v5507_v23 }
 0x448   : > { %2697 = vmatpush.msrb.mxu1 %v2596_v54  ;;  %5245 = vmatmul.msk.f32.vlgmr.msra.gmra.mxu3 %vm2276_vm1, %v8027_v14 }
 0x449   : > { %2756 = vmatpush.msrb.mxu0 %v5498_v49  ;;  %v2806_v15 = vsel %vm963_vm4, %v5504_v19, %v5508_v21  ;;  %v2805_v37 = vsel %vm963_vm4, %v5503_v53, %v5504_v19  ;;  %v2799_v55 = vsel %vm963_vm4, %v5509_v61, %v5513_v51 }
 0x44b   : > { %2757 = vmatpush.msrb.mxu0 %v5499_v44 }
 0x44c   : > { %5240 = vmatmul.msk.f32.vlgmr.msra.gmra.mxu2 %vm2276_vm1, %v8027_v14 }
 0x44d   : > { %2862 = vmatpush.msra.mxu2 %v2806_v15  ;;  %5239 = vmatmul.msk.f32.vlgmr.msra.gmra.mxu1 %vm2276_vm1, %v7986_v27 }
 0x44e   : > { %2842 = vmatpush.msra.mxu1 %v2805_v37  ;;  %v5522_v6 = vpop.permute.xlu1 %5521  ;;  %v5517_v32 = vpop.permute.xlu0 %5516 }
 0x44f   : > { %2863 = vmatpush.msra.mxu2 %v2800_v5  ;;  %5242 = vmatmul.msk.f32.vlgmr.msra.gmra.mxu0 %vm2276_vm1, %v8027_v14  ;;  %v5524_v38 = vunpack.i.h.bf16 %v5522_v6  ;;  %v5523_v63 = vunpack.i.l.bf16 %v5522_v6  ;;  %v5519_v41 = vunpack.i.h.bf16 %v5517_v32  ;;  %v5518_v8 = vunpack.i.l.bf16 %v5517_v32 }
 0x450   : > { %2843 = vmatpush.msra.mxu1 %v2799_v55 }
 0x451   : > { %v2807_v39 = vsel %vm963_vm4, %v5508_v21, %v5518_v8  ;;  %v2808_v27 = vsel %vm963_vm4, %v5518_v8, %v5523_v63  ;;  %v2810_v58 = vsel %vm963_vm4, %v5524_v38, %v5528_v45  ;;  %v2809_v4 = vsel %vm963_vm4, %v5523_v63, %v5524_v38 }
 0x452   : > { %2882 = vmatpush.msrb.mxu3 %v2807_v39  ;;  %2902 = vmatpush.msra.mxu0 %v2808_v27  ;;  %v2801_v30 = vsel %vm963_vm4, %v5514_v31, %v5519_v41  ;;  %v2802_v1 = vsel %vm963_vm4, %v5519_v41, %v5529_v13 }
 0x454   : > { %5244 = vmatmul.msk.f32.vlgmr.msrb.gmra.mxu2 %vm2276_vm1, %v8027_v14  ;;  %2883 = vmatpush.msrb.mxu3 %v2801_v30 }
 0x455   : > { %2942 = vmatpush.msrb.mxu2 %v2810_v58  ;;  %5243 = vmatmul.msk.f32.vlgmr.msrb.gmra.mxu1 %vm2276_vm1, %v8027_v14 }
 0x456   : > { %2903 = vmatpush.msra.mxu0 %v2802_v1  ;;  %2922 = vmatpush.msrb.mxu1 %v2809_v4  ;;  %v5532_v47 = vpop.permute.xlu0 %5531  ;;  %v2979_v29 = vpop.permute.xlu1 %2978 }
 0x457   : > { %5249 = vmatmul.msk.f32.vlgmr.msrb.gmra.mxu3 %vm2276_vm1, %v2770_v34  ;;  %5246 = vmatmul.msk.f32.vlgmr.msrb.gmra.mxu0 %vm2276_vm1, %v8027_v14  ;;  %v5534_v3 = vunpack.i.h.bf16 %v5532_v47  ;;  %v5533_v43 = vunpack.i.l.bf16 %v5532_v47 }
 0x458   : > { %2962 = vmatpush.msra.mxu3 %v5528_v45 }
 0x459   : > { %v2803_v57 = vsel %vm963_vm4, %v5529_v13, %v5533_v43  ;;  %v2804_v18 = vsel %vm963_vm4, %v5533_v43, %v5534_v3 }
 0x45a   : > { %2963 = vmatpush.msra.mxu3 %v5534_v3  ;;  %2923 = vmatpush.msrb.mxu1 %v2803_v57 }
 0x45b   : > { %2943 = vmatpush.msrb.mxu2 %v2804_v18 }
 0x45c   : > { %5248 = vmatmul.msk.f32.vlgmr.msra.gmra.mxu2 %vm2276_vm1, %v2770_v34 }
 0x45d   : > { %5247 = vmatmul.msk.f32.vlgmr.msra.gmra.mxu1 %vm2276_vm1, %v2770_v34 }
 0x45f   : > { %5253 = vmatmul.msk.f32.vlgmr.msra.gmra.mxu3 %vm2276_vm1, %v2770_v34  ;;  %5250 = vmatmul.msk.f32.vlgmr.msra.gmra.mxu0 %vm2276_vm1, %v2770_v34 }
 0x464   : > { %5252 = vmatmul.msk.f32.vlgmr.msrb.gmra.mxu2 %vm2276_vm1, %v2770_v34 }
 0x465   : > { %5251 = vmatmul.msk.f32.vlgmr.msrb.gmra.mxu1 %vm2276_vm1, %v2770_v34 }
 0x47d   : > { %v2317_v11 = vpop.f32.mrf.mxu1 }
 0x483   : > { %v2337_v48 = vpop.f32.mrf.mxu2 }
 0x4a2   : > { %v2297_v33 = vpop.f32.mrf.mxu0 }
 0x4b0   : > { %v2357_v25 = vpop.f32.mrf.mxu1 }
 0x4b3   : > { %v2377_v10 = vpop.f32.mrf.mxu0 }
 0x4b4   : > { %v2521_v37 = vadd.f32 %v2520_v22, %v2377_v10  ;;  %v3204_v10 = vld [vmem:[#allocation9 + $0x380] sm:$0xff] }
 0x4b5   : > { %v3596_v22 = vld [vmem:[#allocation9 + $0xfc0] sm:$0xff] }
 0x4b6   : > { %v2417_v12 = vpop.f32.mrf.mxu2  ;;  %3939 = vmatpush.msrb.mxu3 %v3596_v22  ;;  %v3500_v22 = vld [vmem:[#allocation9 + $0xcc0] sm:$0xff] }
 0x4b9   : > { %v2397_v60 = vpop.f32.mrf.mxu1 }
 0x4bc   : > { %v2460_v2 = vpop.f32.mrf.mxu0 }
 0x4bd   : > { %v2461_v23 = vadd.f32 %v2460_v2, %v2317_v11  ;;  %v3340_v2 = vld [vmem:[#allocation9 + $0x7c0] sm:$0xff] }
 0x4be   : > { %3899 = vmatpush.msra.mxu1 %v3340_v2  ;;  %v3092_v2 = vld [vmem:[#allocation9] sm:$0xff] }
 0x4bf   : > { %v2440_v17 = vpop.f32.mrf.mxu2 }
 0x4c0   : > { %v2441_v56 = vadd.f32 %v2440_v17, %v2297_v33  ;;  %v3332_v17 = vld [vmem:[#allocation9 + $0x780] sm:$0xff] }
 0x4c1   : > { %3900 = vmatpush.msra.mxu1 %v3332_v17 }
 0x4c2   : > { %v2480_v14 = vpop.f32.mrf.mxu1 }
 0x4c3   : > { %v2659_v26 = vpop.f32.mrf.mxu3  ;;  %v2481_v44 = vadd.f32 %v2480_v14, %v2337_v48  ;;  %v3588_v14 = vld [vmem:[#allocation9 + $0xf80] sm:$0xff] }
 0x4c4   : > { %v2540_v50 = vpop.f32.mrf.mxu0  ;;  %v2763_v53 = vadd.f32 %v2659_v26, %v2461_v23  ;;  %v3580_v26 = vld [vmem:[#allocation9 + $0xf40] sm:$0xff]  ;;  %3940 = vmatpush.msrb.mxu3 %v3588_v14 }
 0x4c5   : > { %v2541_v27 = vadd.f32 %v2540_v50, %v2397_v60  ;;  %v3188_v60 = vld [vmem:[#allocation9 + $0x300] sm:$0xff] }
 0x4c6   : > { %v3180_v50 = vld [vmem:[#allocation9 + $0x2c0] sm:$0xff]  ;;  %3941 = vmatpush.msrb.mxu3 %v3580_v26 }
 0x4c7   : > { %v2500_v35 = vpop.f32.mrf.mxu2  ;;  %v3548_v23 = vld [vmem:[#allocation9 + $0xe40] sm:$0xff] }
 0x4c8   : > { %v2501_v28 = vadd.f32 %v2500_v35, %v2357_v25  ;;  %v3212_v25 = vld [vmem:[#allocation9 + $0x3c0] sm:$0xff] }
 0x4c9   : > { %3879 = vmatpush.msrb.mxu0 %v3212_v25  ;;  %v3324_v35 = vld [vmem:[#allocation9 + $0x740] sm:$0xff] }
 0x4ca   : > { %v2560_v62 = vpop.f32.mrf.mxu1  ;;  %3901 = vmatpush.msra.mxu1 %v3324_v35  ;;  %v3508_v25 = vld [vmem:[#allocation9 + $0xd00] sm:$0xff] }
 0x4cb   : > { %v2739_v40 = vpop.f32.mrf.mxu3  ;;  %v2561_v15 = vadd.f32 %v2560_v62, %v2417_v12  ;;  %v3196_v12 = vld [vmem:[#allocation9 + $0x340] sm:$0xff]  ;;  %3880 = vmatpush.msrb.mxu0 %v3204_v10 }
 0x4cc   : > { %v2679_v59 = vpop.f32.mrf.mxu0  ;;  %v2767_v34 = vadd.f32 %v2739_v40, %v2541_v27  ;;  %v3572_v40 = vld [vmem:[#allocation9 + $0xf00] sm:$0xff] }
 0x4cd   : > { %v2764_v7 = vadd.f32 %v2679_v59, %v2481_v44  ;;  %3881 = vmatpush.msrb.mxu0 %v3196_v12  ;;  %v3172_v59 = vld [vmem:[#allocation9 + $0x280] sm:$0xff]  ;;  %3942 = vmatpush.msrb.mxu3 %v3572_v40 }
 0x4ce   : > { %v3532_v27 = vld [vmem:[#allocation9 + $0xdc0] sm:$0xff] }
 0x4cf   : > { %v2639_v49 = vpop.f32.mrf.mxu2  ;;  %3882 = vmatpush.msrb.mxu0 %v3188_v60  ;;  %v3244_v12 = vld [vmem:[#allocation9 + $0x4c0] sm:$0xff] }
 0x4d0   : > { %v2762_v52 = vadd.f32 %v2639_v49, %v2441_v56  ;;  %v3316_v49 = vld [vmem:[#allocation9 + $0x700] sm:$0xff] }
 0x4d1   : > { %3883 = vmatpush.msrb.mxu0 %v3180_v50  ;;  %3902 = vmatpush.msra.mxu1 %v3316_v49  ;;  %v3564_v56 = vld [vmem:[#allocation9 + $0xec0] sm:$0xff] }
 0x4d2   : > { %v2699_v36 = vpop.f32.mrf.mxu1  ;;  %3943 = vmatpush.msrb.mxu3 %v3564_v56  ;;  %v3452_v60 = vld [vmem:[#allocation9 + $0xb40] sm:$0xff] }
 0x4d3   : > { %v2765_v42 = vadd.f32 %v2699_v36, %v2501_v28  ;;  %v3164_v36 = vld [vmem:[#allocation9 + $0x240] sm:$0xff]  ;;  %3884 = vmatpush.msrb.mxu0 %v3172_v59 }
 0x4d4   : > { %v2759_v24 = vpop.f32.mrf.mxu0  ;;  %v3300_v28 = vld [vmem:[#allocation9 + $0x680] sm:$0xff] }
 0x4d5   : > { %v2768_v6 = vadd.f32 %v2759_v24, %v2561_v15  ;;  %v3308_v24 = vld [vmem:[#allocation9 + $0x6c0] sm:$0xff]  ;;  %3885 = vmatpush.msrb.mxu0 %v3164_v36 }
 0x4d6   : > { %3903 = vmatpush.msra.mxu1 %v3308_v24  ;;  %v3724_v50 = vld [vmem:[#allocation9 + $0x13c0] sm:$0xff]  ;;  %v3213_v24 = vld [vmem:[#allocation9 + $0x3c8] sm:$0xff] }
 0x4d7   : > { %v2719_v16 = vpop.f32.mrf.mxu2  ;;  %v3236_v35 = vld [vmem:[#allocation9 + $0x480] sm:$0xff] }
 0x4d8   : > { %v2766_v32 = vadd.f32 %v2719_v16, %v2521_v37  ;;  %3904 = vmatpush.msra.mxu1 %v3300_v28  ;;  %v3492_v26 = vld [vmem:[#allocation9 + $0xc80] sm:$0xff] }
 0x4d9   : > { %v3220_v59 = vld [vmem:[#allocation9 + $0x400] sm:$0xff] }
 0x4da   : > { %v2885_v46 = vpop.f32.mrf.mxu3  ;;  %v2845_v9 = vpop.f32.mrf.mxu1  ;;  %v3476_v49 = vld [vmem:[#allocation9 + $0xc00] sm:$0xff] }
 0x4db   : > { %v2970_v0 = vadd.f32 %v2885_v46, %v2764_v7  ;;  %v2968_v54 = vadd.f32 %v2845_v9, %v2762_v52  ;;  %v3156_v7 = vld [vmem:[#allocation9 + $0x200] sm:$0xff] }
 0x4dc   : > { %v2905_v19 = vpop.f32.mrf.mxu0  ;;  %v3556_v52 = vld [vmem:[#allocation9 + $0xe80] sm:$0xff]  ;;  %3886 = vmatpush.msrb.mxu0 %v3156_v7 }
 0x4dd   : > { %v8087_v21 = vadd.f32 %v2979_v29, %v2970_v0  ;;  %v8089_v31 = vadd.f32 %v2979_v29, %v2968_v54  ;;  %v2971_v51 = vadd.f32 %v2905_v19, %v2765_v42  ;;  %v3148_v9 = vld [vmem:[#allocation9 + $0x1c0] sm:$0xff]  ;;  %3944 = vmatpush.msrb.mxu3 %v3556_v52 }
 0x4de   : > { %v3292_v0 = vld [vmem:[#allocation9 + $0x640] sm:$0xff]  ;;  %3887 = vmatpush.msrb.mxu0 %v3148_v9 }
 0x4df   : > { %v2990_v61 = vmax.f32 %v8087_v21, 0.0  ;;  %v2865_v20 = vpop.f32.mrf.mxu2  ;;  %v2988_v5 = vmax.f32 %v8089_v31, 0.0  ;;  %v8093_v45 = vadd.f32 %v2979_v29, %v2971_v51  ;;  %v3140_v54 = vld [vmem:[#allocation9 + $0x180] sm:$0xff]  ;;  %3905 = vmatpush.msra.mxu1 %v3292_v0  ;;  %3945 = vmatpush.msrb.mxu3 %v3548_v23 }
 0x4e0   : > { %v2969_v55 = vadd.f32 %v2865_v20, %v2763_v53  ;;  %v3284_v19 = vld [vmem:[#allocation9 + $0x600] sm:$0xff]  ;;  %3888 = vmatpush.msrb.mxu0 %v3140_v54 }
 0x4e1   : > { %v2991_v38 = vmax.f32 %v8093_v45, 0.0  ;;  %v3540_v20 = vld [vmem:[#allocation9 + $0xe00] sm:$0xff]  ;;  %3906 = vmatpush.msra.mxu1 %v3284_v19 }
 0x4e2   : > { %v8096_v63 = vadd.f32 %v2979_v29, %v2969_v55  ;;  %v2965_v41 = vpop.f32.mrf.mxu3  ;;  %v2925_v8 = vpop.f32.mrf.mxu1  ;;  %3946 = vmatpush.msrb.mxu3 %v3540_v20  ;;  %v3116_v45 = vld [vmem:[#allocation9 + $0xc0] sm:$0xff] }
 0x4e3   : > { %v2974_v39 = vadd.f32 %v2965_v41, %v2768_v6  ;;  %v2972_v13 = vadd.f32 %v2925_v8, %v2766_v32  ;;  %v5535_v4 = vpack.i.bf16 %v2991_v38, %v2990_v61  ;;  %v3132_v6 = vld [vmem:[#allocation9 + $0x140] sm:$0xff] }
 0x4e4   : > { %v2989_v58 = vmax.f32 %v8096_v63, 0.0  ;;  %v3276_v32 = vld [vmem:[#allocation9 + $0x5c0] sm:$0xff]  ;;  %3889 = vmatpush.msrb.mxu0 %v3132_v6  ;;  %3947 = vmatpush.msrb.mxu3 %v3532_v27  ;;  %v3189_v6 = vld [vmem:[#allocation9 + $0x308] sm:$0xff] }
 0x4e5   : > { %v2987_v30 = vadd.f32 %v2979_v29, %v2974_v39  ;;  %v8103_v1 = vadd.f32 %v2979_v29, %v2972_v13  ;;  %5536 = vrot.lane.b32.xlu2 %v5535_v4, %s5832_s24  ;;  %3907 = vmatpush.msra.mxu1 %v3276_v32  ;;  %v3260_v63 = vld [vmem:[#allocation9 + $0x540] sm:$0xff] }
 0x4e6   : > { %3019 = vrot.lane.b32.xlu1 %v2989_v58, %s5832_s24  ;;  %v3852_v40 = vld [vmem:[#allocation9 + $0x17c0] sm:$0xff] }
 0x4e7   : > { %v2994_v47 = vmax.f32 %v2987_v30, 0.0  ;;  %v2945_v3 = vpop.f32.mrf.mxu2  ;;  %v2992_v43 = vmax.f32 %v8103_v1, 0.0  ;;  %v3124_v30 = vld [vmem:[#allocation9 + $0x100] sm:$0xff] }
 0x4e8   : > { %v2973_v57 = vadd.f32 %v2945_v3, %v2767_v34  ;;  %v3268_v34 = vld [vmem:[#allocation9 + $0x580] sm:$0xff]  ;;  %3890 = vmatpush.msrb.mxu0 %v3124_v30  ;;  %v3173_v30 = vld [vmem:[#allocation9 + $0x288] sm:$0xff] }
 0x4e9   : > { %3002 = vst.msk [vmem:[#allocation3 + $0x30] sm:$0xff] %vm3001_vm2, %v2994_v47  ;;  %v5540_v11 = vpack.i.bf16 %v2988_v5, %v2992_v43  ;;  %3908 = vmatpush.msra.mxu1 %v3268_v34  ;;  %v3108_v47 = vld [vmem:[#allocation9 + $0x80] sm:$0xff] }
 0x4ea   : > { %v8110_v18 = vadd.f32 %v2979_v29, %v2973_v57  ;;  %v3516_v3 = vld [vmem:[#allocation9 + $0xd40] sm:$0xff]  ;;  %3891 = vmatpush.msrb.mxu0 %v3116_v45 }
 0x4eb   : > { %5541 = vrot.lane.b32.xlu0 %v5540_v11, %s5832_s24  ;;  %v3460_v57 = vld [vmem:[#allocation9 + $0xb80] sm:$0xff]  ;;  %3909 = vmatpush.msra.mxu1 %v3260_v63  ;;  %v3157_v63 = vld [vmem:[#allocation9 + $0x208] sm:$0xff] }
 0x4ec   : > { %v2993_v33 = vmax.f32 %v8110_v18, 0.0  ;;  %v3100_v11 = vld [vmem:[#allocation9 + $0x40] sm:$0xff]  ;;  %3892 = vmatpush.msrb.mxu0 %v3108_v47  ;;  %v3149_v47 = vld [vmem:[#allocation9 + $0x1c8] sm:$0xff] }
 0x4ed   : > { %v3228_v18 = vld [vmem:[#allocation9 + $0x440] sm:$0xff] }
 0x4ee   : > { %3027 = vrot.lane.b32.xlu2 %v2993_v33, %s5832_s24  ;;  %3893 = vmatpush.msrb.mxu0 %v3100_v11  ;;  %v3700_v36 = vld [vmem:[#allocation9 + $0x1300] sm:$0xff] }
 0x4ef   : > { %v3676_v56 = vld [vmem:[#allocation9 + $0x1240] sm:$0xff] }
 0x4f0   : > { %v8121_v48 = vld [vmem:[#allocation3 + $0x30] sm:$0xff]  ;;  %3894 = vmatpush.msrb.mxu0 %v3092_v2  ;;  %v3668_v7 = vld [vmem:[#allocation9 + $0x1200] sm:$0xff] }
 0x4f1   : > { %v3660_v28 = vld [vmem:[#allocation9 + $0x11c0] sm:$0xff]  ;;  %v3125_v2 = vld [vmem:[#allocation9 + $0x108] sm:$0xff] }
 0x4f2   : > { %3959 = vmatpush.msra.mxu0 %v3724_v50  ;;  %v3652_v52 = vld [vmem:[#allocation9 + $0x1180] sm:$0xff] }
 0x4f3   : > { %3029 = vrot.lane.b32.xlu0 %v8121_v48, %s5832_s24  ;;  %v3636_v9 = vld [vmem:[#allocation9 + $0x1100] sm:$0xff]  ;;  %s417_s24 = sand.u32 1, %s5805_s10  }
 0x4f4   : > { %v3628_v0 = vld [vmem:[#allocation9 + $0x10c0] sm:$0xff]  ;;  %s418_s25 = scalar_lea.vmem [#allocation15], %s417_s24  ;;  %s5082_s3 = scalar_lea.sflag [#allocation6], %s417_s24 }
 0x4f5   : > { %v3844_v23 = vld [vmem:[#allocation9 + $0x1780] sm:$0xff]  ;;  %s5092_s26 = sshll.u32 %s418_s25, 4  ;;  %s5093_s26 = int_to_ptr.vmem [resolvable:$true] %s5092_s26 }
 0x4f6   : > { %v3444_v54 = vld [vmem:[#allocation9 + $0xb00] sm:$0xff] }
 0x4f7   : > { %v3612_v19 = vld [vmem:[#allocation9 + $0x1040] sm:$0xff] }
 0x4f8   : > { %v3604_v20 = vld [vmem:[#allocation9 + $0x1000] sm:$0xff] }
 0x4f9   : > { %v3428_v32 = vld [vmem:[#allocation9 + $0xa80] sm:$0xff] }
 0x4fa   : > { %v3812_v27 = vld [vmem:[#allocation9 + $0x1680] sm:$0xff] }
 0x4fb   : > { %v3412_v34 = vld [vmem:[#allocation9 + $0xa00] sm:$0xff] }
 0x4fc   : > { %v3404_v45 = vld [vmem:[#allocation9 + $0x9c0] sm:$0xff] }
 0x4fd   : > { %v3380_v11 = vld [vmem:[#allocation9 + $0x900] sm:$0xff] }
 0x4fe   : > { %v3756_v50 = vld [vmem:[#allocation9 + $0x14c0] sm:$0xff] }
 0x53f   : > { %v5537_v62 = vpop.permute.xlu2 %5536 }
 0x540   : > { %v5539_v44 = vunpack.i.h.bf16 %v5537_v62  ;;  %v5538_v16 = vunpack.i.l.bf16 %v5537_v62  ;;  %v3716_v62 = vld [vmem:[#allocation9 + $0x1380] sm:$0xff] }
 0x541   : > { %3960 = vmatpush.msra.mxu0 %v3716_v62  ;;  %v3748_v62 = vld [vmem:[#allocation9 + $0x1480] sm:$0xff] }
 0x542   : > { %v3033_v29 = vsel %vm543_vm0, %v5538_v16, %v5539_v44 }
 0x543   : > { %v8129_v37 = vmax.f32 %v2990_v61, %v3033_v29  ;;  %v3620_v29 = vld [vmem:[#allocation9 + $0x1080] sm:$0xff] }
 0x548   : > { %v3028_v55 = vpop.permute.xlu2 %3027 }
 0x558   : > { %v3020_v46 = vpop.permute.xlu1 %3019 }
 0x559   : > { %v3032_v53 = vsel %vm543_vm0, %v3020_v46, %v5538_v16  ;;  %v3684_v16 = vld [vmem:[#allocation9 + $0x1280] sm:$0xff] }
 0x55a   : > { %v8136_v13 = vmax.f32 %v2989_v58, %v3032_v53  ;;  %v3468_v58 = vld [vmem:[#allocation9 + $0xbc0] sm:$0xff] }
 0x55b   : > { %3919 = vmatpush.msra.mxu2 %v3468_v58  ;;  %v3836_v53 = vld [vmem:[#allocation9 + $0x1740] sm:$0xff] }
 0x55c   : > { %v3396_v58 = vld [vmem:[#allocation9 + $0x980] sm:$0xff] }
 0x55d   : > { %v5542_v42 = vpop.permute.xlu0 %5541  ;;  %3920 = vmatpush.msra.mxu2 %v3460_v57  ;;  %v3141_v57 = vld [vmem:[#allocation9 + $0x188] sm:$0xff] }
 0x55e   : > { %v5544_v51 = vunpack.i.h.bf16 %v5542_v42  ;;  %v5543_v15 = vunpack.i.l.bf16 %v5542_v42  ;;  %v3205_v42 = vld [vmem:[#allocation9 + $0x388] sm:$0xff] }
 0x55f   : > { %3921 = vmatpush.msra.mxu2 %v3452_v60  ;;  %v3764_v60 = vld [vmem:[#allocation9 + $0x1500] sm:$0xff] }
 0x560   : > { %v3031_v41 = vsel %vm543_vm0, %v5544_v51, %v3020_v46  ;;  %v3034_v8 = vsel %vm543_vm0, %v5539_v44, %v5543_v15  ;;  %v3035_v39 = vsel %vm543_vm0, %v5543_v15, %v3028_v55  ;;  %v3692_v44 = vld [vmem:[#allocation9 + $0x12c0] sm:$0xff]  ;;  %v3197_v51 = vld [vmem:[#allocation9 + $0x348] sm:$0xff] }
 0x561   : > { %v8140_v21 = vmax.f32 %v2988_v5, %v3031_v41  ;;  %v8144_v61 = vmax.f32 %v2991_v38, %v3034_v8  ;;  %v8148_v4 = vmax.f32 %v2992_v43, %v3035_v39  ;;  %v3524_v38 = vld [vmem:[#allocation9 + $0xd80] sm:$0xff]  ;;  %3922 = vmatpush.msra.mxu2 %v3444_v54  ;;  %v3181_v8 = vld [vmem:[#allocation9 + $0x2c8] sm:$0xff] }
 0x562   : > { %3948 = vmatpush.msrb.mxu3 %v3524_v38  ;;  %v3252_v43 = vld [vmem:[#allocation9 + $0x500] sm:$0xff]  ;;  %v3413_v54 = vld [vmem:[#allocation9 + $0xa08] sm:$0xff] }
 0x563   : > { %3066 = vrot.lane.b32.xlu0 %v8148_v4, %s5844_s27  ;;  %v5545_v31 = vpack.i.bf16 %v8144_v61, %v8129_v37  ;;  %v5550_v5 = vpack.i.bf16 %v8136_v13, %v8140_v21  ;;  %3910 = vmatpush.msra.mxu1 %v3252_v43  ;;  %v3644_v46 = vld [vmem:[#allocation9 + $0x1140] sm:$0xff] }
 0x564   : > { %3949 = vmatpush.msrb.mxu3 %v3516_v3  ;;  %v3436_v15 = vld [vmem:[#allocation9 + $0xac0] sm:$0xff] }
 0x565   : > { %v3030_v1 = vpop.permute.xlu0 %3029  ;;  %5546 = vrot.lane.b32.xlu1 %v5545_v31, %s5844_s27  ;;  %5551 = vrot.lane.b32.xlu2 %v5550_v5, %s5844_s27  ;;  %v3820_v41 = vld [vmem:[#allocation9 + $0x16c0] sm:$0xff]  ;;  %v3165_v5 = vld [vmem:[#allocation9 + $0x248] sm:$0xff] }
 0x566   : > { %v3036_v10 = vsel %vm543_vm0, %v3028_v55, %v3030_v1  ;;  %3950 = vmatpush.msrb.mxu3 %v3508_v25  ;;  %v8164_v14 = vmax.f32 %v8121_v48, %v3030_v1  ;;  %3911 = vmatpush.msra.mxu1 %v3244_v12  ;;  %v3708_v48 = vld [vmem:[#allocation9 + $0x1340] sm:$0xff] }
 0x567   : > { %v8161_v17 = vmax.f32 %v2993_v33, %v3036_v10  ;;  %v3484_v33 = vld [vmem:[#allocation9 + $0xc40] sm:$0xff]  ;;  %3961 = vmatpush.msra.mxu0 %v3708_v48  ;;  %3923 = vmatpush.msra.mxu2 %v3436_v15  ;;  %v3133_v10 = vld [vmem:[#allocation9 + $0x148] sm:$0xff] }
 0x568   : > { %3951 = vmatpush.msrb.mxu3 %v3500_v22  ;;  %3912 = vmatpush.msra.mxu1 %v3236_v35  ;;  %v3828_v55 = vld [vmem:[#allocation9 + $0x1700] sm:$0xff]  ;;  %v3117_v35 = vld [vmem:[#allocation9 + $0xc8] sm:$0xff] }
 0x569   : > { %3962 = vmatpush.msra.mxu0 %v3700_v36  ;;  %v3420_v39 = vld [vmem:[#allocation9 + $0xa40] sm:$0xff]  ;;  %3924 = vmatpush.msra.mxu2 %v3428_v32 }
 0x56a   : > { %3952 = vmatpush.msrb.mxu3 %v3492_v26  ;;  %3913 = vmatpush.msra.mxu1 %v3228_v18  ;;  %v3804_v31 = vld [vmem:[#allocation9 + $0x1640] sm:$0xff]  ;;  %v3109_v18 = vld [vmem:[#allocation9 + $0x88] sm:$0xff] }
 0x56b   : > { %3963 = vmatpush.msra.mxu0 %v3692_v44  ;;  %3925 = vmatpush.msra.mxu2 %v3420_v39  ;;  %v3796_v38 = vld [vmem:[#allocation9 + $0x1600] sm:$0xff] }
 0x56c   : > { %3953 = vmatpush.msrb.mxu3 %v3484_v33  ;;  %3914 = vmatpush.msra.mxu1 %v3220_v59  ;;  %v3788_v1 = vld [vmem:[#allocation9 + $0x15c0] sm:$0xff] }
 0x56d   : > { %3070 = vrot.lane.b32.xlu1 %v8164_v14, %s5844_s27  ;;  %3068 = vrot.lane.b32.xlu2 %v8161_v17, %s5844_s27  ;;  %v3388_v3 = vld [vmem:[#allocation9 + $0x940] sm:$0xff] }
 0x56e   : > { %3954 = vmatpush.msrb.mxu3 %v3476_v49  ;;  %3979 = vmatpush.msrb.mxu1 %v3852_v40  ;;  %v3780_v43 = vld [vmem:[#allocation9 + $0x1580] sm:$0xff]  ;;  %v3101_v49 = vld [vmem:[#allocation9 + $0x48] sm:$0xff] }
 0x56f   : > { %3964 = vmatpush.msra.mxu0 %v3684_v16  ;;  %3926 = vmatpush.msra.mxu2 %v3412_v34  ;;  %v3772_v25 = vld [vmem:[#allocation9 + $0x1540] sm:$0xff] }
 0x570   : > { %4019 = vmatpush.msra.mxu3 %v3213_v24  ;;  %3980 = vmatpush.msrb.mxu1 %v3844_v23  ;;  %v3372_v12 = vld [vmem:[#allocation9 + $0x8c0] sm:$0xff]  ;;  %v3093_v24 = vld [vmem:[#allocation9 + $0x8] sm:$0xff] }
 0x571   : > { %3965 = vmatpush.msra.mxu0 %v3676_v56  ;;  %3927 = vmatpush.msra.mxu2 %v3404_v45  ;;  %v3364_v22 = vld [vmem:[#allocation9 + $0x880] sm:$0xff]  ;;  %v3429_v23 = vld [vmem:[#allocation9 + $0xa88] sm:$0xff] }
 0x572   : > { %4020 = vmatpush.msra.mxu3 %v3205_v42  ;;  %3981 = vmatpush.msrb.mxu1 %v3836_v53  ;;  %v3356_v26 = vld [vmem:[#allocation9 + $0x840] sm:$0xff]  ;;  %v3421_v42 = vld [vmem:[#allocation9 + $0xa48] sm:$0xff] }
 0x573   : > { %3966 = vmatpush.msra.mxu0 %v3668_v7  ;;  %3928 = vmatpush.msra.mxu2 %v3396_v58  ;;  %v3348_v33 = vld [vmem:[#allocation9 + $0x800] sm:$0xff]  ;;  %v3373_v45 = vld [vmem:[#allocation9 + $0x8c8] sm:$0xff] }
 0x574   : > { %4021 = vmatpush.msra.mxu3 %v3197_v51  ;;  %3982 = vmatpush.msrb.mxu1 %v3828_v55  ;;  %v3740_v48 = vld [vmem:[#allocation9 + $0x1440] sm:$0xff]  ;;  %v3397_v51 = vld [vmem:[#allocation9 + $0x988] sm:$0xff] }
 0x575   : > { %3967 = vmatpush.msra.mxu0 %v3660_v28  ;;  %3929 = vmatpush.msra.mxu2 %v3388_v3  ;;  %v3868_v59 = vld [vmem:[#allocation9 + $0x1840] sm:$0xff]  ;;  %v3333_v58 = vld [vmem:[#allocation9 + $0x788] sm:$0xff] }
 0x576   : > { %4022 = vmatpush.msra.mxu3 %v3189_v6  ;;  %3983 = vmatpush.msrb.mxu1 %v3820_v41  ;;  %v3732_v40 = vld [vmem:[#allocation9 + $0x1400] sm:$0xff]  ;;  %v3389_v6 = vld [vmem:[#allocation9 + $0x948] sm:$0xff] }
 0x577   : > { %3968 = vmatpush.msra.mxu0 %v3652_v52  ;;  %3930 = vmatpush.msra.mxu2 %v3380_v11  ;;  %v3860_v36 = vld [vmem:[#allocation9 + $0x1800] sm:$0xff]  ;;  %v3469_v52 = vld [vmem:[#allocation9 + $0xbc8] sm:$0xff] }
 0x578   : > { %4023 = vmatpush.msra.mxu3 %v3181_v8  ;;  %3984 = vmatpush.msrb.mxu1 %v3812_v27  ;;  %v3381_v8 = vld [vmem:[#allocation9 + $0x908] sm:$0xff] }
 0x579   : > { %3969 = vmatpush.msra.mxu0 %v3644_v46  ;;  %3931 = vmatpush.msra.mxu2 %v3372_v12  ;;  %v3461_v46 = vld [vmem:[#allocation9 + $0xb88] sm:$0xff] }
 0x57a   : > { %4024 = vmatpush.msra.mxu3 %v3173_v30  ;;  %3985 = vmatpush.msrb.mxu1 %v3804_v31  ;;  %v3357_v3 = vld [vmem:[#allocation9 + $0x848] sm:$0xff] }
 0x57b   : > { %3970 = vmatpush.msra.mxu0 %v3636_v9  ;;  %3932 = vmatpush.msra.mxu2 %v3364_v22  ;;  %v3453_v9 = vld [vmem:[#allocation9 + $0xb48] sm:$0xff] }
 0x57c   : > { %4025 = vmatpush.msra.mxu3 %v3165_v5  ;;  %3986 = vmatpush.msrb.mxu1 %v3796_v38  ;;  %v3341_v5 = vld [vmem:[#allocation9 + $0x7c8] sm:$0xff] }
 0x57d   : > { %3971 = vmatpush.msra.mxu0 %v3628_v0  ;;  %3933 = vmatpush.msra.mxu2 %v3356_v26  ;;  %v3445_v0 = vld [vmem:[#allocation9 + $0xb08] sm:$0xff] }
 0x57e   : > { %4026 = vmatpush.msra.mxu3 %v3157_v63  ;;  %3987 = vmatpush.msrb.mxu1 %v3788_v1  ;;  %v3597_v38 = vld [vmem:[#allocation9 + $0xfc8] sm:$0xff] }
 0x57f   : > { %3972 = vmatpush.msra.mxu0 %v3620_v29  ;;  %3934 = vmatpush.msra.mxu2 %v3348_v33  ;;  %v3437_v29 = vld [vmem:[#allocation9 + $0xac8] sm:$0xff] }
 0x580   : > { %4027 = vmatpush.msra.mxu3 %v3149_v47  ;;  %3988 = vmatpush.msrb.mxu1 %v3780_v43  ;;  %v3725_v63 = vld [vmem:[#allocation9 + $0x13c8] sm:$0xff] }
 0x581   : > { %3973 = vmatpush.msra.mxu0 %v3612_v19  ;;  %4013 = vmatpush.msrb.mxu2 %v3868_v59  ;;  %v3405_v19 = vld [vmem:[#allocation9 + $0x9c8] sm:$0xff] }
 0x582   : > { %4028 = vmatpush.msra.mxu3 %v3141_v57  ;;  %3989 = vmatpush.msrb.mxu1 %v3772_v25  ;;  %v3589_v1 = vld [vmem:[#allocation9 + $0xf88] sm:$0xff] }
 0x583   : > { %3974 = vmatpush.msra.mxu0 %v3604_v20  ;;  %4014 = vmatpush.msrb.mxu2 %v3860_v36  ;;  %v3325_v47 = vld [vmem:[#allocation9 + $0x748] sm:$0xff]  ;;  %v3462_v36 = vld [vmem:[#allocation9 + $0xb90] sm:$0xff] }
 0x584   : > { %4029 = vmatpush.msra.mxu3 %v3133_v10  ;;  %3990 = vmatpush.msrb.mxu1 %v3764_v60  ;;  %v3581_v43 = vld [vmem:[#allocation9 + $0xf48] sm:$0xff] }
 0x585   : > { %v3709_v57 = vld [vmem:[#allocation9 + $0x1348] sm:$0xff] }
 0x586   : > { %4030 = vmatpush.msra.mxu3 %v3125_v2  ;;  %3991 = vmatpush.msrb.mxu1 %v3756_v50  ;;  %v3317_v11 = vld [vmem:[#allocation9 + $0x708] sm:$0xff] }
 0x587   : > { %v3349_v10 = vld [vmem:[#allocation9 + $0x808] sm:$0xff] }
 0x588   : > { %4031 = vmatpush.msra.mxu3 %v3117_v35  ;;  %3992 = vmatpush.msrb.mxu1 %v3748_v62  ;;  %v3573_v12 = vld [vmem:[#allocation9 + $0xf08] sm:$0xff] }
 0x589   : > { %v3701_v60 = vld [vmem:[#allocation9 + $0x1308] sm:$0xff] }
 0x58a   : > { %4032 = vmatpush.msra.mxu3 %v3109_v18  ;;  %3993 = vmatpush.msrb.mxu1 %v3740_v48  ;;  %v3869_v2 = vld [vmem:[#allocation9 + $0x1848] sm:$0xff]  ;;  %v3470_v48 = vld [vmem:[#allocation9 + $0xbd0] sm:$0xff] }
 0x58b   : > { %v3309_v35 = vld [vmem:[#allocation9 + $0x6c8] sm:$0xff] }
 0x58c   : > { %4033 = vmatpush.msra.mxu3 %v3101_v49  ;;  %3994 = vmatpush.msrb.mxu1 %v3732_v40  ;;  %v3565_v26 = vld [vmem:[#allocation9 + $0xec8] sm:$0xff] }
 0x58d   : > { %v3693_v62 = vld [vmem:[#allocation9 + $0x12c8] sm:$0xff] }
 0x58e   : > { %4034 = vmatpush.msra.mxu3 %v3093_v24  ;;  %v3861_v18 = vld [vmem:[#allocation9 + $0x1808] sm:$0xff] }
 0x58f   : > { %v3557_v33 = vld [vmem:[#allocation9 + $0xe88] sm:$0xff] }
 0x590   : > { %v3293_v59 = vld [vmem:[#allocation9 + $0x648] sm:$0xff] }
 0x591   : > { %v3549_v49 = vld [vmem:[#allocation9 + $0xe48] sm:$0xff] }
 0x592   : > { %v3677_v40 = vld [vmem:[#allocation9 + $0x1248] sm:$0xff] }
 0x593   : > { %v3285_v24 = vld [vmem:[#allocation9 + $0x608] sm:$0xff] }
 0x5bf   : > { %v5552_v44 = vpop.permute.xlu2 %5551 }
 0x5c0   : > { %v5554_v16 = vunpack.i.h.bf16 %v5552_v44  ;;  %v5553_v56 = vunpack.i.l.bf16 %v5552_v44  ;;  %v3541_v44 = vld [vmem:[#allocation9 + $0xe08] sm:$0xff] }
 0x5c2   : > { %v3072_v7 = vsel %vm858_vm3, %v5553_v56, %v5554_v16  ;;  %v3454_v56 = vld [vmem:[#allocation9 + $0xb50] sm:$0xff] }
 0x5c3   : > { %v8172_v28 = vmax.f32 %v8140_v21, %v3072_v7  ;;  %v3277_v7 = vld [vmem:[#allocation9 + $0x5c8] sm:$0xff] }
 0x5c5   : > { %3895 = vmatmul.f32.vlgmr.msrb.gmra.mxu0 %v8172_v28 }
 0x5c6   : > { %4059 = vmatpush.msrb.mxu0 %v3469_v52  ;;  %v3533_v52 = vld [vmem:[#allocation9 + $0xdc8] sm:$0xff] }
 0x5c7   : > { %v3069_v21 = vpop.permute.xlu2 %3068 }
 0x5c8   : > { %4060 = vmatpush.msrb.mxu0 %v3461_v46  ;;  %v3661_v46 = vld [vmem:[#allocation9 + $0x11c8] sm:$0xff] }
 0x5ca   : > { %4061 = vmatpush.msrb.mxu0 %v3453_v9  ;;  %v3446_v9 = vld [vmem:[#allocation9 + $0xb10] sm:$0xff] }
 0x5cc   : > { %4062 = vmatpush.msrb.mxu0 %v3445_v0  ;;  %v3269_v0 = vld [vmem:[#allocation9 + $0x588] sm:$0xff] }
 0x5ce   : > { %4063 = vmatpush.msrb.mxu0 %v3437_v29  ;;  %v3525_v29 = vld [vmem:[#allocation9 + $0xd88] sm:$0xff] }
 0x5d0   : > { %4064 = vmatpush.msrb.mxu0 %v3429_v23  ;;  %v3653_v23 = vld [vmem:[#allocation9 + $0x1188] sm:$0xff] }
 0x5d2   : > { %4065 = vmatpush.msrb.mxu0 %v3421_v42  ;;  %v3438_v42 = vld [vmem:[#allocation9 + $0xad0] sm:$0xff] }
 0x5d4   : > { %4066 = vmatpush.msrb.mxu0 %v3413_v54  ;;  %v3261_v54 = vld [vmem:[#allocation9 + $0x548] sm:$0xff] }
 0x5d5   : > { %v3067_v53 = vpop.permute.xlu0 %3066 }
 0x5d6   : > { %v3076_v15 = vsel %vm858_vm3, %v3067_v53, %v3069_v21  ;;  %4067 = vmatpush.msrb.mxu0 %v3405_v19  ;;  %v3517_v19 = vld [vmem:[#allocation9 + $0xd48] sm:$0xff] }
 0x5d7   : > { %v8177_v20 = vmax.f32 %v8148_v4, %v3076_v15  ;;  %v5547_v55 = vpop.permute.xlu1 %5546  ;;  %v3509_v15 = vld [vmem:[#allocation9 + $0xd08] sm:$0xff] }
 0x5d8   : > { %v5549_v32 = vunpack.i.h.bf16 %v5547_v55  ;;  %v5548_v41 = vunpack.i.l.bf16 %v5547_v55  ;;  %4068 = vmatpush.msrb.mxu0 %v3397_v51  ;;  %v3253_v51 = vld [vmem:[#allocation9 + $0x508] sm:$0xff] }
 0x5d9   : > { %3975 = vmatmul.f32.vlgmr.msra.gmra.mxu0 %v8177_v20  ;;  %v3637_v55 = vld [vmem:[#allocation9 + $0x1108] sm:$0xff] }
 0x5da   : > { %v3075_v39 = vsel %vm858_vm3, %v5549_v32, %v3067_v53  ;;  %v3073_v27 = vsel %vm858_vm3, %v5554_v16, %v5548_v41  ;;  %v3074_v30 = vsel %vm858_vm3, %v5548_v41, %v5549_v32  ;;  %4069 = vmatpush.msrb.mxu0 %v3389_v6  ;;  %v3669_v16 = vld [vmem:[#allocation9 + $0x1208] sm:$0xff]  ;;  %v3430_v53 = vld [vmem:[#allocation9 + $0xa90] sm:$0xff] }
 0x5db   : > { %v8184_v34 = vmax.f32 %v8144_v61, %v3075_v39  ;;  %v8187_v4 = vmax.f32 %v8136_v13, %v3073_v27  ;;  %v8190_v31 = vmax.f32 %v8129_v37, %v3074_v30  ;;  %v3365_v61 = vld [vmem:[#allocation9 + $0x888] sm:$0xff]  ;;  %v3422_v6 = vld [vmem:[#allocation9 + $0xa50] sm:$0xff] }
 0x5dc   : > { %4070 = vmatpush.msrb.mxu0 %v3381_v8  ;;  %v3717_v37 = vld [vmem:[#allocation9 + $0x1388] sm:$0xff]  ;;  %v3414_v39 = vld [vmem:[#allocation9 + $0xa10] sm:$0xff] }
 0x5dd   : > { %3915 = vmatmul.f32.vlgmr.msra.gmra.mxu1 %v8187_v4  ;;  %3935 = vmatmul.f32.vlgmr.msra.gmra.mxu2 %v8190_v31  ;;  %v3245_v32 = vld [vmem:[#allocation9 + $0x4c8] sm:$0xff] }
 0x5de   : > { %3955 = vmatmul.f32.vlgmr.msrb.gmra.mxu3 %v8184_v34  ;;  %4039 = vmatpush.msra.mxu2 %v3341_v5  ;;  %v3501_v41 = vld [vmem:[#allocation9 + $0xcc8] sm:$0xff] }
 0x5df   : > { %4071 = vmatpush.msrb.mxu0 %v3373_v45  ;;  %4079 = vmatpush.msra.mxu1 %v3597_v38  ;;  %v3071_v13 = vpop.permute.xlu1 %3070  ;;  %v3629_v8 = vld [vmem:[#allocation9 + $0x10c8] sm:$0xff]  ;;  %v3406_v45 = vld [vmem:[#allocation9 + $0x9d0] sm:$0xff] }
 0x5e0   : > { %4099 = vmatpush.msrb.mxu3 %v3725_v63  ;;  %4040 = vmatpush.msra.mxu2 %v3333_v58  ;;  %v3077_v25 = vsel %vm858_vm3, %v3069_v21, %v3071_v13  ;;  %v8200_v50 = vmax.f32 %v8164_v14, %v3071_v13  ;;  %v3685_v14 = vld [vmem:[#allocation9 + $0x1288] sm:$0xff] }
 0x5e1   : > { %4072 = vmatpush.msrb.mxu0 %v3365_v61  ;;  %4080 = vmatpush.msra.mxu1 %v3589_v1  ;;  %v8197_v22 = vmax.f32 %v8161_v17, %v3077_v25  ;;  %v3301_v17 = vld [vmem:[#allocation9 + $0x688] sm:$0xff]  ;;  %v3398_v61 = vld [vmem:[#allocation9 + $0x990] sm:$0xff] }
 0x5e2   : > { %4100 = vmatpush.msrb.mxu3 %v3717_v37  ;;  %4041 = vmatpush.msra.mxu2 %v3325_v47  ;;  %v3645_v21 = vld [vmem:[#allocation9 + $0x1148] sm:$0xff]  ;;  %v3390_v47 = vld [vmem:[#allocation9 + $0x950] sm:$0xff] }
 0x5e3   : > { %4073 = vmatpush.msrb.mxu0 %v3357_v3  ;;  %4081 = vmatpush.msra.mxu1 %v3581_v43  ;;  %v3237_v27 = vld [vmem:[#allocation9 + $0x488] sm:$0xff]  ;;  %v3214_v43 = vld [vmem:[#allocation9 + $0x3d0] sm:$0xff] }
 0x5e4   : > { %4101 = vmatpush.msrb.mxu3 %v3709_v57  ;;  %4042 = vmatpush.msra.mxu2 %v3317_v11  ;;  %v3493_v30 = vld [vmem:[#allocation9 + $0xc88] sm:$0xff]  ;;  %v3342_v57 = vld [vmem:[#allocation9 + $0x7d0] sm:$0xff] }
 0x5e5   : > { %4074 = vmatpush.msrb.mxu0 %v3349_v10  ;;  %4082 = vmatpush.msra.mxu1 %v3573_v12  ;;  %v3621_v5 = vld [vmem:[#allocation9 + $0x1088] sm:$0xff]  ;;  %v3382_v11 = vld [vmem:[#allocation9 + $0x910] sm:$0xff] }
 0x5e6   : > { %4102 = vmatpush.msrb.mxu3 %v3701_v60  ;;  %4075 = vmatmul.f32.vlgmr.msrb.gmra.mxu0 %v8190_v31  ;;  %v3229_v38 = vld [vmem:[#allocation9 + $0x448] sm:$0xff]  ;;  %v3206_v10 = vld [vmem:[#allocation9 + $0x390] sm:$0xff] }
 0x5e7   : > { %4153 = vmatpush.msra.mxu0 %v3869_v2  ;;  %3995 = vmatmul.f32.vlgmr.msrb.gmra.mxu1 %v8197_v22  ;;  %v3485_v63 = vld [vmem:[#allocation9 + $0xc48] sm:$0xff]  ;;  %v3334_v12 = vld [vmem:[#allocation9 + $0x790] sm:$0xff] }
 0x5e8   : > { %5254 = vmatmul.msk.f32.vlgmr.msrb.gmra.mxu2 %vm2276_vm1, %v8200_v50  ;;  %4035 = vmatmul.f32.vlgmr.msra.gmra.mxu3 %v8172_v28  ;;  %v3613_v58 = vld [vmem:[#allocation9 + $0x1048] sm:$0xff]  ;;  %v3374_v60 = vld [vmem:[#allocation9 + $0x8d0] sm:$0xff] }
 0x5e9   : > { %4043 = vmatpush.msra.mxu2 %v3309_v35  ;;  %4083 = vmatpush.msra.mxu1 %v3565_v26  ;;  %v3221_v1 = vld [vmem:[#allocation9 + $0x408] sm:$0xff]  ;;  %v3198_v35 = vld [vmem:[#allocation9 + $0x350] sm:$0xff] }
 0x5ea   : > { %4103 = vmatpush.msrb.mxu3 %v3693_v62  ;;  %4154 = vmatpush.msra.mxu0 %v3861_v18  ;;  %v3477_v13 = vld [vmem:[#allocation9 + $0xc08] sm:$0xff]  ;;  %v3326_v26 = vld [vmem:[#allocation9 + $0x750] sm:$0xff] }
 0x5eb   : > { %4044 = vmatpush.msra.mxu2 %v3301_v17  ;;  %4084 = vmatpush.msra.mxu1 %v3557_v33  ;;  %v3605_v37 = vld [vmem:[#allocation9 + $0x1008] sm:$0xff]  ;;  %v3366_v62 = vld [vmem:[#allocation9 + $0x890] sm:$0xff] }
 0x5ec   : > { %4104 = vmatpush.msrb.mxu3 %v3685_v14  ;;  %4199 = vmatpush.msrb.mxu0 %v3470_v48  ;;  %v3853_v3 = vld [vmem:[#allocation9 + $0x17c8] sm:$0xff]  ;;  %v3190_v17 = vld [vmem:[#allocation9 + $0x310] sm:$0xff] }
 0x5ed   : > { %4045 = vmatpush.msra.mxu2 %v3293_v59  ;;  %4085 = vmatpush.msra.mxu1 %v3549_v49  ;;  %v3845_v25 = vld [vmem:[#allocation9 + $0x1788] sm:$0xff]  ;;  %v3318_v33 = vld [vmem:[#allocation9 + $0x710] sm:$0xff] }
 0x5ee   : > { %4105 = vmatpush.msrb.mxu3 %v3677_v40  ;;  %4200 = vmatpush.msrb.mxu0 %v3462_v36  ;;  %v3837_v2 = vld [vmem:[#allocation9 + $0x1748] sm:$0xff]  ;;  %v3358_v14 = vld [vmem:[#allocation9 + $0x850] sm:$0xff] }
 0x5ef   : > { %4046 = vmatpush.msra.mxu2 %v3285_v24  ;;  %4086 = vmatpush.msra.mxu1 %v3541_v44  ;;  %v3829_v18 = vld [vmem:[#allocation9 + $0x1708] sm:$0xff]  ;;  %v3182_v59 = vld [vmem:[#allocation9 + $0x2d0] sm:$0xff] }
 0x5f0   : > { %4106 = vmatpush.msrb.mxu3 %v3669_v16  ;;  %4201 = vmatpush.msrb.mxu0 %v3454_v56  ;;  %v3821_v48 = vld [vmem:[#allocation9 + $0x16c8] sm:$0xff]  ;;  %v3310_v49 = vld [vmem:[#allocation9 + $0x6d0] sm:$0xff] }
 0x5f1   : > { %5255 = vmatmul.msk.f32.vlgmr.msra.gmra.mxu0 %vm2276_vm1, %v8200_v50  ;;  %4047 = vmatpush.msra.mxu2 %v3277_v7  ;;  %v3350_v40 = vld [vmem:[#allocation9 + $0x810] sm:$0xff]  ;;  %v3813_v36 = vld [vmem:[#allocation9 + $0x1688] sm:$0xff] }
 0x5f2   : > { %4087 = vmatpush.msra.mxu1 %v3533_v52  ;;  %4107 = vmatpush.msrb.mxu3 %v3661_v46  ;;  %v3174_v24 = vld [vmem:[#allocation9 + $0x290] sm:$0xff]  ;;  %v3805_v56 = vld [vmem:[#allocation9 + $0x1648] sm:$0xff] }
 0x5f3   : > { %4202 = vmatpush.msrb.mxu0 %v3446_v9  ;;  %4048 = vmatpush.msra.mxu2 %v3269_v0  ;;  %v3302_v44 = vld [vmem:[#allocation9 + $0x690] sm:$0xff]  ;;  %v3797_v9 = vld [vmem:[#allocation9 + $0x1608] sm:$0xff]  ;;  %v3343_v0 = vld [vmem:[#allocation9 + $0x7d8] sm:$0xff] }
 0x5f4   : > { %4088 = vmatpush.msra.mxu1 %v3525_v29  ;;  %4108 = vmatpush.msrb.mxu3 %v3653_v23  ;;  %v3870_v16 = vld [vmem:[#allocation9 + $0x1850] sm:$0xff] }
 0x5f5   : > { %4203 = vmatpush.msrb.mxu0 %v3438_v42  ;;  %4049 = vmatpush.msra.mxu2 %v3261_v54  ;;  %v3166_v7 = vld [vmem:[#allocation9 + $0x250] sm:$0xff]  ;;  %v3789_v42 = vld [vmem:[#allocation9 + $0x15c8] sm:$0xff]  ;;  %v3335_v54 = vld [vmem:[#allocation9 + $0x798] sm:$0xff] }
 0x5f6   : > { %4089 = vmatpush.msra.mxu1 %v3517_v19  ;;  %4109 = vmatpush.msrb.mxu3 %v3645_v21  ;;  %v3294_v52 = vld [vmem:[#allocation9 + $0x650] sm:$0xff] }
 0x5f7   : > { %4204 = vmatpush.msrb.mxu0 %v3430_v53  ;;  %4050 = vmatpush.msra.mxu2 %v3253_v51  ;;  %v3862_v46 = vld [vmem:[#allocation9 + $0x1810] sm:$0xff]  ;;  %v3781_v53 = vld [vmem:[#allocation9 + $0x1588] sm:$0xff]  ;;  %v3327_v51 = vld [vmem:[#allocation9 + $0x758] sm:$0xff] }
 0x5f8   : > { %4090 = vmatpush.msra.mxu1 %v3509_v15  ;;  %4110 = vmatpush.msrb.mxu3 %v3637_v55  ;;  %v3158_v29 = vld [vmem:[#allocation9 + $0x210] sm:$0xff] }
 0x5f9   : > { %4205 = vmatpush.msrb.mxu0 %v3422_v6  ;;  %4051 = vmatpush.msra.mxu2 %v3245_v32  ;;  %v3286_v23 = vld [vmem:[#allocation9 + $0x610] sm:$0xff]  ;;  %v3319_v6 = vld [vmem:[#allocation9 + $0x718] sm:$0xff]  ;;  %v3773_v32 = vld [vmem:[#allocation9 + $0x1548] sm:$0xff] }
 0x5fa   : > { %4091 = vmatpush.msra.mxu1 %v3501_v41  ;;  %4111 = vmatpush.msrb.mxu3 %v3629_v8  ;;  %v3150_v19 = vld [vmem:[#allocation9 + $0x1d0] sm:$0xff] }
 0x5fb   : > { %4206 = vmatpush.msrb.mxu0 %v3414_v39  ;;  %4052 = vmatpush.msra.mxu2 %v3237_v27  ;;  %v3278_v21 = vld [vmem:[#allocation9 + $0x5d0] sm:$0xff]  ;;  %v3311_v39 = vld [vmem:[#allocation9 + $0x6d8] sm:$0xff]  ;;  %v3765_v27 = vld [vmem:[#allocation9 + $0x1508] sm:$0xff] }
 0x5fc   : > { %4092 = vmatpush.msra.mxu1 %v3493_v30  ;;  %4112 = vmatpush.msrb.mxu3 %v3621_v5  ;;  %v3142_v15 = vld [vmem:[#allocation9 + $0x190] sm:$0xff] }
 0x5fd   : > { %4207 = vmatpush.msrb.mxu0 %v3406_v45  ;;  %4053 = vmatpush.msra.mxu2 %v3229_v38  ;;  %v3270_v55 = vld [vmem:[#allocation9 + $0x590] sm:$0xff]  ;;  %v3303_v45 = vld [vmem:[#allocation9 + $0x698] sm:$0xff]  ;;  %v3757_v38 = vld [vmem:[#allocation9 + $0x14c8] sm:$0xff] }
 0x5fe   : > { %4093 = vmatpush.msra.mxu1 %v3485_v63  ;;  %4113 = vmatpush.msrb.mxu3 %v3613_v58  ;;  %v3134_v41 = vld [vmem:[#allocation9 + $0x150] sm:$0xff] }
 0x5ff   : > { %4208 = vmatpush.msrb.mxu0 %v3398_v61  ;;  %4054 = vmatpush.msra.mxu2 %v3221_v1  ;;  %v3262_v8 = vld [vmem:[#allocation9 + $0x550] sm:$0xff]  ;;  %v3295_v61 = vld [vmem:[#allocation9 + $0x658] sm:$0xff]  ;;  %v3749_v1 = vld [vmem:[#allocation9 + $0x1488] sm:$0xff] }
 0x600   : > { %4094 = vmatpush.msra.mxu1 %v3477_v13  ;;  %4114 = vmatpush.msrb.mxu3 %v3605_v37  ;;  %v3126_v30 = vld [vmem:[#allocation9 + $0x110] sm:$0xff] }
 0x601   : > { %4209 = vmatpush.msrb.mxu0 %v3390_v47  ;;  %4055 = vmatmul.f32.vlgmr.msra.gmra.mxu2 %v8187_v4  ;;  %v3254_v5 = vld [vmem:[#allocation9 + $0x510] sm:$0xff]  ;;  %v3287_v47 = vld [vmem:[#allocation9 + $0x618] sm:$0xff] }
 0x602   : > { %4095 = vmatmul.f32.vlgmr.msra.gmra.mxu1 %v8184_v34  ;;  %4115 = vmatmul.f32.vlgmr.msrb.gmra.mxu3 %v8177_v20  ;;  %v3118_v63 = vld [vmem:[#allocation9 + $0xd0] sm:$0xff] }
 0x603   : > { %4119 = vmatpush.msrb.mxu2 %v3853_v3  ;;  %4159 = vmatpush.msrb.mxu1 %v3214_v43  ;;  %v3246_v58 = vld [vmem:[#allocation9 + $0x4d0] sm:$0xff]  ;;  %v3741_v3 = vld [vmem:[#allocation9 + $0x1448] sm:$0xff] }
 0x604   : > { %4179 = vmatpush.msra.mxu3 %v3342_v57  ;;  %4210 = vmatpush.msrb.mxu0 %v3382_v11  ;;  %v3110_v13 = vld [vmem:[#allocation9 + $0x90] sm:$0xff]  ;;  %v3279_v11 = vld [vmem:[#allocation9 + $0x5d8] sm:$0xff] }
 0x605   : > { %4120 = vmatpush.msrb.mxu2 %v3845_v25  ;;  %4160 = vmatpush.msrb.mxu1 %v3206_v10  ;;  %v3238_v37 = vld [vmem:[#allocation9 + $0x490] sm:$0xff]  ;;  %v3733_v25 = vld [vmem:[#allocation9 + $0x1408] sm:$0xff] }
 0x606   : > { %4180 = vmatpush.msra.mxu3 %v3334_v12  ;;  %4211 = vmatpush.msrb.mxu0 %v3374_v60  ;;  %v3102_v43 = vld [vmem:[#allocation9 + $0x50] sm:$0xff] }
 0x607   : > { %4121 = vmatpush.msrb.mxu2 %v3837_v2  ;;  %4161 = vmatpush.msrb.mxu1 %v3198_v35  ;;  %v3230_v57 = vld [vmem:[#allocation9 + $0x450] sm:$0xff] }
 0x608   : > { %4181 = vmatpush.msra.mxu3 %v3326_v26  ;;  %4212 = vmatpush.msrb.mxu0 %v3366_v62  ;;  %v3094_v10 = vld [vmem:[#allocation9 + $0x10] sm:$0xff]  ;;  %v3271_v26 = vld [vmem:[#allocation9 + $0x598] sm:$0xff] }
 0x609   : > { %4122 = vmatpush.msrb.mxu2 %v3829_v18  ;;  %4162 = vmatpush.msrb.mxu1 %v3190_v17  ;;  %v3222_v12 = vld [vmem:[#allocation9 + $0x410] sm:$0xff] }
 0x60a   : > { %4182 = vmatpush.msra.mxu3 %v3318_v33  ;;  %4213 = vmatpush.msrb.mxu0 %v3358_v14  ;;  %v3598_v60 = vld [vmem:[#allocation9 + $0xfd0] sm:$0xff]  ;;  %v3263_v33 = vld [vmem:[#allocation9 + $0x558] sm:$0xff] }
 0x60b   : > { %4123 = vmatpush.msrb.mxu2 %v3821_v48  ;;  %4163 = vmatpush.msrb.mxu1 %v3182_v59  ;;  %v3726_v2 = vld [vmem:[#allocation9 + $0x13d0] sm:$0xff] }
 0x60c   : > { %4183 = vmatpush.msra.mxu3 %v3310_v49  ;;  %4214 = vmatpush.msrb.mxu0 %v3350_v40  ;;  %v3854_v35 = vld [vmem:[#allocation9 + $0x17d0] sm:$0xff]  ;;  %v3255_v49 = vld [vmem:[#allocation9 + $0x518] sm:$0xff] }
 0x60d   : > { %4124 = vmatpush.msrb.mxu2 %v3813_v36  ;;  %4164 = vmatpush.msrb.mxu1 %v3174_v24  ;;  %v3590_v62 = vld [vmem:[#allocation9 + $0xf90] sm:$0xff] }
 0x60e   : > { %4184 = vmatpush.msra.mxu3 %v3302_v44  ;;  %4215 = vmatmul.f32.vlgmr.msrb.gmra.mxu0 %v8190_v31  ;;  %v3718_v18 = vld [vmem:[#allocation9 + $0x1390] sm:$0xff]  ;;  %v3247_v44 = vld [vmem:[#allocation9 + $0x4d8] sm:$0xff] }
 0x60f   : > { %4293 = vmatpush.msra.mxu0 %v3870_v16  ;;  %4125 = vmatpush.msrb.mxu2 %v3805_v56  ;;  %v3846_v17 = vld [vmem:[#allocation9 + $0x1790] sm:$0xff] }
 0x610   : > { %4165 = vmatpush.msrb.mxu1 %v3166_v7  ;;  %4185 = vmatpush.msra.mxu3 %v3294_v52  ;;  %v3582_v14 = vld [vmem:[#allocation9 + $0xf50] sm:$0xff]  ;;  %v3239_v52 = vld [vmem:[#allocation9 + $0x498] sm:$0xff] }
 0x611   : > { %4294 = vmatpush.msra.mxu0 %v3862_v46  ;;  %4126 = vmatpush.msrb.mxu2 %v3797_v9  ;;  %v3710_v48 = vld [vmem:[#allocation9 + $0x1350] sm:$0xff] }
 0x612   : > { %4166 = vmatpush.msrb.mxu1 %v3158_v29  ;;  %4186 = vmatpush.msra.mxu3 %v3286_v23  ;;  %v3838_v59 = vld [vmem:[#allocation9 + $0x1750] sm:$0xff]  ;;  %v3231_v29 = vld [vmem:[#allocation9 + $0x458] sm:$0xff] }
 0x613   : > { %4319 = vmatpush.msrb.mxu0 %v3343_v0  ;;  %4127 = vmatpush.msrb.mxu2 %v3789_v42  ;;  %v3574_v40 = vld [vmem:[#allocation9 + $0xf10] sm:$0xff] }
 0x614   : > { %4167 = vmatpush.msrb.mxu1 %v3150_v19  ;;  %4187 = vmatpush.msra.mxu3 %v3278_v21  ;;  %v3702_v36 = vld [vmem:[#allocation9 + $0x1310] sm:$0xff]  ;;  %v3223_v19 = vld [vmem:[#allocation9 + $0x418] sm:$0xff] }
 0x615   : > { %4320 = vmatpush.msrb.mxu0 %v3335_v54  ;;  %4128 = vmatpush.msrb.mxu2 %v3781_v53  ;;  %v3830_v24 = vld [vmem:[#allocation9 + $0x1710] sm:$0xff] }
 0x616   : > { %4168 = vmatpush.msrb.mxu1 %v3142_v15  ;;  %4188 = vmatpush.msra.mxu3 %v3270_v55  ;;  %v3566_v16 = vld [vmem:[#allocation9 + $0xed0] sm:$0xff] }
 0x617   : > { %4321 = vmatpush.msrb.mxu0 %v3327_v51  ;;  %4129 = vmatpush.msrb.mxu2 %v3773_v32  ;;  %v3694_v56 = vld [vmem:[#allocation9 + $0x12d0] sm:$0xff]  ;;  %v3855_v51 = vld [vmem:[#allocation9 + $0x17d8] sm:$0xff] }
 0x618   : > { %5256 = vmatmul.msk.f32.vlgmr.msra.gmra.mxu0 %vm2276_vm1, %v8200_v50  ;;  %4169 = vmatpush.msrb.mxu1 %v3134_v41  ;;  %v3822_v7 = vld [vmem:[#allocation9 + $0x16d0] sm:$0xff]  ;;  %v3847_v32 = vld [vmem:[#allocation9 + $0x1798] sm:$0xff] }
 0x619   : > { %4322 = vmatpush.msrb.mxu0 %v3319_v6  ;;  %4189 = vmatpush.msra.mxu3 %v3262_v8  ;;  %v3558_v46 = vld [vmem:[#allocation9 + $0xe90] sm:$0xff] }
 0x61a   : > { %4130 = vmatpush.msrb.mxu2 %v3765_v27  ;;  %4170 = vmatpush.msrb.mxu1 %v3126_v30  ;;  %v3686_v9 = vld [vmem:[#allocation9 + $0x1290] sm:$0xff]  ;;  %v3839_v27 = vld [vmem:[#allocation9 + $0x1758] sm:$0xff] }
 0x61b   : > { %4323 = vmatpush.msrb.mxu0 %v3311_v39  ;;  %4190 = vmatpush.msra.mxu3 %v3254_v5  ;;  %v3814_v0 = vld [vmem:[#allocation9 + $0x1690] sm:$0xff] }
 0x61c   : > { %4131 = vmatpush.msrb.mxu2 %v3757_v38  ;;  %4171 = vmatpush.msrb.mxu1 %v3118_v63  ;;  %v3550_v23 = vld [vmem:[#allocation9 + $0xe50] sm:$0xff]  ;;  %v3831_v38 = vld [vmem:[#allocation9 + $0x1718] sm:$0xff] }
 0x61d   : > { %4324 = vmatpush.msrb.mxu0 %v3303_v45  ;;  %4191 = vmatpush.msra.mxu3 %v3246_v58  ;;  %v3678_v42 = vld [vmem:[#allocation9 + $0x1250] sm:$0xff] }
 0x61e   : > { %4132 = vmatpush.msrb.mxu2 %v3749_v1  ;;  %4172 = vmatpush.msrb.mxu1 %v3110_v13  ;;  %v3806_v54 = vld [vmem:[#allocation9 + $0x1650] sm:$0xff]  ;;  %v3823_v1 = vld [vmem:[#allocation9 + $0x16d8] sm:$0xff] }
 0x61f   : > { %4325 = vmatpush.msrb.mxu0 %v3295_v61  ;;  %4192 = vmatpush.msra.mxu3 %v3238_v37  ;;  %v3542_v21 = vld [vmem:[#allocation9 + $0xe10] sm:$0xff] }
 0x620   : > { %4133 = vmatpush.msrb.mxu2 %v3741_v3  ;;  %4173 = vmatpush.msrb.mxu1 %v3102_v43  ;;  %v3670_v53 = vld [vmem:[#allocation9 + $0x1210] sm:$0xff]  ;;  %v3815_v3 = vld [vmem:[#allocation9 + $0x1698] sm:$0xff] }
 0x621   : > { %4326 = vmatpush.msrb.mxu0 %v3287_v47  ;;  %4193 = vmatpush.msra.mxu3 %v3230_v57  ;;  %v3798_v15 = vld [vmem:[#allocation9 + $0x1610] sm:$0xff] }
 0x622   : > { %4134 = vmatpush.msrb.mxu2 %v3733_v25  ;;  %4174 = vmatpush.msrb.mxu1 %v3094_v10  ;;  %v3534_v55 = vld [vmem:[#allocation9 + $0xdd0] sm:$0xff]  ;;  %v3807_v25 = vld [vmem:[#allocation9 + $0x1658] sm:$0xff] }
 0x623   : > { %4327 = vmatpush.msrb.mxu0 %v3279_v11  ;;  %4194 = vmatpush.msra.mxu3 %v3222_v12  ;;  %v3662_v6 = vld [vmem:[#allocation9 + $0x11d0] sm:$0xff] }
 0x624   : > { %4135 = vmatmul.f32.vlgmr.msrb.gmra.mxu2 %v8197_v22  ;;  %4175 = vmatmul.f32.vlgmr.msrb.gmra.mxu1 %v8172_v28  ;;  %v3790_v41 = vld [vmem:[#allocation9 + $0x15d0] sm:$0xff] }
 0x625   : > { %4195 = vmatmul.f32.vlgmr.msra.gmra.mxu3 %v8187_v4  ;;  %4219 = vmatpush.msra.mxu2 %v3598_v60  ;;  %v3526_v8 = vld [vmem:[#allocation9 + $0xd90] sm:$0xff] }
 0x626   : > { %4239 = vmatpush.msra.mxu1 %v3726_v2  ;;  %4259 = vmatpush.msrb.mxu3 %v3854_v35  ;;  %v3654_v39 = vld [vmem:[#allocation9 + $0x1190] sm:$0xff]  ;;  %v3799_v2 = vld [vmem:[#allocation9 + $0x1618] sm:$0xff] }
 0x627   : > { %4328 = vmatpush.msrb.mxu0 %v3271_v26  ;;  %4220 = vmatpush.msra.mxu2 %v3590_v62  ;;  %v3782_v30 = vld [vmem:[#allocation9 + $0x1590] sm:$0xff] }
 0x628   : > { %4240 = vmatpush.msra.mxu1 %v3718_v18  ;;  %4260 = vmatpush.msrb.mxu3 %v3846_v17  ;;  %v3518_v5 = vld [vmem:[#allocation9 + $0xd50] sm:$0xff]  ;;  %v3791_v18 = vld [vmem:[#allocation9 + $0x15d8] sm:$0xff] }
 0x629   : > { %4329 = vmatpush.msrb.mxu0 %v3263_v33  ;;  %4221 = vmatpush.msra.mxu2 %v3582_v14  ;;  %v3646_v45 = vld [vmem:[#allocation9 + $0x1150] sm:$0xff]  ;;  %v3215_v33 = vld [vmem:[#allocation9 + $0x3d8] sm:$0xff] }
 0x62a   : > { %4241 = vmatpush.msra.mxu1 %v3710_v48  ;;  %4261 = vmatpush.msrb.mxu3 %v3838_v59  ;;  %v3774_v63 = vld [vmem:[#allocation9 + $0x1550] sm:$0xff]  ;;  %v3471_v14 = vld [vmem:[#allocation9 + $0xbd8] sm:$0xff] }
 0x62b   : > { %4330 = vmatpush.msrb.mxu0 %v3255_v49  ;;  %4222 = vmatpush.msra.mxu2 %v3574_v40  ;;  %v3510_v58 = vld [vmem:[#allocation9 + $0xd10] sm:$0xff]  ;;  %v3599_v48 = vld [vmem:[#allocation9 + $0xfd8] sm:$0xff] }
 0x62c   : > { %4242 = vmatpush.msra.mxu1 %v3702_v36  ;;  %4262 = vmatpush.msrb.mxu3 %v3830_v24  ;;  %v3638_v61 = vld [vmem:[#allocation9 + $0x1110] sm:$0xff]  ;;  %v3783_v59 = vld [vmem:[#allocation9 + $0x1598] sm:$0xff] }
 0x62d   : > { %4331 = vmatpush.msrb.mxu0 %v3247_v44  ;;  %4223 = vmatpush.msra.mxu2 %v3566_v16  ;;  %v3766_v13 = vld [vmem:[#allocation9 + $0x1510] sm:$0xff]  ;;  %v3207_v49 = vld [vmem:[#allocation9 + $0x398] sm:$0xff] }
 0x62e   : > { %4243 = vmatpush.msra.mxu1 %v3694_v56  ;;  %4263 = vmatpush.msrb.mxu3 %v3822_v7  ;;  %v3502_v37 = vld [vmem:[#allocation9 + $0xcd0] sm:$0xff]  ;;  %v3463_v40 = vld [vmem:[#allocation9 + $0xb98] sm:$0xff] }
 0x62f   : > { %4332 = vmatpush.msrb.mxu0 %v3239_v52  ;;  %4224 = vmatpush.msra.mxu2 %v3558_v46  ;;  %v3630_v47 = vld [vmem:[#allocation9 + $0x10d0] sm:$0xff]  ;;  %v3591_v36 = vld [vmem:[#allocation9 + $0xf98] sm:$0xff] }
 0x630   : > { %4244 = vmatpush.msra.mxu1 %v3686_v9  ;;  %4264 = vmatpush.msrb.mxu3 %v3814_v0  ;;  %v3758_v43 = vld [vmem:[#allocation9 + $0x14d0] sm:$0xff]  ;;  %v3775_v24 = vld [vmem:[#allocation9 + $0x1558] sm:$0xff] }
 0x631   : > { %4333 = vmatpush.msrb.mxu0 %v3231_v29  ;;  %4225 = vmatpush.msra.mxu2 %v3550_v23  ;;  %v3494_v57 = vld [vmem:[#allocation9 + $0xc90] sm:$0xff]  ;;  %v3199_v44 = vld [vmem:[#allocation9 + $0x358] sm:$0xff] }
 0x632   : > { %4245 = vmatpush.msra.mxu1 %v3678_v42  ;;  %4265 = vmatpush.msrb.mxu3 %v3806_v54  ;;  %v3622_v11 = vld [vmem:[#allocation9 + $0x1090] sm:$0xff]  ;;  %v3455_v16 = vld [vmem:[#allocation9 + $0xb58] sm:$0xff] }
 0x633   : > { %4334 = vmatpush.msrb.mxu0 %v3223_v19  ;;  %4226 = vmatpush.msra.mxu2 %v3542_v21  ;;  %v3750_v10 = vld [vmem:[#allocation9 + $0x1490] sm:$0xff]  ;;  %v3583_v56 = vld [vmem:[#allocation9 + $0xf58] sm:$0xff] }
 0x634   : > { %4335 = vmatmul.f32.vlgmr.msrb.gmra.mxu0 %v8187_v4  ;;  %4246 = vmatpush.msra.mxu1 %v3670_v53  ;;  %v3486_v12 = vld [vmem:[#allocation9 + $0xc50] sm:$0xff]  ;;  %v3767_v7 = vld [vmem:[#allocation9 + $0x1518] sm:$0xff] }
 0x635   : > { %4399 = vmatpush.msra.mxu0 %v3855_v51  ;;  %4266 = vmatpush.msrb.mxu3 %v3798_v15  ;;  %v3614_v60 = vld [vmem:[#allocation9 + $0x1050] sm:$0xff]  ;;  %v3191_v52 = vld [vmem:[#allocation9 + $0x318] sm:$0xff] }
 0x636   : > { %4227 = vmatpush.msra.mxu2 %v3534_v55  ;;  %4247 = vmatpush.msra.mxu1 %v3662_v6  ;;  %v3742_v35 = vld [vmem:[#allocation9 + $0x1450] sm:$0xff]  ;;  %v3447_v46 = vld [vmem:[#allocation9 + $0xb18] sm:$0xff] }
 0x637   : > { %4400 = vmatpush.msra.mxu0 %v3847_v32  ;;  %4267 = vmatpush.msrb.mxu3 %v3790_v41  ;;  %v3478_v26 = vld [vmem:[#allocation9 + $0xc10] sm:$0xff]  ;;  %v3575_v9 = vld [vmem:[#allocation9 + $0xf18] sm:$0xff] }
 0x638   : > { %4228 = vmatpush.msra.mxu2 %v3526_v8  ;;  %4248 = vmatpush.msra.mxu1 %v3654_v39  ;;  %v3606_v62 = vld [vmem:[#allocation9 + $0x1010] sm:$0xff]  ;;  %v3759_v0 = vld [vmem:[#allocation9 + $0x14d8] sm:$0xff]  ;;  %v3600_v39 = vld [vmem:[#allocation9 + $0xfe0] sm:$0xff] }
 0x639   : > { %4401 = vmatpush.msra.mxu0 %v3839_v27  ;;  %4268 = vmatpush.msrb.mxu3 %v3782_v30  ;;  %v3734_v17 = vld [vmem:[#allocation9 + $0x1410] sm:$0xff]  ;;  %v3183_v29 = vld [vmem:[#allocation9 + $0x2d8] sm:$0xff] }
 0x63a   : > { %4229 = vmatpush.msra.mxu2 %v3518_v5  ;;  %4249 = vmatpush.msra.mxu1 %v3646_v45  ;;  %v3439_v23 = vld [vmem:[#allocation9 + $0xad8] sm:$0xff]  ;;  %v3592_v45 = vld [vmem:[#allocation9 + $0xfa0] sm:$0xff] }
 0x63b   : > { %4402 = vmatpush.msra.mxu0 %v3831_v38  ;;  %4269 = vmatpush.msrb.mxu3 %v3774_v63  ;;  %v3567_v42 = vld [vmem:[#allocation9 + $0xed8] sm:$0xff] }
 0x63c   : > { %4230 = vmatpush.msra.mxu2 %v3510_v58  ;;  %4250 = vmatpush.msra.mxu1 %v3638_v61  ;;  %v3751_v54 = vld [vmem:[#allocation9 + $0x1498] sm:$0xff]  ;;  %v3584_v61 = vld [vmem:[#allocation9 + $0xf60] sm:$0xff] }
 0x63d   : > { %4403 = vmatpush.msra.mxu0 %v3823_v1  ;;  %4270 = vmatpush.msrb.mxu3 %v3766_v13  ;;  %v3175_v19 = vld [vmem:[#allocation9 + $0x298] sm:$0xff] }
 0x63e   : > { %4231 = vmatpush.msra.mxu2 %v3502_v37  ;;  %4251 = vmatpush.msra.mxu1 %v3630_v47  ;;  %v3431_v21 = vld [vmem:[#allocation9 + $0xa98] sm:$0xff] }
 0x63f   : > { %4404 = vmatpush.msra.mxu0 %v3815_v3  ;;  %4271 = vmatpush.msrb.mxu3 %v3758_v43  ;;  %v3559_v53 = vld [vmem:[#allocation9 + $0xe98] sm:$0xff]  ;;  %v3576_v3 = vld [vmem:[#allocation9 + $0xf20] sm:$0xff] }
 0x640   : > { %4232 = vmatpush.msra.mxu2 %v3494_v57  ;;  %4252 = vmatpush.msra.mxu1 %v3622_v11  ;;  %v3743_v51 = vld [vmem:[#allocation9 + $0x1458] sm:$0xff] }
 0x641   : > { %4405 = vmatpush.msra.mxu0 %v3807_v25  ;;  %4272 = vmatpush.msrb.mxu3 %v3750_v10  ;;  %v3167_v15 = vld [vmem:[#allocation9 + $0x258] sm:$0xff] }
 0x642   : > { %4233 = vmatpush.msra.mxu2 %v3486_v12  ;;  %4253 = vmatpush.msra.mxu1 %v3614_v60  ;;  %v3423_v55 = vld [vmem:[#allocation9 + $0xa58] sm:$0xff]  ;;  %v3896_v47 = vpop.f32.mrf.mxu0  ;;  %v3568_v12 = vld [vmem:[#allocation9 + $0xee0] sm:$0xff] }
 0x643   : > { %4406 = vmatpush.msra.mxu0 %v3799_v2  ;;  %4273 = vmatpush.msrb.mxu3 %v3742_v35  ;;  %v3551_v6 = vld [vmem:[#allocation9 + $0xe58] sm:$0xff] }
 0x644   : > { %4234 = vmatpush.msra.mxu2 %v3478_v26  ;;  %4254 = vmatpush.msra.mxu1 %v3606_v62  ;;  %v3735_v32 = vld [vmem:[#allocation9 + $0x1418] sm:$0xff]  ;;  %v3560_v26 = vld [vmem:[#allocation9 + $0xea0] sm:$0xff] }
 0x645   : > { %4407 = vmatpush.msra.mxu0 %v3791_v18  ;;  %4274 = vmatpush.msrb.mxu3 %v3734_v17  ;;  %v3159_v41 = vld [vmem:[#allocation9 + $0x218] sm:$0xff] }
 0x646   : > { %4235 = vmatmul.f32.vlgmr.msra.gmra.mxu2 %v8184_v34  ;;  %4255 = vmatmul.f32.vlgmr.msra.gmra.mxu1 %v8177_v20  ;;  %v3415_v8 = vld [vmem:[#allocation9 + $0xa18] sm:$0xff] }
 0x647   : > { %4275 = vmatmul.f32.vlgmr.msrb.gmra.mxu3 %v8197_v22  ;;  %4299 = vmatpush.msrb.mxu2 %v3215_v33  ;;  %v3543_v27 = vld [vmem:[#allocation9 + $0xe18] sm:$0xff]  ;;  %v3552_v33 = vld [vmem:[#allocation9 + $0xe60] sm:$0xff] }
 0x648   : > { %4339 = vmatpush.msrb.mxu1 %v3471_v14  ;;  %4359 = vmatpush.msra.mxu3 %v3599_v48  ;;  %v3151_v30 = vld [vmem:[#allocation9 + $0x1d8] sm:$0xff] }
 0x649   : > { %4408 = vmatpush.msra.mxu0 %v3783_v59  ;;  %4300 = vmatpush.msrb.mxu2 %v3207_v49  ;;  %v3407_v5 = vld [vmem:[#allocation9 + $0x9d8] sm:$0xff] }
 0x64a   : > { %4340 = vmatpush.msrb.mxu1 %v3463_v40  ;;  %4360 = vmatpush.msra.mxu3 %v3591_v36  ;;  %v3535_v38 = vld [vmem:[#allocation9 + $0xdd8] sm:$0xff]  ;;  %v3544_v36 = vld [vmem:[#allocation9 + $0xe20] sm:$0xff] }
 0x64b   : > { %4409 = vmatpush.msra.mxu0 %v3775_v24  ;;  %4301 = vmatpush.msrb.mxu2 %v3199_v44  ;;  %v3143_v63 = vld [vmem:[#allocation9 + $0x198] sm:$0xff] }
 0x64c   : > { %4341 = vmatpush.msrb.mxu1 %v3455_v16  ;;  %4361 = vmatpush.msra.mxu3 %v3583_v56  ;;  %v3399_v58 = vld [vmem:[#allocation9 + $0x998] sm:$0xff] }
 0x64d   : > { %4410 = vmatpush.msra.mxu0 %v3767_v7  ;;  %4302 = vmatpush.msrb.mxu2 %v3191_v52  ;;  %v3527_v1 = vld [vmem:[#allocation9 + $0xd98] sm:$0xff] }
 0x64e   : > { %4342 = vmatpush.msrb.mxu1 %v3447_v46  ;;  %4362 = vmatpush.msra.mxu3 %v3575_v9  ;;  %v3135_v13 = vld [vmem:[#allocation9 + $0x158] sm:$0xff]  ;;  %v3536_v46 = vld [vmem:[#allocation9 + $0xde0] sm:$0xff] }
 0x64f   : > { %4411 = vmatpush.msra.mxu0 %v3759_v0  ;;  %4303 = vmatpush.msrb.mxu2 %v3183_v29  ;;  %v3391_v37 = vld [vmem:[#allocation9 + $0x958] sm:$0xff] }
 0x650   : > { %4343 = vmatpush.msrb.mxu1 %v3439_v23  ;;  %4363 = vmatpush.msra.mxu3 %v3567_v42  ;;  %v3519_v43 = vld [vmem:[#allocation9 + $0xd58] sm:$0xff] }
 0x651   : > { %4412 = vmatpush.msra.mxu0 %v3751_v54  ;;  %4304 = vmatpush.msrb.mxu2 %v3175_v19  ;;  %v3127_v11 = vld [vmem:[#allocation9 + $0x118] sm:$0xff]  ;;  %v3216_v54 = vld [vmem:[#allocation9 + $0x3e0] sm:$0xff] }
 0x652   : > { %4344 = vmatpush.msrb.mxu1 %v3431_v21  ;;  %4364 = vmatpush.msra.mxu3 %v3559_v53  ;;  %v3383_v25 = vld [vmem:[#allocation9 + $0x918] sm:$0xff]  ;;  %v3528_v21 = vld [vmem:[#allocation9 + $0xda0] sm:$0xff] }
 0x653   : > { %4413 = vmatpush.msra.mxu0 %v3743_v51  ;;  %4305 = vmatpush.msrb.mxu2 %v3167_v15  ;;  %v3511_v60 = vld [vmem:[#allocation9 + $0xd18] sm:$0xff]  ;;  %v3208_v15 = vld [vmem:[#allocation9 + $0x3a0] sm:$0xff] }
 0x654   : > { %4345 = vmatpush.msrb.mxu1 %v3423_v55  ;;  %4365 = vmatpush.msra.mxu3 %v3551_v6  ;;  %v3119_v2 = vld [vmem:[#allocation9 + $0xd8] sm:$0xff]  ;;  %v3520_v55 = vld [vmem:[#allocation9 + $0xd60] sm:$0xff] }
 0x655   : > { %4414 = vmatpush.msra.mxu0 %v3735_v32  ;;  %4306 = vmatpush.msrb.mxu2 %v3159_v41  ;;  %v3375_v35 = vld [vmem:[#allocation9 + $0x8d8] sm:$0xff]  ;;  %v3344_v6 = vld [vmem:[#allocation9 + $0x7e0] sm:$0xff] }
 0x656   : > { %4415 = vmatmul.f32.vlgmr.msra.gmra.mxu0 %v8197_v22  ;;  %4346 = vmatpush.msrb.mxu1 %v3415_v8  ;;  %v3503_v62 = vld [vmem:[#allocation9 + $0xcd8] sm:$0xff]  ;;  %v3976_v52 = vpop.f32.mrf.mxu0  ;;  %v3200_v41 = vld [vmem:[#allocation9 + $0x360] sm:$0xff] }
 0x657   : > { %4499 = vmatpush.msrb.mxu0 %v3600_v39  ;;  %4366 = vmatpush.msra.mxu3 %v3543_v27  ;;  %v3111_v18 = vld [vmem:[#allocation9 + $0x98] sm:$0xff]  ;;  %v3512_v39 = vld [vmem:[#allocation9 + $0xd20] sm:$0xff] }
 0x658   : > { %4307 = vmatpush.msrb.mxu2 %v3151_v30  ;;  %4347 = vmatpush.msrb.mxu1 %v3407_v5  ;;  %v3367_v17 = vld [vmem:[#allocation9 + $0x898] sm:$0xff]  ;;  %v3336_v27 = vld [vmem:[#allocation9 + $0x7a0] sm:$0xff] }
 0x659   : > { %4500 = vmatpush.msrb.mxu0 %v3592_v45  ;;  %4367 = vmatpush.msra.mxu3 %v3535_v38  ;;  %v3495_v14 = vld [vmem:[#allocation9 + $0xc98] sm:$0xff]  ;;  %v3192_v45 = vld [vmem:[#allocation9 + $0x320] sm:$0xff] }
 0x65a   : > { %4308 = vmatpush.msrb.mxu2 %v3143_v63  ;;  %4348 = vmatpush.msrb.mxu1 %v3399_v58  ;;  %v3916_v57 = vpop.f32.mrf.mxu1  ;;  %v3103_v59 = vld [vmem:[#allocation9 + $0x58] sm:$0xff]  ;;  %v3504_v38 = vld [vmem:[#allocation9 + $0xce0] sm:$0xff] }
 0x65b   : > { %4501 = vmatpush.msrb.mxu0 %v3584_v61  ;;  %4368 = vmatpush.msra.mxu3 %v3527_v1  ;;  %v3917_v10 = vadd.f32 %v3916_v57, %v3896_v47  ;;  %v3359_v49 = vld [vmem:[#allocation9 + $0x858] sm:$0xff]  ;;  %v3328_v63 = vld [vmem:[#allocation9 + $0x760] sm:$0xff] }
 0x65c   : > { %4309 = vmatpush.msrb.mxu2 %v3135_v13  ;;  %4349 = vmatpush.msrb.mxu1 %v3391_v37  ;;  %v3487_v24 = vld [vmem:[#allocation9 + $0xc58] sm:$0xff]  ;;  %v3184_v61 = vld [vmem:[#allocation9 + $0x2e0] sm:$0xff] }
 0x65d   : > { %4502 = vmatpush.msrb.mxu0 %v3576_v3  ;;  %4369 = vmatpush.msra.mxu3 %v3519_v43  ;;  %v3095_v16 = vld [vmem:[#allocation9 + $0x18] sm:$0xff]  ;;  %v3496_v1 = vld [vmem:[#allocation9 + $0xca0] sm:$0xff] }
 0x65e   : > { %4310 = vmatpush.msrb.mxu2 %v3127_v11  ;;  %4350 = vmatpush.msrb.mxu1 %v3383_v25  ;;  %v3351_v56 = vld [vmem:[#allocation9 + $0x818] sm:$0xff]  ;;  %v3320_v13 = vld [vmem:[#allocation9 + $0x720] sm:$0xff] }
 0x65f   : > { %4503 = vmatpush.msrb.mxu0 %v3568_v12  ;;  %4370 = vmatpush.msra.mxu3 %v3511_v60  ;;  %v3479_v9 = vld [vmem:[#allocation9 + $0xc18] sm:$0xff]  ;;  %v3176_v47 = vld [vmem:[#allocation9 + $0x2a0] sm:$0xff]  ;;  %v3217_v12 = vld [vmem:[#allocation9 + $0x3e8] sm:$0xff] }
 0x660   : > { %4311 = vmatpush.msrb.mxu2 %v3119_v2  ;;  %4351 = vmatpush.msrb.mxu1 %v3375_v35  ;;  %v3936_v48 = vpop.f32.mrf.mxu2  ;;  %v3727_v29 = vld [vmem:[#allocation9 + $0x13d8] sm:$0xff]  ;;  %v3488_v3 = vld [vmem:[#allocation9 + $0xc60] sm:$0xff] }
 0x661   : > { %4504 = vmatpush.msrb.mxu0 %v3560_v26  ;;  %4371 = vmatpush.msra.mxu3 %v3503_v62  ;;  %v3937_v40 = vadd.f32 %v3936_v48, %v3917_v10  ;;  %v3956_v44 = vpop.f32.mrf.mxu3  ;;  %v3871_v42 = vld [vmem:[#allocation9 + $0x1858] sm:$0xff]  ;;  %v3312_v43 = vld [vmem:[#allocation9 + $0x6e0] sm:$0xff]  ;;  %v3209_v26 = vld [vmem:[#allocation9 + $0x3a8] sm:$0xff] }
 0x662   : > { %4312 = vmatpush.msrb.mxu2 %v3111_v18  ;;  %4352 = vmatpush.msrb.mxu1 %v3367_v17  ;;  %v3719_v53 = vld [vmem:[#allocation9 + $0x1398] sm:$0xff]  ;;  %v3168_v11 = vld [vmem:[#allocation9 + $0x260] sm:$0xff] }
 0x663   : > { %4505 = vmatpush.msrb.mxu0 %v3552_v33  ;;  %4372 = vmatpush.msra.mxu3 %v3495_v14  ;;  %v3957_v7 = vadd.f32 %v3956_v44, %v3937_v40  ;;  %v3863_v51 = vld [vmem:[#allocation9 + $0x1818] sm:$0xff]  ;;  %v3480_v25 = vld [vmem:[#allocation9 + $0xc20] sm:$0xff]  ;;  %v3201_v33 = vld [vmem:[#allocation9 + $0x368] sm:$0xff] }
 0x664   : > { %4313 = vmatpush.msrb.mxu2 %v3103_v59  ;;  %4353 = vmatpush.msrb.mxu1 %v3359_v49  ;;  %v3996_v23 = vpop.f32.mrf.mxu1  ;;  %v3711_v32 = vld [vmem:[#allocation9 + $0x1358] sm:$0xff]  ;;  %v3304_v10 = vld [vmem:[#allocation9 + $0x6a0] sm:$0xff]  ;;  %v3193_v49 = vld [vmem:[#allocation9 + $0x328] sm:$0xff] }
 0x665   : > { %4506 = vmatpush.msrb.mxu0 %v3544_v36  ;;  %4373 = vmatpush.msra.mxu3 %v3487_v24  ;;  %v3977_v0 = vadd.f32 %v3976_v52, %v3957_v7  ;;  %v3703_v5 = vld [vmem:[#allocation9 + $0x1318] sm:$0xff]  ;;  %v3160_v2 = vld [vmem:[#allocation9 + $0x220] sm:$0xff]  ;;  %v3185_v44 = vld [vmem:[#allocation9 + $0x2e8] sm:$0xff] }
 0x666   : > { %4314 = vmatpush.msrb.mxu2 %v3095_v16  ;;  %4354 = vmatpush.msrb.mxu1 %v3351_v56  ;;  %v3695_v58 = vld [vmem:[#allocation9 + $0x12d8] sm:$0xff]  ;;  %v3296_v35 = vld [vmem:[#allocation9 + $0x660] sm:$0xff]  ;;  %v3177_v52 = vld [vmem:[#allocation9 + $0x2a8] sm:$0xff] }
 0x667   : > { %4507 = vmatpush.msrb.mxu0 %v3536_v46  ;;  %4374 = vmatpush.msra.mxu3 %v3479_v9  ;;  %v3997_v19 = vadd.f32 %v3996_v23, %v3977_v0  ;;  %v3687_v37 = vld [vmem:[#allocation9 + $0x1298] sm:$0xff]  ;;  %v3152_v18 = vld [vmem:[#allocation9 + $0x1e0] sm:$0xff] }
 0x668   : > { %4315 = vmatmul.f32.vlgmr.msrb.gmra.mxu2 %v8172_v28  ;;  %4355 = vmatmul.f32.vlgmr.msrb.gmra.mxu1 %v8190_v31  ;;  %v3679_v57 = vld [vmem:[#allocation9 + $0x1258] sm:$0xff]  ;;  %v3288_v17 = vld [vmem:[#allocation9 + $0x620] sm:$0xff] }
 0x669   : > { %4375 = vmatmul.f32.vlgmr.msra.gmra.mxu3 %v8184_v34  ;;  %4379 = vmatpush.msra.mxu2 %v3727_v29  ;;  %v3671_v60 = vld [vmem:[#allocation9 + $0x1218] sm:$0xff]  ;;  %v3144_v48 = vld [vmem:[#allocation9 + $0x1a0] sm:$0xff]  ;;  %v3169_v29 = vld [vmem:[#allocation9 + $0x268] sm:$0xff] }
 0x66a   : > { %4433 = vmatpush.msra.mxu1 %v3871_v42  ;;  %4439 = vmatpush.msrb.mxu3 %v3216_v54  ;;  %v3663_v62 = vld [vmem:[#allocation9 + $0x11d8] sm:$0xff]  ;;  %v3280_v59 = vld [vmem:[#allocation9 + $0x5e0] sm:$0xff] }
 0x66b   : > { %4508 = vmatpush.msrb.mxu0 %v3528_v21  ;;  %4380 = vmatpush.msra.mxu2 %v3719_v53  ;;  %v4016_v8 = vpop.f32.mrf.mxu2  ;;  %v3655_v14 = vld [vmem:[#allocation9 + $0x1198] sm:$0xff]  ;;  %v3136_v36 = vld [vmem:[#allocation9 + $0x160] sm:$0xff] }
 0x66c   : > { %4434 = vmatpush.msra.mxu1 %v3863_v51  ;;  %4440 = vmatpush.msrb.mxu3 %v3208_v15  ;;  %v8226_v30 = vadd.f32 %v4016_v8, %v3997_v19  ;;  %v3647_v40 = vld [vmem:[#allocation9 + $0x1158] sm:$0xff]  ;;  %v3272_v24 = vld [vmem:[#allocation9 + $0x5a0] sm:$0xff]  ;;  %v3161_v19 = vld [vmem:[#allocation9 + $0x228] sm:$0xff] }
 0x66d   : > { %4509 = vmatpush.msrb.mxu0 %v3520_v55  ;;  %4381 = vmatpush.msra.mxu2 %v3711_v32  ;;  %v3639_v16 = vld [vmem:[#allocation9 + $0x1118] sm:$0xff]  ;;  %v3128_v56 = vld [vmem:[#allocation9 + $0x120] sm:$0xff]  ;;  %v3153_v15 = vld [vmem:[#allocation9 + $0x1e8] sm:$0xff] }
 0x66e   : > { %4459 = vmatpush.msrb.mxu1 %v3344_v6  ;;  %4441 = vmatpush.msrb.mxu3 %v3200_v41  ;;  %v3264_v7 = vld [vmem:[#allocation9 + $0x560] sm:$0xff]  ;;  %v3631_v46 = vld [vmem:[#allocation9 + $0x10d8] sm:$0xff] }
 0x66f   : > { %4510 = vmatpush.msrb.mxu0 %v3512_v39  ;;  %4382 = vmatpush.msra.mxu2 %v3703_v5  ;;  %v3120_v9 = vld [vmem:[#allocation9 + $0xe0] sm:$0xff]  ;;  %v3623_v23 = vld [vmem:[#allocation9 + $0x1098] sm:$0xff]  ;;  %v3145_v39 = vld [vmem:[#allocation9 + $0x1a8] sm:$0xff] }
 0x670   : > { %4460 = vmatpush.msrb.mxu1 %v3336_v27  ;;  %4442 = vmatpush.msrb.mxu3 %v3192_v45  ;;  %v3256_v0 = vld [vmem:[#allocation9 + $0x520] sm:$0xff]  ;;  %v3615_v21 = vld [vmem:[#allocation9 + $0x1058] sm:$0xff] }
 0x671   : > { %4511 = vmatpush.msrb.mxu0 %v3504_v38  ;;  %4383 = vmatpush.msra.mxu2 %v3695_v58  ;;  %v3112_v42 = vld [vmem:[#allocation9 + $0xa0] sm:$0xff]  ;;  %v3607_v55 = vld [vmem:[#allocation9 + $0x1018] sm:$0xff]  ;;  %v3137_v38 = vld [vmem:[#allocation9 + $0x168] sm:$0xff] }
 0x672   : > { %4461 = vmatpush.msrb.mxu1 %v3328_v63  ;;  %4443 = vmatpush.msrb.mxu3 %v3184_v61  ;;  %v3248_v54 = vld [vmem:[#allocation9 + $0x4e0] sm:$0xff] }
 0x673   : > { %5257 = vmatmul.msk.f32.vlgmr.msra.gmra.mxu1 %vm2276_vm1, %v8200_v50  ;;  %4512 = vmatpush.msrb.mxu0 %v3496_v1  ;;  %v3104_v53 = vld [vmem:[#allocation9 + $0x60] sm:$0xff]  ;;  %v3129_v1 = vld [vmem:[#allocation9 + $0x128] sm:$0xff] }
 0x674   : > { %4462 = vmatpush.msrb.mxu1 %v3320_v13  ;;  %4384 = vmatpush.msra.mxu2 %v3687_v37  ;;  %v3240_v51 = vld [vmem:[#allocation9 + $0x4a0] sm:$0xff] }
 0x675   : > { %4444 = vmatpush.msrb.mxu3 %v3176_v47  ;;  %4513 = vmatpush.msrb.mxu0 %v3488_v3  ;;  %v3096_v6 = vld [vmem:[#allocation9 + $0x20] sm:$0xff]  ;;  %v3121_v3 = vld [vmem:[#allocation9 + $0xe8] sm:$0xff] }
 0x676   : > { %4463 = vmatpush.msrb.mxu1 %v3312_v43  ;;  %4385 = vmatpush.msra.mxu2 %v3679_v57  ;;  %v3232_v32 = vld [vmem:[#allocation9 + $0x460] sm:$0xff] }
 0x677   : > { %4445 = vmatpush.msrb.mxu3 %v3168_v11  ;;  %4514 = vmatpush.msrb.mxu0 %v3480_v25  ;;  %v3472_v41 = vld [vmem:[#allocation9 + $0xbe0] sm:$0xff]  ;;  %v3113_v25 = vld [vmem:[#allocation9 + $0xa8] sm:$0xff] }
 0x678   : > { %4464 = vmatpush.msrb.mxu1 %v3304_v10  ;;  %4515 = vmatmul.f32.vlgmr.msrb.gmra.mxu0 %v8184_v34  ;;  %v3728_v8 = vld [vmem:[#allocation9 + $0x13e0] sm:$0xff] }
 0x679   : > { %4579 = vmatpush.msra.mxu0 %v3217_v12  ;;  %4386 = vmatpush.msra.mxu2 %v3671_v60  ;;  %v3224_v27 = vld [vmem:[#allocation9 + $0x420] sm:$0xff] }
 0x67a   : > { %4446 = vmatpush.msrb.mxu3 %v3160_v2  ;;  %4465 = vmatpush.msrb.mxu1 %v3296_v35  ;;  %v3464_v5 = vld [vmem:[#allocation9 + $0xba0] sm:$0xff]  ;;  %v3105_v2 = vld [vmem:[#allocation9 + $0x68] sm:$0xff] }
 0x67b   : > { %4580 = vmatpush.msra.mxu0 %v3209_v26  ;;  %4387 = vmatpush.msra.mxu2 %v3663_v62  ;;  %v3720_v45 = vld [vmem:[#allocation9 + $0x13a0] sm:$0xff] }
 0x67c   : > { %4447 = vmatpush.msrb.mxu3 %v3152_v18  ;;  %4466 = vmatpush.msrb.mxu1 %v3288_v17  ;;  %v3856_v63 = vld [vmem:[#allocation9 + $0x17e0] sm:$0xff]  ;;  %v3097_v18 = vld [vmem:[#allocation9 + $0x28] sm:$0xff] }
 0x67d   : > { %4581 = vmatpush.msra.mxu0 %v3201_v33  ;;  %4388 = vmatpush.msra.mxu2 %v3655_v14  ;;  %v3456_v58 = vld [vmem:[#allocation9 + $0xb60] sm:$0xff]  ;;  %v3729_v14 = vld [vmem:[#allocation9 + $0x13e8] sm:$0xff] }
 0x67e   : > { %4448 = vmatpush.msrb.mxu3 %v3144_v48  ;;  %4467 = vmatpush.msrb.mxu1 %v3280_v59  ;;  %v3712_v61 = vld [vmem:[#allocation9 + $0x1360] sm:$0xff]  ;;  %v4036_v59 = vpop.f32.mrf.mxu3 }
 0x67f   : > { %4582 = vmatpush.msra.mxu0 %v3193_v49  ;;  %4389 = vmatpush.msra.mxu2 %v3647_v40  ;;  %v3848_v13 = vld [vmem:[#allocation9 + $0x17a0] sm:$0xff] }
 0x680   : > { %4449 = vmatpush.msrb.mxu3 %v3136_v36  ;;  %4468 = vmatpush.msrb.mxu1 %v3272_v24  ;;  %v3448_v37 = vld [vmem:[#allocation9 + $0xb20] sm:$0xff]  ;;  %v3721_v24 = vld [vmem:[#allocation9 + $0x13a8] sm:$0xff] }
 0x681   : > { %4583 = vmatpush.msra.mxu0 %v3185_v44  ;;  %4390 = vmatpush.msra.mxu2 %v3639_v16  ;;  %v3704_v47 = vld [vmem:[#allocation9 + $0x1320] sm:$0xff] }
 0x682   : > { %4450 = vmatpush.msrb.mxu3 %v3128_v56  ;;  %4469 = vmatpush.msrb.mxu1 %v3264_v7  ;;  %v3840_v43 = vld [vmem:[#allocation9 + $0x1760] sm:$0xff]  ;;  %v3713_v7 = vld [vmem:[#allocation9 + $0x1368] sm:$0xff] }
 0x683   : > { %4584 = vmatpush.msra.mxu0 %v3177_v52  ;;  %4391 = vmatpush.msra.mxu2 %v3631_v46  ;;  %v3440_v57 = vld [vmem:[#allocation9 + $0xae0] sm:$0xff]  ;;  %v4076_v46 = vpop.f32.mrf.mxu0 }
 0x684   : > { %4451 = vmatpush.msrb.mxu3 %v3120_v9  ;;  %4470 = vmatpush.msrb.mxu1 %v3256_v0  ;;  %v3696_v11 = vld [vmem:[#allocation9 + $0x12e0] sm:$0xff]  ;;  %v4056_v17 = vpop.f32.mrf.mxu2 }
 0x685   : > { %4585 = vmatpush.msra.mxu0 %v3169_v29  ;;  %4392 = vmatpush.msra.mxu2 %v3623_v23  ;;  %v3832_v10 = vld [vmem:[#allocation9 + $0x1720] sm:$0xff]  ;;  %v4057_v36 = vadd.f32 %v4056_v17, %v4036_v59  ;;  %v3705_v23 = vld [vmem:[#allocation9 + $0x1328] sm:$0xff] }
 0x686   : > { %4452 = vmatpush.msrb.mxu3 %v3112_v42  ;;  %4471 = vmatpush.msrb.mxu1 %v3248_v54  ;;  %v3432_v12 = vld [vmem:[#allocation9 + $0xaa0] sm:$0xff]  ;;  %v3649_v17 = vld [vmem:[#allocation9 + $0x1168] sm:$0xff] }
 0x687   : > { %4586 = vmatpush.msra.mxu0 %v3161_v19  ;;  %4393 = vmatpush.msra.mxu2 %v3615_v21  ;;  %v3688_v60 = vld [vmem:[#allocation9 + $0x12a0] sm:$0xff]  ;;  %v4077_v29 = vadd.f32 %v4076_v46, %v4057_v36  ;;  %v3697_v21 = vld [vmem:[#allocation9 + $0x12e8] sm:$0xff] }
 0x688   : > { %4453 = vmatpush.msrb.mxu3 %v3104_v53  ;;  %4472 = vmatpush.msrb.mxu1 %v3240_v51  ;;  %v3824_v35 = vld [vmem:[#allocation9 + $0x16e0] sm:$0xff]  ;;  %v4096_v51 = vpop.f32.mrf.mxu1  ;;  %v3641_v59 = vld [vmem:[#allocation9 + $0x1128] sm:$0xff] }
 0x689   : > { %4587 = vmatpush.msra.mxu0 %v3153_v15  ;;  %4394 = vmatpush.msra.mxu2 %v3607_v55  ;;  %v3424_v26 = vld [vmem:[#allocation9 + $0xa60] sm:$0xff]  ;;  %v3449_v36 = vld [vmem:[#allocation9 + $0xb28] sm:$0xff] }
 0x68a   : > { %4454 = vmatpush.msrb.mxu3 %v3096_v6  ;;  %4395 = vmatmul.f32.vlgmr.msra.gmra.mxu2 %v8177_v20  ;;  %v3680_v62 = vld [vmem:[#allocation9 + $0x1260] sm:$0xff]  ;;  %v4097_v6 = vadd.f32 %v4096_v51, %v4077_v29  ;;  %v3577_v46 = vld [vmem:[#allocation9 + $0xf28] sm:$0xff] }
 0x68b   : > { %4455 = vmatmul.f32.vlgmr.msrb.gmra.mxu3 %v8172_v28  ;;  %4473 = vmatpush.msrb.mxu1 %v3232_v32  ;;  %v3816_v33 = vld [vmem:[#allocation9 + $0x16a0] sm:$0xff]  ;;  %v3689_v32 = vld [vmem:[#allocation9 + $0x12a8] sm:$0xff] }
 0x68c   : > { %4479 = vmatpush.msrb.mxu2 %v3472_v41  ;;  %4519 = vmatpush.msra.mxu3 %v3728_v8  ;;  %v3416_v48 = vld [vmem:[#allocation9 + $0xa20] sm:$0xff]  ;;  %v3313_v29 = vld [vmem:[#allocation9 + $0x6e8] sm:$0xff] }
 0x68d   : > { %4588 = vmatpush.msra.mxu0 %v3145_v39  ;;  %4474 = vmatpush.msrb.mxu1 %v3224_v27  ;;  %v3672_v49 = vld [vmem:[#allocation9 + $0x1220] sm:$0xff]  ;;  %v3681_v27 = vld [vmem:[#allocation9 + $0x1268] sm:$0xff] }
 0x68e   : > { %4480 = vmatpush.msrb.mxu2 %v3464_v5  ;;  %4520 = vmatpush.msra.mxu3 %v3720_v45  ;;  %v3808_v40 = vld [vmem:[#allocation9 + $0x1660] sm:$0xff]  ;;  %v4116_v45 = vpop.f32.mrf.mxu3  ;;  %v3417_v51 = vld [vmem:[#allocation9 + $0xa28] sm:$0xff] }
 0x68f   : > { %4589 = vmatpush.msra.mxu0 %v3137_v38  ;;  %4475 = vmatmul.f32.vlgmr.msrb.gmra.mxu1 %v8187_v4  ;;  %v3408_v44 = vld [vmem:[#allocation9 + $0x9e0] sm:$0xff] }
 0x690   : > { %4539 = vmatpush.msra.mxu1 %v3856_v63  ;;  %4481 = vmatpush.msrb.mxu2 %v3456_v58  ;;  %v3664_v16 = vld [vmem:[#allocation9 + $0x11e0] sm:$0xff]  ;;  %v4117_v58 = vadd.f32 %v4116_v45, %v4097_v6  ;;  %v3466_v6 = vld [vmem:[#allocation9 + $0xbb0] sm:$0xff]  ;;  %v3537_v45 = vld [vmem:[#allocation9 + $0xde8] sm:$0xff] }
 0x691   : > { %4521 = vmatpush.msra.mxu3 %v3712_v61  ;;  %4590 = vmatpush.msra.mxu0 %v3129_v1  ;;  %v3800_v56 = vld [vmem:[#allocation9 + $0x1620] sm:$0xff]  ;;  %v3673_v61 = vld [vmem:[#allocation9 + $0x1228] sm:$0xff] }
 0x692   : > { %4540 = vmatpush.msra.mxu1 %v3848_v13  ;;  %4482 = vmatpush.msrb.mxu2 %v3448_v37  ;;  %v3400_v52 = vld [vmem:[#allocation9 + $0x9a0] sm:$0xff] }
 0x693   : > { %4522 = vmatpush.msra.mxu3 %v3704_v47  ;;  %4591 = vmatpush.msra.mxu0 %v3121_v3  ;;  %v3656_v9 = vld [vmem:[#allocation9 + $0x11a0] sm:$0xff]  ;;  %v3665_v3 = vld [vmem:[#allocation9 + $0x11e8] sm:$0xff] }
 0x694   : > { %4541 = vmatpush.msra.mxu1 %v3840_v43  ;;  %4483 = vmatpush.msrb.mxu2 %v3440_v57  ;;  %v3792_v0 = vld [vmem:[#allocation9 + $0x15e0] sm:$0xff] }
 0x695   : > { %4523 = vmatpush.msra.mxu3 %v3696_v11  ;;  %4592 = vmatpush.msra.mxu0 %v3113_v25  ;;  %v3392_v42 = vld [vmem:[#allocation9 + $0x960] sm:$0xff]  ;;  %v4156_v11 = vpop.f32.mrf.mxu0 }
 0x696   : > { %4542 = vmatpush.msra.mxu1 %v3832_v10  ;;  %4484 = vmatpush.msrb.mxu2 %v3432_v12  ;;  %v3648_v54 = vld [vmem:[#allocation9 + $0x1160] sm:$0xff] }
 0x697   : > { %4524 = vmatpush.msra.mxu3 %v3688_v60  ;;  %4593 = vmatpush.msra.mxu0 %v3105_v2  ;;  %v3784_v19 = vld [vmem:[#allocation9 + $0x15a0] sm:$0xff]  ;;  %v3473_v2 = vld [vmem:[#allocation9 + $0xbe8] sm:$0xff] }
 0x698   : > { %4543 = vmatpush.msra.mxu1 %v3824_v35  ;;  %4485 = vmatpush.msrb.mxu2 %v3424_v26  ;;  %v3384_v53 = vld [vmem:[#allocation9 + $0x920] sm:$0xff]  ;;  %v3657_v35 = vld [vmem:[#allocation9 + $0x11a8] sm:$0xff] }
 0x699   : > { %4525 = vmatpush.msra.mxu3 %v3680_v62  ;;  %4594 = vmatpush.msra.mxu0 %v3097_v18  ;;  %v3640_v15 = vld [vmem:[#allocation9 + $0x1120] sm:$0xff]  ;;  %v3465_v18 = vld [vmem:[#allocation9 + $0xba8] sm:$0xff] }
 0x69a   : > { %4544 = vmatpush.msra.mxu1 %v3816_v33  ;;  %4595 = vmatmul.f32.vlgmr.msra.gmra.mxu0 %v8172_v28  ;;  %v3776_v55 = vld [vmem:[#allocation9 + $0x1560] sm:$0xff]  ;;  %v3345_v33 = vld [vmem:[#allocation9 + $0x7e8] sm:$0xff] }
 0x69b   : > { %4659 = vmatpush.msrb.mxu0 %v3729_v14  ;;  %4486 = vmatpush.msrb.mxu2 %v3416_v48  ;;  %v3376_v41 = vld [vmem:[#allocation9 + $0x8e0] sm:$0xff]  ;;  %v3601_v14 = vld [vmem:[#allocation9 + $0xfe8] sm:$0xff] }
 0x69c   : > { %4526 = vmatpush.msra.mxu3 %v3672_v49  ;;  %4545 = vmatpush.msra.mxu1 %v3808_v40  ;;  %v3632_v8 = vld [vmem:[#allocation9 + $0x10e0] sm:$0xff]  ;;  %v3457_v48 = vld [vmem:[#allocation9 + $0xb68] sm:$0xff] }
 0x69d   : > { %4660 = vmatpush.msrb.mxu0 %v3721_v24  ;;  %4487 = vmatpush.msrb.mxu2 %v3408_v44  ;;  %v3768_v39 = vld [vmem:[#allocation9 + $0x1520] sm:$0xff]  ;;  %v3337_v49 = vld [vmem:[#allocation9 + $0x7a8] sm:$0xff] }
 0x69e   : > { %4527 = vmatpush.msra.mxu3 %v3664_v16  ;;  %4546 = vmatpush.msra.mxu1 %v3800_v56  ;;  %v3368_v5 = vld [vmem:[#allocation9 + $0x8a0] sm:$0xff]  ;;  %v3593_v40 = vld [vmem:[#allocation9 + $0xfa8] sm:$0xff] }
 0x69f   : > { %4661 = vmatpush.msrb.mxu0 %v3713_v7  ;;  %4488 = vmatpush.msrb.mxu2 %v3400_v52  ;;  %v3624_v38 = vld [vmem:[#allocation9 + $0x10a0] sm:$0xff]  ;;  %v3633_v24 = vld [vmem:[#allocation9 + $0x10e8] sm:$0xff] }
 0x6a0   : > { %4528 = vmatpush.msra.mxu3 %v3656_v9  ;;  %4547 = vmatpush.msra.mxu1 %v3792_v0  ;;  %v3760_v63 = vld [vmem:[#allocation9 + $0x14e0] sm:$0xff]  ;;  %v3329_v44 = vld [vmem:[#allocation9 + $0x768] sm:$0xff] }
 0x6a1   : > { %4662 = vmatpush.msrb.mxu0 %v3705_v23  ;;  %4489 = vmatpush.msrb.mxu2 %v3392_v42  ;;  %v3360_v1 = vld [vmem:[#allocation9 + $0x860] sm:$0xff]  ;;  %v3585_v16 = vld [vmem:[#allocation9 + $0xf68] sm:$0xff] }
 0x6a2   : > { %4529 = vmatpush.msra.mxu3 %v3648_v54  ;;  %4548 = vmatpush.msra.mxu1 %v3784_v19  ;;  %v3616_v13 = vld [vmem:[#allocation9 + $0x1060] sm:$0xff]  ;;  %v3441_v56 = vld [vmem:[#allocation9 + $0xae8] sm:$0xff] }
 0x6a3   : > { %4663 = vmatpush.msrb.mxu0 %v3697_v21  ;;  %4490 = vmatpush.msrb.mxu2 %v3384_v53  ;;  %v3752_v37 = vld [vmem:[#allocation9 + $0x14a0] sm:$0xff]  ;;  %v3625_v7 = vld [vmem:[#allocation9 + $0x10a8] sm:$0xff]  ;;  %v3474_v53 = vld [vmem:[#allocation9 + $0xbf0] sm:$0xff] }
 0x6a4   : > { %4530 = vmatpush.msra.mxu3 %v3640_v15  ;;  %4549 = vmatpush.msra.mxu1 %v3776_v55  ;;  %v3352_v43 = vld [vmem:[#allocation9 + $0x820] sm:$0xff]  ;;  %v3321_v52 = vld [vmem:[#allocation9 + $0x728] sm:$0xff] }
 0x6a5   : > { %4664 = vmatpush.msrb.mxu0 %v3689_v32  ;;  %4491 = vmatpush.msrb.mxu2 %v3376_v41  ;;  %v3608_v25 = vld [vmem:[#allocation9 + $0x1020] sm:$0xff]  ;;  %v3433_v9 = vld [vmem:[#allocation9 + $0xaa8] sm:$0xff] }
 0x6a6   : > { %4531 = vmatpush.msra.mxu3 %v3632_v8  ;;  %4550 = vmatpush.msra.mxu1 %v3768_v39  ;;  %v3744_v10 = vld [vmem:[#allocation9 + $0x1460] sm:$0xff]  ;;  %v3617_v0 = vld [vmem:[#allocation9 + $0x1068] sm:$0xff]  ;;  %v3458_v39 = vld [vmem:[#allocation9 + $0xb70] sm:$0xff] }
 0x6a7   : > { %4665 = vmatpush.msrb.mxu0 %v3681_v27  ;;  %4492 = vmatpush.msrb.mxu2 %v3368_v5  ;;  %v4136_v47 = vpop.f32.mrf.mxu2  ;;  %v3872_v60 = vld [vmem:[#allocation9 + $0x1860] sm:$0xff]  ;;  %v3569_v23 = vld [vmem:[#allocation9 + $0xee8] sm:$0xff] }
 0x6a8   : > { %4532 = vmatpush.msra.mxu3 %v3624_v38  ;;  %4551 = vmatpush.msra.mxu1 %v3760_v63  ;;  %v4137_v57 = vadd.f32 %v4136_v47, %v4117_v58  ;;  %v3736_v26 = vld [vmem:[#allocation9 + $0x1420] sm:$0xff]  ;;  %v3425_v42 = vld [vmem:[#allocation9 + $0xa68] sm:$0xff]  ;;  %v4196_v38 = vpop.f32.mrf.mxu3  ;;  %v3450_v63 = vld [vmem:[#allocation9 + $0xb30] sm:$0xff] }
 0x6a9   : > { %4666 = vmatpush.msrb.mxu0 %v3673_v61  ;;  %4493 = vmatpush.msrb.mxu2 %v3360_v1  ;;  %v3864_v62 = vld [vmem:[#allocation9 + $0x1820] sm:$0xff]  ;;  %v3609_v54 = vld [vmem:[#allocation9 + $0x1028] sm:$0xff] }
 0x6aa   : > { %4533 = vmatpush.msra.mxu3 %v3616_v13  ;;  %4552 = vmatpush.msra.mxu1 %v3752_v37  ;;  %v4157_v12 = vadd.f32 %v4156_v11, %v4137_v57  ;;  %v3305_v19 = vld [vmem:[#allocation9 + $0x6a8] sm:$0xff]  ;;  %v4176_v13 = vpop.f32.mrf.mxu1  ;;  %v3442_v37 = vld [vmem:[#allocation9 + $0xaf0] sm:$0xff]  ;;  %v4216_v11 = vpop.f32.mrf.mxu0 }
 0x6ab   : > { %4667 = vmatpush.msrb.mxu0 %v3665_v3  ;;  %4494 = vmatpush.msrb.mxu2 %v3352_v43  ;;  %v3561_v21 = vld [vmem:[#allocation9 + $0xea8] sm:$0xff]  ;;  %v4197_v3 = vadd.f32 %v4196_v38, %v4176_v13  ;;  %v3186_v13 = vld [vmem:[#allocation9 + $0x2f0] sm:$0xff] }
 0x6ac   : > { %4534 = vmatpush.msra.mxu3 %v3608_v25  ;;  %4495 = vmatmul.f32.vlgmr.msrb.gmra.mxu2 %v8190_v31  ;;  %5002 = vst [vmem:[#allocation1] sm:$0xff] %v4157_v12  ;;  %v3297_v15 = vld [vmem:[#allocation9 + $0x668] sm:$0xff]  ;;  %v3434_v25 = vld [vmem:[#allocation9 + $0xab0] sm:$0xff] }
 0x6ad   : > { %4535 = vmatmul.f32.vlgmr.msra.gmra.mxu3 %v8177_v20  ;;  %4553 = vmatpush.msra.mxu1 %v3744_v10  ;;  %v3553_v55 = vld [vmem:[#allocation9 + $0xe68] sm:$0xff] }
 0x6ae   : > { %4573 = vmatpush.msra.mxu2 %v3872_v60  ;;  %4619 = vmatpush.msrb.mxu3 %v3473_v2  ;;  %v3409_v32 = vld [vmem:[#allocation9 + $0x9e8] sm:$0xff]  ;;  %v3426_v2 = vld [vmem:[#allocation9 + $0xa70] sm:$0xff] }
 0x6af   : > { %4668 = vmatpush.msrb.mxu0 %v3657_v35  ;;  %4554 = vmatpush.msra.mxu1 %v3736_v26  ;;  %v3289_v41 = vld [vmem:[#allocation9 + $0x628] sm:$0xff] }
 0x6b0   : > { %4574 = vmatpush.msra.mxu2 %v3864_v62  ;;  %4620 = vmatpush.msrb.mxu3 %v3465_v18  ;;  %v3545_v8 = vld [vmem:[#allocation9 + $0xe28] sm:$0xff]  ;;  %v4217_v18 = vadd.f32 %v4216_v11, %v4197_v3  ;;  %v3874_v11 = vld [vmem:[#allocation9 + $0x1870] sm:$0xff] }
 0x6b1   : > { %4669 = vmatpush.msrb.mxu0 %v3649_v17  ;;  %4555 = vmatmul.f32.vlgmr.msra.gmra.mxu1 %v8197_v22  ;;  %v3401_v27 = vld [vmem:[#allocation9 + $0x9a8] sm:$0xff]  ;;  %v3418_v17 = vld [vmem:[#allocation9 + $0xa30] sm:$0xff] }
 0x6b2   : > { %4599 = vmatpush.msrb.mxu2 %v3345_v33  ;;  %4639 = vmatpush.msrb.mxu1 %v3601_v14  ;;  %v3281_v5 = vld [vmem:[#allocation9 + $0x5e8] sm:$0xff] }
 0x6b3   : > { %4621 = vmatpush.msrb.mxu3 %v3457_v48  ;;  %4670 = vmatpush.msrb.mxu0 %v3641_v59  ;;  %v3393_v58 = vld [vmem:[#allocation9 + $0x968] sm:$0xff] }
 0x6b4   : > { %4600 = vmatpush.msrb.mxu2 %v3337_v49  ;;  %4640 = vmatpush.msrb.mxu1 %v3593_v40  ;;  %v3273_v61 = vld [vmem:[#allocation9 + $0x5a8] sm:$0xff]  ;;  %v3410_v40 = vld [vmem:[#allocation9 + $0x9f0] sm:$0xff] }
 0x6b5   : > { %4622 = vmatpush.msrb.mxu3 %v3449_v36  ;;  %4671 = vmatpush.msrb.mxu0 %v3633_v24  ;;  %v3529_v1 = vld [vmem:[#allocation9 + $0xda8] sm:$0xff] }
 0x6b6   : > { %4601 = vmatpush.msrb.mxu2 %v3329_v44  ;;  %4641 = vmatpush.msrb.mxu1 %v3585_v16  ;;  %v3385_v47 = vld [vmem:[#allocation9 + $0x928] sm:$0xff] }
 0x6b7   : > { %5258 = vmatmul.msk.f32.vlgmr.msra.gmra.mxu2 %vm2276_vm1, %v8200_v50  ;;  %4623 = vmatpush.msrb.mxu3 %v3441_v56  ;;  %v3265_v43 = vld [vmem:[#allocation9 + $0x568] sm:$0xff] }
 0x6b8   : > { %4672 = vmatpush.msrb.mxu0 %v3625_v7  ;;  %4602 = vmatpush.msrb.mxu2 %v3321_v52  ;;  %v3521_v57 = vld [vmem:[#allocation9 + $0xd68] sm:$0xff] }
 0x6b9   : > { %4642 = vmatpush.msrb.mxu1 %v3577_v46  ;;  %4624 = vmatpush.msrb.mxu3 %v3433_v9  ;;  %v3377_v10 = vld [vmem:[#allocation9 + $0x8e8] sm:$0xff]  ;;  %v3402_v46 = vld [vmem:[#allocation9 + $0x9b0] sm:$0xff] }
 0x6ba   : > { %4673 = vmatpush.msrb.mxu0 %v3617_v0  ;;  %4603 = vmatpush.msrb.mxu2 %v3313_v29  ;;  %v3257_v12 = vld [vmem:[#allocation9 + $0x528] sm:$0xff]  ;;  %v4296_v29 = vpop.f32.mrf.mxu0 }
 0x6bb   : > { %4643 = vmatpush.msrb.mxu1 %v3569_v23  ;;  %4625 = vmatpush.msrb.mxu3 %v3425_v42  ;;  %v3513_v60 = vld [vmem:[#allocation9 + $0xd28] sm:$0xff] }
 0x6bc   : > { %4674 = vmatpush.msrb.mxu0 %v3609_v54  ;;  %4604 = vmatpush.msrb.mxu2 %v3305_v19  ;;  %v3369_v35 = vld [vmem:[#allocation9 + $0x8a8] sm:$0xff]  ;;  %v3394_v54 = vld [vmem:[#allocation9 + $0x970] sm:$0xff] }
 0x6bd   : > { %4644 = vmatpush.msrb.mxu1 %v3561_v21  ;;  %4675 = vmatmul.f32.vlgmr.msrb.gmra.mxu0 %v8177_v20  ;;  %v3249_v26 = vld [vmem:[#allocation9 + $0x4e8] sm:$0xff] }
 0x6be   : > { %4759 = vmatpush.msra.mxu0 %v3474_v53  ;;  %4626 = vmatpush.msrb.mxu3 %v3417_v51  ;;  %v3505_v62 = vld [vmem:[#allocation9 + $0xce8] sm:$0xff]  ;;  %v3218_v51 = vld [vmem:[#allocation9 + $0x3f0] sm:$0xff] }
 0x6bf   : > { %4605 = vmatpush.msrb.mxu2 %v3297_v15  ;;  %4645 = vmatpush.msrb.mxu1 %v3553_v55  ;;  %v3361_v33 = vld [vmem:[#allocation9 + $0x868] sm:$0xff]  ;;  %v3346_v15 = vld [vmem:[#allocation9 + $0x7f0] sm:$0xff] }
 0x6c0   : > { %4760 = vmatpush.msra.mxu0 %v3466_v6  ;;  %4627 = vmatpush.msrb.mxu3 %v3409_v32  ;;  %v3241_v48 = vld [vmem:[#allocation9 + $0x4a8] sm:$0xff]  ;;  %v3386_v55 = vld [vmem:[#allocation9 + $0x930] sm:$0xff] }
 0x6c1   : > { %4606 = vmatpush.msrb.mxu2 %v3289_v41  ;;  %4646 = vmatpush.msrb.mxu1 %v3545_v8  ;;  %v3497_v59 = vld [vmem:[#allocation9 + $0xca8] sm:$0xff]  ;;  %v3210_v32 = vld [vmem:[#allocation9 + $0x3b0] sm:$0xff] }
 0x6c2   : > { %4761 = vmatpush.msra.mxu0 %v3458_v39  ;;  %4628 = vmatpush.msrb.mxu3 %v3401_v27  ;;  %v3353_v36 = vld [vmem:[#allocation9 + $0x828] sm:$0xff]  ;;  %v3338_v41 = vld [vmem:[#allocation9 + $0x7b0] sm:$0xff] }
 0x6c3   : > { %4607 = vmatpush.msrb.mxu2 %v3281_v5  ;;  %4647 = vmatpush.msrb.mxu1 %v3537_v45  ;;  %v4256_v24 = vpop.f32.mrf.mxu1  ;;  %v3233_v44 = vld [vmem:[#allocation9 + $0x468] sm:$0xff]  ;;  %v3378_v8 = vld [vmem:[#allocation9 + $0x8f0] sm:$0xff] }
 0x6c4   : > { %4762 = vmatpush.msra.mxu0 %v3450_v63  ;;  %4629 = vmatpush.msrb.mxu3 %v3393_v58  ;;  %v3489_v56 = vld [vmem:[#allocation9 + $0xc68] sm:$0xff]  ;;  %v3202_v27 = vld [vmem:[#allocation9 + $0x370] sm:$0xff] }
 0x6c5   : > { %4608 = vmatpush.msrb.mxu2 %v3273_v61  ;;  %4648 = vmatpush.msrb.mxu1 %v3529_v1  ;;  %v3873_v7 = vld [vmem:[#allocation9 + $0x1868] sm:$0xff]  ;;  %v3330_v5 = vld [vmem:[#allocation9 + $0x770] sm:$0xff] }
 0x6c6   : > { %4763 = vmatpush.msra.mxu0 %v3442_v37  ;;  %4630 = vmatpush.msrb.mxu3 %v3385_v47  ;;  %v3225_v9 = vld [vmem:[#allocation9 + $0x428] sm:$0xff]  ;;  %v3370_v45 = vld [vmem:[#allocation9 + $0x8b0] sm:$0xff] }
 0x6c7   : > { %4609 = vmatpush.msrb.mxu2 %v3265_v43  ;;  %4649 = vmatpush.msrb.mxu1 %v3521_v57  ;;  %v3481_v23 = vld [vmem:[#allocation9 + $0xc28] sm:$0xff]  ;;  %v3194_v63 = vld [vmem:[#allocation9 + $0x330] sm:$0xff] }
 0x6c8   : > { %4764 = vmatpush.msra.mxu0 %v3434_v25  ;;  %4631 = vmatpush.msrb.mxu3 %v3377_v10  ;;  %v3865_v42 = vld [vmem:[#allocation9 + $0x1828] sm:$0xff]  ;;  %v3322_v58 = vld [vmem:[#allocation9 + $0x730] sm:$0xff] }
 0x6c9   : > { %4610 = vmatpush.msrb.mxu2 %v3257_v12  ;;  %4650 = vmatpush.msrb.mxu1 %v3513_v60  ;;  %v4236_v14 = vpop.f32.mrf.mxu2  ;;  %v3857_v21 = vld [vmem:[#allocation9 + $0x17e8] sm:$0xff]  ;;  %v3362_v61 = vld [vmem:[#allocation9 + $0x870] sm:$0xff] }
 0x6ca   : > { %4765 = vmatpush.msra.mxu0 %v3426_v2  ;;  %4632 = vmatpush.msrb.mxu3 %v3369_v35  ;;  %v4237_v49 = vadd.f32 %v4236_v14, %v4217_v18  ;;  %v4276_v52 = vpop.f32.mrf.mxu3  ;;  %v8242_v53 = vld [vmem:[#allocation1 + $0x1] ss:$9 sm:$0xff] }
 0x6cb   : > { %4611 = vmatpush.msrb.mxu2 %v3249_v26  ;;  %4651 = vmatpush.msrb.mxu1 %v3505_v62  ;;  %v3849_v6 = vld [vmem:[#allocation9 + $0x17a8] sm:$0xff]  ;;  %v3314_v37 = vld [vmem:[#allocation9 + $0x6f0] sm:$0xff]  ;;  %v3347_v35 = vld [vmem:[#allocation9 + $0x7f8] sm:$0xff] }
 0x6cc   : > { %4766 = vmatpush.msra.mxu0 %v3418_v17  ;;  %4633 = vmatpush.msrb.mxu3 %v3361_v33  ;;  %v4257_v16 = vadd.f32 %v4256_v24, %v4237_v49  ;;  %v3841_v39 = vld [vmem:[#allocation9 + $0x1768] sm:$0xff]  ;;  %v3354_v47 = vld [vmem:[#allocation9 + $0x830] sm:$0xff]  ;;  %v3339_v17 = vld [vmem:[#allocation9 + $0x7b8] sm:$0xff] }
 0x6cd   : > { %4612 = vmatpush.msrb.mxu2 %v3241_v48  ;;  %4652 = vmatpush.msrb.mxu1 %v3497_v59  ;;  %v3833_v38 = vld [vmem:[#allocation9 + $0x1728] sm:$0xff]  ;;  %v3178_v43 = vld [vmem:[#allocation9 + $0x2b0] sm:$0xff]  ;;  %v3331_v59 = vld [vmem:[#allocation9 + $0x778] sm:$0xff] }
 0x6ce   : > { %4767 = vmatpush.msra.mxu0 %v3410_v40  ;;  %4634 = vmatpush.msrb.mxu3 %v3353_v36  ;;  %v4277_v0 = vadd.f32 %v4276_v52, %v4257_v16  ;;  %v3825_v1 = vld [vmem:[#allocation9 + $0x16e8] sm:$0xff]  ;;  %v3306_v57 = vld [vmem:[#allocation9 + $0x6b0] sm:$0xff]  ;;  %v3323_v36 = vld [vmem:[#allocation9 + $0x738] sm:$0xff] }
 0x6cf   : > { %4613 = vmatpush.msrb.mxu2 %v3233_v44  ;;  %4635 = vmatmul.f32.vlgmr.msrb.gmra.mxu3 %v8190_v31  ;;  %v3817_v3 = vld [vmem:[#allocation9 + $0x16a8] sm:$0xff]  ;;  %v3170_v10 = vld [vmem:[#allocation9 + $0x270] sm:$0xff] }
 0x6d0   : > { %4653 = vmatpush.msrb.mxu1 %v3489_v56  ;;  %4713 = vmatpush.msra.mxu3 %v3873_v7  ;;  %v4297_v19 = vadd.f32 %v4296_v29, %v4277_v0  ;;  %v3809_v25 = vld [vmem:[#allocation9 + $0x1668] sm:$0xff]  ;;  %v3298_v12 = vld [vmem:[#allocation9 + $0x670] sm:$0xff]  ;;  %v3315_v56 = vld [vmem:[#allocation9 + $0x6f8] sm:$0xff] }
 0x6d1   : > { %4768 = vmatpush.msra.mxu0 %v3402_v46  ;;  %4614 = vmatpush.msrb.mxu2 %v3225_v9  ;;  %v3866_v60 = vld [vmem:[#allocation9 + $0x1830] sm:$0xff]  ;;  %v3801_v2 = vld [vmem:[#allocation9 + $0x1628] sm:$0xff]  ;;  %v3307_v9 = vld [vmem:[#allocation9 + $0x6b8] sm:$0xff] }
 0x6d2   : > { %4654 = vmatpush.msrb.mxu1 %v3481_v23  ;;  %4714 = vmatpush.msra.mxu3 %v3865_v42  ;;  %5008 = vst [vmem:[#allocation1] sm:$0xff] %v4297_v19  ;;  %v3162_v26 = vld [vmem:[#allocation9 + $0x230] sm:$0xff]  ;;  %v3793_v18 = vld [vmem:[#allocation9 + $0x15e8] sm:$0xff]  ;;  %v3299_v42 = vld [vmem:[#allocation9 + $0x678] sm:$0xff] }
 0x6d3   : > { %4769 = vmatpush.msra.mxu0 %v3394_v54  ;;  %4615 = vmatmul.f32.vlgmr.msrb.gmra.mxu2 %v8187_v4  ;;  %v3290_v62 = vld [vmem:[#allocation9 + $0x630] sm:$0xff]  ;;  %v3785_v48 = vld [vmem:[#allocation9 + $0x15a8] sm:$0xff] }
 0x6d4   : > { %4655 = vmatmul.f32.vlgmr.msrb.gmra.mxu1 %v8184_v34  ;;  %4679 = vmatpush.msra.mxu2 %v3857_v21  ;;  %v3154_v33 = vld [vmem:[#allocation9 + $0x1f0] sm:$0xff]  ;;  %v3777_v24 = vld [vmem:[#allocation9 + $0x1568] sm:$0xff] }
 0x6d5   : > { %4719 = vmatpush.msra.mxu1 %v3218_v51  ;;  %4739 = vmatpush.msrb.mxu3 %v3346_v15  ;;  %v3282_v14 = vld [vmem:[#allocation9 + $0x5f0] sm:$0xff]  ;;  %v3769_v7 = vld [vmem:[#allocation9 + $0x1528] sm:$0xff]  ;;  %v3291_v51 = vld [vmem:[#allocation9 + $0x638] sm:$0xff] }
 0x6d6   : > { %4770 = vmatpush.msra.mxu0 %v3386_v55  ;;  %4680 = vmatpush.msra.mxu2 %v3849_v6  ;;  %v3146_v49 = vld [vmem:[#allocation9 + $0x1b0] sm:$0xff]  ;;  %v3761_v0 = vld [vmem:[#allocation9 + $0x14e8] sm:$0xff] }
 0x6d7   : > { %4720 = vmatpush.msra.mxu1 %v3210_v32  ;;  %4740 = vmatpush.msrb.mxu3 %v3338_v41  ;;  %v3274_v40 = vld [vmem:[#allocation9 + $0x5b0] sm:$0xff]  ;;  %v3753_v54 = vld [vmem:[#allocation9 + $0x14a8] sm:$0xff]  ;;  %v3283_v32 = vld [vmem:[#allocation9 + $0x5f8] sm:$0xff] }
 0x6d8   : > { %4771 = vmatpush.msra.mxu0 %v3378_v8  ;;  %4681 = vmatpush.msra.mxu2 %v3841_v39  ;;  %v3138_v44 = vld [vmem:[#allocation9 + $0x170] sm:$0xff]  ;;  %v3745_v15 = vld [vmem:[#allocation9 + $0x1468] sm:$0xff] }
 0x6d9   : > { %4721 = vmatpush.msra.mxu1 %v3202_v27  ;;  %4741 = vmatpush.msrb.mxu3 %v3330_v5  ;;  %v3266_v16 = vld [vmem:[#allocation9 + $0x570] sm:$0xff]  ;;  %v3737_v41 = vld [vmem:[#allocation9 + $0x1428] sm:$0xff] }
 0x6da   : > { %5259 = vmatmul.msk.f32.vlgmr.msra.gmra.mxu3 %vm2276_vm1, %v8200_v50  ;;  %4772 = vmatpush.msra.mxu0 %v3370_v45  ;;  %v3130_v52 = vld [vmem:[#allocation9 + $0x130] sm:$0xff] }
 0x6db   : > { %4682 = vmatpush.msra.mxu2 %v3833_v38  ;;  %4722 = vmatpush.msra.mxu1 %v3194_v63  ;;  %v3258_v46 = vld [vmem:[#allocation9 + $0x530] sm:$0xff]  ;;  %v3275_v38 = vld [vmem:[#allocation9 + $0x5b8] sm:$0xff] }
 0x6dc   : > { %4742 = vmatpush.msrb.mxu3 %v3322_v58  ;;  %4773 = vmatpush.msra.mxu0 %v3362_v61  ;;  %v3122_v29 = vld [vmem:[#allocation9 + $0xf0] sm:$0xff] }
 0x6dd   : > { %4683 = vmatpush.msra.mxu2 %v3825_v1  ;;  %4723 = vmatpush.msra.mxu1 %v3186_v13  ;;  %v3250_v23 = vld [vmem:[#allocation9 + $0x4f0] sm:$0xff]  ;;  %v3267_v1 = vld [vmem:[#allocation9 + $0x578] sm:$0xff] }
 0x6de   : > { %4743 = vmatpush.msrb.mxu3 %v3314_v37  ;;  %4774 = vmatpush.msra.mxu0 %v3354_v47  ;;  %v3114_v19 = vld [vmem:[#allocation9 + $0xb0] sm:$0xff] }
 0x6df   : > { %4684 = vmatpush.msra.mxu2 %v3817_v3  ;;  %4724 = vmatpush.msra.mxu1 %v3178_v43  ;;  %v3242_v21 = vld [vmem:[#allocation9 + $0x4b0] sm:$0xff]  ;;  %v3259_v3 = vld [vmem:[#allocation9 + $0x538] sm:$0xff] }
 0x6e0   : > { %4744 = vmatpush.msrb.mxu3 %v3306_v57  ;;  %4775 = vmatmul.f32.vlgmr.msra.gmra.mxu0 %v8190_v31  ;;  %v3106_v55 = vld [vmem:[#allocation9 + $0x70] sm:$0xff] }
 0x6e1   : > { %4853 = vmatpush.msrb.mxu0 %v3874_v11  ;;  %4685 = vmatpush.msra.mxu2 %v3809_v25  ;;  %v3234_v6 = vld [vmem:[#allocation9 + $0x470] sm:$0xff]  ;;  %v3251_v25 = vld [vmem:[#allocation9 + $0x4f8] sm:$0xff] }
 0x6e2   : > { %4725 = vmatpush.msra.mxu1 %v3170_v10  ;;  %4745 = vmatpush.msrb.mxu3 %v3298_v12  ;;  %v3098_v8 = vld [vmem:[#allocation9 + $0x30] sm:$0xff] }
 0x6e3   : > { %4854 = vmatpush.msrb.mxu0 %v3866_v60  ;;  %4686 = vmatpush.msra.mxu2 %v3801_v2  ;;  %v3226_v39 = vld [vmem:[#allocation9 + $0x430] sm:$0xff]  ;;  %v3243_v2 = vld [vmem:[#allocation9 + $0x4b8] sm:$0xff] }
 0x6e4   : > { %4726 = vmatpush.msra.mxu1 %v3162_v26  ;;  %4746 = vmatpush.msrb.mxu3 %v3290_v62  ;;  %v3602_v27 = vld [vmem:[#allocation9 + $0xff0] sm:$0xff] }
 0x6e5   : > { %4879 = vmatpush.msra.mxu0 %v3347_v35  ;;  %4687 = vmatpush.msra.mxu2 %v3793_v18  ;;  %v3730_v5 = vld [vmem:[#allocation9 + $0x13f0] sm:$0xff]  ;;  %v3235_v18 = vld [vmem:[#allocation9 + $0x478] sm:$0xff] }
 0x6e6   : > { %4727 = vmatpush.msra.mxu1 %v3154_v33  ;;  %4747 = vmatpush.msrb.mxu3 %v3282_v14  ;;  %v3858_v45 = vld [vmem:[#allocation9 + $0x17f0] sm:$0xff] }
 0x6e7   : > { %4880 = vmatpush.msra.mxu0 %v3339_v17  ;;  %4688 = vmatpush.msra.mxu2 %v3785_v48  ;;  %v3594_v63 = vld [vmem:[#allocation9 + $0xfb0] sm:$0xff] }
 0x6e8   : > { %4728 = vmatpush.msra.mxu1 %v3146_v49  ;;  %4748 = vmatpush.msrb.mxu3 %v3274_v40  ;;  %v3722_v58 = vld [vmem:[#allocation9 + $0x13b0] sm:$0xff]  ;;  %v4336_v40 = vpop.f32.mrf.mxu0 }
 0x6e9   : > { %4881 = vmatpush.msra.mxu0 %v3331_v59  ;;  %4689 = vmatpush.msra.mxu2 %v3777_v24  ;;  %v3850_v61 = vld [vmem:[#allocation9 + $0x17b0] sm:$0xff]  ;;  %v3227_v59 = vld [vmem:[#allocation9 + $0x438] sm:$0xff] }
 0x6ea   : > { %5260 = vmatmul.msk.f32.vlgmr.msrb.gmra.mxu0 %vm2276_vm1, %v8200_v50  ;;  %4729 = vmatpush.msra.mxu1 %v3138_v44  ;;  %v3586_v13 = vld [vmem:[#allocation9 + $0xf70] sm:$0xff]  ;;  %v3859_v44 = vld [vmem:[#allocation9 + $0x17f8] sm:$0xff] }
 0x6eb   : > { %4882 = vmatpush.msra.mxu0 %v3323_v36  ;;  %4749 = vmatpush.msrb.mxu3 %v3266_v16  ;;  %v3714_v37 = vld [vmem:[#allocation9 + $0x1370] sm:$0xff]  ;;  %v4316_v33 = vpop.f32.mrf.mxu2 }
 0x6ec   : > { %4690 = vmatpush.msra.mxu2 %v3769_v7  ;;  %4730 = vmatpush.msra.mxu1 %v3130_v52  ;;  %v3842_v47 = vld [vmem:[#allocation9 + $0x1770] sm:$0xff]  ;;  %v4337_v24 = vadd.f32 %v4336_v40, %v4316_v33  ;;  %v3851_v52 = vld [vmem:[#allocation9 + $0x17b8] sm:$0xff] }
 0x6ed   : > { %4883 = vmatpush.msra.mxu0 %v3315_v56  ;;  %4750 = vmatpush.msrb.mxu3 %v3258_v46  ;;  %v3578_v43 = vld [vmem:[#allocation9 + $0xf30] sm:$0xff]  ;;  %v3787_v33 = vld [vmem:[#allocation9 + $0x15b8] sm:$0xff] }
 0x6ee   : > { %4691 = vmatpush.msra.mxu2 %v3761_v0  ;;  %4731 = vmatpush.msra.mxu1 %v3122_v29  ;;  %v3706_v57 = vld [vmem:[#allocation9 + $0x1330] sm:$0xff]  ;;  %v3203_v40 = vld [vmem:[#allocation9 + $0x378] sm:$0xff] }
 0x6ef   : > { %4884 = vmatpush.msra.mxu0 %v3307_v9  ;;  %4751 = vmatpush.msrb.mxu3 %v3250_v23  ;;  %v3834_v11 = vld [vmem:[#allocation9 + $0x1730] sm:$0xff]  ;;  %v4356_v9 = vpop.f32.mrf.mxu1 }
 0x6f0   : > { %4692 = vmatpush.msra.mxu2 %v3753_v54  ;;  %4732 = vmatpush.msra.mxu1 %v3114_v19  ;;  %v3570_v10 = vld [vmem:[#allocation9 + $0xef0] sm:$0xff]  ;;  %v4357_v23 = vadd.f32 %v4356_v9, %v4337_v24  ;;  %v3587_v24 = vld [vmem:[#allocation9 + $0xf78] sm:$0xff] }
 0x6f1   : > { %4885 = vmatpush.msra.mxu0 %v3299_v42  ;;  %4752 = vmatpush.msrb.mxu3 %v3242_v21  ;;  %v3698_v12 = vld [vmem:[#allocation9 + $0x12f0] sm:$0xff]  ;;  %v3843_v42 = vld [vmem:[#allocation9 + $0x1778] sm:$0xff] }
 0x6f2   : > { %4693 = vmatpush.msra.mxu2 %v3745_v15  ;;  %4733 = vmatpush.msra.mxu1 %v3106_v55  ;;  %v3826_v60 = vld [vmem:[#allocation9 + $0x16f0] sm:$0xff]  ;;  %v4376_v15 = vpop.f32.mrf.mxu3  ;;  %v3443_v9 = vld [vmem:[#allocation9 + $0xaf8] sm:$0xff] }
 0x6f3   : > { %4886 = vmatpush.msra.mxu0 %v3291_v51  ;;  %4753 = vmatpush.msrb.mxu3 %v3234_v6  ;;  %v3562_v35 = vld [vmem:[#allocation9 + $0xeb0] sm:$0xff] }
 0x6f4   : > { %4694 = vmatpush.msra.mxu2 %v3737_v41  ;;  %4734 = vmatpush.msra.mxu1 %v3098_v8  ;;  %v3690_v26 = vld [vmem:[#allocation9 + $0x12b0] sm:$0xff]  ;;  %v3827_v41 = vld [vmem:[#allocation9 + $0x16f8] sm:$0xff] }
 0x6f5   : > { %4887 = vmatpush.msra.mxu0 %v3283_v32  ;;  %4754 = vmatpush.msrb.mxu3 %v3226_v39  ;;  %v3818_v62 = vld [vmem:[#allocation9 + $0x16b0] sm:$0xff]  ;;  %v4377_v32 = vadd.f32 %v4376_v15, %v4357_v23  ;;  %v3179_v23 = vld [vmem:[#allocation9 + $0x2b8] sm:$0xff] }
 0x6f6   : > { %4695 = vmatmul.f32.vlgmr.msra.gmra.mxu2 %v8197_v22  ;;  %4735 = vmatmul.f32.vlgmr.msra.gmra.mxu1 %v8172_v28  ;;  %v3554_v17 = vld [vmem:[#allocation9 + $0xe70] sm:$0xff]  ;;  %v3739_v15 = vld [vmem:[#allocation9 + $0x1438] sm:$0xff] }
 0x6f7   : > { %4755 = vmatmul.f32.vlgmr.msrb.gmra.mxu3 %v8187_v4  ;;  %4779 = vmatpush.msrb.mxu2 %v3602_v27  ;;  %v3682_v14 = vld [vmem:[#allocation9 + $0x1270] sm:$0xff] }
 0x6f8   : > { %4799 = vmatpush.msrb.mxu1 %v3730_v5  ;;  %4819 = vmatpush.msra.mxu3 %v3858_v45  ;;  %v3810_v48 = vld [vmem:[#allocation9 + $0x1670] sm:$0xff]  ;;  %v3819_v45 = vld [vmem:[#allocation9 + $0x16b8] sm:$0xff] }
 0x6f9   : > { %4888 = vmatpush.msra.mxu0 %v3275_v38  ;;  %4780 = vmatpush.msrb.mxu2 %v3594_v63  ;;  %v3546_v49 = vld [vmem:[#allocation9 + $0xe30] sm:$0xff] }
 0x6fa   : > { %4800 = vmatpush.msrb.mxu1 %v3722_v58  ;;  %4820 = vmatpush.msra.mxu3 %v3850_v61  ;;  %v3674_v36 = vld [vmem:[#allocation9 + $0x1230] sm:$0xff]  ;;  %v4416_v58 = vpop.f32.mrf.mxu0 }
 0x6fb   : > { %4889 = vmatpush.msra.mxu0 %v3267_v1  ;;  %4781 = vmatpush.msrb.mxu2 %v3586_v13  ;;  %v3802_v16 = vld [vmem:[#allocation9 + $0x1630] sm:$0xff]  ;;  %v3811_v13 = vld [vmem:[#allocation9 + $0x1678] sm:$0xff] }
 0x6fc   : > { %4801 = vmatpush.msrb.mxu1 %v3714_v37  ;;  %4821 = vmatpush.msra.mxu3 %v3842_v47  ;;  %v3538_v56 = vld [vmem:[#allocation9 + $0xdf0] sm:$0xff] }
 0x6fd   : > { %4890 = vmatpush.msra.mxu0 %v3259_v3  ;;  %4782 = vmatpush.msrb.mxu2 %v3578_v43  ;;  %v3666_v7 = vld [vmem:[#allocation9 + $0x11f0] sm:$0xff]  ;;  %v4436_v3 = vpop.f32.mrf.mxu1 }
 0x6fe   : > { %4802 = vmatpush.msrb.mxu1 %v3706_v57  ;;  %4822 = vmatpush.msra.mxu3 %v3834_v11  ;;  %v3794_v46 = vld [vmem:[#allocation9 + $0x15f0] sm:$0xff]  ;;  %v3803_v11 = vld [vmem:[#allocation9 + $0x1638] sm:$0xff] }
 0x6ff   : > { %4891 = vmatpush.msra.mxu0 %v3251_v25  ;;  %4783 = vmatpush.msrb.mxu2 %v3570_v10  ;;  %v3530_v0 = vld [vmem:[#allocation9 + $0xdb0] sm:$0xff] }
 0x700   : > { %4803 = vmatpush.msrb.mxu1 %v3698_v12  ;;  %4823 = vmatpush.msra.mxu3 %v3826_v60  ;;  %v3658_v29 = vld [vmem:[#allocation9 + $0x11b0] sm:$0xff] }
 0x701   : > { %4892 = vmatpush.msra.mxu0 %v3243_v2  ;;  %4784 = vmatpush.msrb.mxu2 %v3562_v35  ;;  %v3786_v54 = vld [vmem:[#allocation9 + $0x15b0] sm:$0xff]  ;;  %v3795_v35 = vld [vmem:[#allocation9 + $0x15f8] sm:$0xff] }
 0x702   : > { %4804 = vmatpush.msrb.mxu1 %v3690_v26  ;;  %4824 = vmatpush.msra.mxu3 %v3818_v62  ;;  %v3522_v19 = vld [vmem:[#allocation9 + $0xd70] sm:$0xff]  ;;  %v3219_v62 = vld [vmem:[#allocation9 + $0x3f8] sm:$0xff] }
 0x703   : > { %4893 = vmatpush.msra.mxu0 %v3235_v18  ;;  %4785 = vmatpush.msrb.mxu2 %v3554_v17  ;;  %v3650_v21 = vld [vmem:[#allocation9 + $0x1170] sm:$0xff]  ;;  %v3475_v18 = vld [vmem:[#allocation9 + $0xbf8] sm:$0xff] }
 0x704   : > { %4805 = vmatpush.msrb.mxu1 %v3682_v14  ;;  %4825 = vmatpush.msra.mxu3 %v3810_v48  ;;  %v3778_v51 = vld [vmem:[#allocation9 + $0x1570] sm:$0xff]  ;;  %v3603_v17 = vld [vmem:[#allocation9 + $0xff8] sm:$0xff] }
 0x705   : > { %4894 = vmatpush.msra.mxu0 %v3227_v59  ;;  %4786 = vmatpush.msrb.mxu2 %v3546_v49  ;;  %v3514_v55 = vld [vmem:[#allocation9 + $0xd30] sm:$0xff]  ;;  %v3211_v14 = vld [vmem:[#allocation9 + $0x3b8] sm:$0xff] }
 0x706   : > { %4895 = vmatmul.f32.vlgmr.msra.gmra.mxu0 %v8187_v4  ;;  %4806 = vmatpush.msrb.mxu1 %v3674_v36  ;;  %v3835_v4 = vld [vmem:[#allocation9 + $0x1738] sm:$0xff]  ;;  %v3642_v6 = vld [vmem:[#allocation9 + $0x1130] sm:$0xff] }
 0x707   : > { %4959 = vmatpush.msrb.mxu0 %v3859_v44  ;;  %4826 = vmatpush.msra.mxu3 %v3802_v16  ;;  %v3770_v8 = vld [vmem:[#allocation9 + $0x1530] sm:$0xff]  ;;  %v3467_v48 = vld [vmem:[#allocation9 + $0xbb8] sm:$0xff] }
 0x708   : > { %4787 = vmatpush.msrb.mxu2 %v3538_v56  ;;  %4807 = vmatpush.msrb.mxu1 %v3666_v7  ;;  %v3506_v39 = vld [vmem:[#allocation9 + $0xcf0] sm:$0xff]  ;;  %v3595_v59 = vld [vmem:[#allocation9 + $0xfb8] sm:$0xff] }
 0x709   : > { %4960 = vmatpush.msrb.mxu0 %v3851_v52  ;;  %4827 = vmatpush.msra.mxu3 %v3794_v46  ;;  %v3634_v27 = vld [vmem:[#allocation9 + $0x10f0] sm:$0xff]  ;;  %v3779_v49 = vld [vmem:[#allocation9 + $0x1578] sm:$0xff] }
 0x70a   : > { %4788 = vmatpush.msrb.mxu2 %v3530_v0  ;;  %4808 = vmatpush.msrb.mxu1 %v3658_v29  ;;  %v3762_v38 = vld [vmem:[#allocation9 + $0x14f0] sm:$0xff]  ;;  %v3459_v36 = vld [vmem:[#allocation9 + $0xb78] sm:$0xff] }
 0x70b   : > { %4961 = vmatpush.msrb.mxu0 %v3843_v42  ;;  %4828 = vmatpush.msra.mxu3 %v3786_v54  ;;  %v3498_v61 = vld [vmem:[#allocation9 + $0xcb0] sm:$0xff]  ;;  %v3771_v44 = vld [vmem:[#allocation9 + $0x1538] sm:$0xff] }
 0x70c   : > { %4789 = vmatpush.msrb.mxu2 %v3522_v19  ;;  %4809 = vmatpush.msrb.mxu1 %v3650_v21  ;;  %v3626_v1 = vld [vmem:[#allocation9 + $0x10b0] sm:$0xff]  ;;  %v3195_v16 = vld [vmem:[#allocation9 + $0x338] sm:$0xff] }
 0x70d   : > { %4962 = vmatpush.msrb.mxu0 %v3835_v4  ;;  %4829 = vmatpush.msra.mxu3 %v3778_v51  ;;  %v4396_v5 = vpop.f32.mrf.mxu2  ;;  %v3754_v37 = vld [vmem:[#allocation9 + $0x14b0] sm:$0xff]  ;;  %v3451_v56 = vld [vmem:[#allocation9 + $0xb38] sm:$0xff] }
 0x70e   : > { %4790 = vmatpush.msrb.mxu2 %v3514_v55  ;;  %4810 = vmatpush.msrb.mxu1 %v3642_v6  ;;  %v4397_v63 = vadd.f32 %v4396_v5, %v4377_v32  ;;  %v3490_v43 = vld [vmem:[#allocation9 + $0xc70] sm:$0xff]  ;;  %v3579_v7 = vld [vmem:[#allocation9 + $0xf38] sm:$0xff] }
 0x70f   : > { %4963 = vmatpush.msrb.mxu0 %v3827_v41  ;;  %4830 = vmatpush.msra.mxu3 %v3770_v8  ;;  %v3618_v57 = vld [vmem:[#allocation9 + $0x1070] sm:$0xff]  ;;  %v3763_v52 = vld [vmem:[#allocation9 + $0x14f8] sm:$0xff] }
 0x710   : > { %4791 = vmatpush.msrb.mxu2 %v3506_v39  ;;  %4811 = vmatpush.msrb.mxu1 %v3634_v27  ;;  %v4417_v47 = vadd.f32 %v4416_v58, %v4397_v63  ;;  %v3746_v25 = vld [vmem:[#allocation9 + $0x1470] sm:$0xff]  ;;  %v3187_v46 = vld [vmem:[#allocation9 + $0x2f8] sm:$0xff]  ;;  %v4456_v63 = vpop.f32.mrf.mxu3 }
 0x711   : > { %4964 = vmatpush.msrb.mxu0 %v3819_v45  ;;  %4831 = vmatpush.msra.mxu3 %v3762_v38  ;;  %v3482_v12 = vld [vmem:[#allocation9 + $0xc30] sm:$0xff]  ;;  %v3571_v0 = vld [vmem:[#allocation9 + $0xef8] sm:$0xff] }
 0x712   : > { %4792 = vmatpush.msrb.mxu2 %v3498_v61  ;;  %4812 = vmatpush.msrb.mxu1 %v3626_v1  ;;  %v4437_v10 = vadd.f32 %v4436_v3, %v4417_v47  ;;  %v3610_v60 = vld [vmem:[#allocation9 + $0x1030] sm:$0xff]  ;;  %v3755_v29 = vld [vmem:[#allocation9 + $0x14b8] sm:$0xff] }
 0x713   : > { %4965 = vmatpush.msrb.mxu0 %v3811_v13  ;;  %4832 = vmatpush.msra.mxu3 %v3754_v37  ;;  %v8255_v2 = vld [vmem:[#allocation1 + $0x2] ss:$9 sm:$0xff]  ;;  %v4476_v13 = vpop.f32.mrf.mxu1 }
 0x714   : > { %4793 = vmatpush.msrb.mxu2 %v3490_v43  ;;  %4813 = vmatpush.msrb.mxu1 %v3618_v57  ;;  %v3738_v26 = vld [vmem:[#allocation9 + $0x1430] sm:$0xff]  ;;  %5014 = vst [vmem:[#allocation1] sm:$0xff] %v4437_v10  ;;  %v3435_v42 = vld [vmem:[#allocation9 + $0xab8] sm:$0xff]  ;;  %v4477_v37 = vadd.f32 %v4476_v13, %v4456_v63 }
 0x715   : > { %4966 = vmatpush.msrb.mxu0 %v3803_v11  ;;  %4833 = vmatpush.msra.mxu3 %v3746_v25  ;;  %v3563_v54 = vld [vmem:[#allocation9 + $0xeb8] sm:$0xff] }
 0x716   : > { %4794 = vmatpush.msrb.mxu2 %v3482_v12  ;;  %4814 = vmatpush.msrb.mxu1 %v3610_v60  ;;  %v3747_v19 = vld [vmem:[#allocation9 + $0x1478] sm:$0xff]  ;;  %v4516_v12 = vpop.f32.mrf.mxu0 }
 0x717   : > { %4967 = vmatpush.msrb.mxu0 %v3795_v35  ;;  %4834 = vmatpush.msra.mxu3 %v3738_v26  ;;  %v3171_v21 = vld [vmem:[#allocation9 + $0x278] sm:$0xff] }
 0x718   : > { %4795 = vmatmul.f32.vlgmr.msrb.gmra.mxu2 %v8184_v34  ;;  %4815 = vmatmul.f32.vlgmr.msrb.gmra.mxu1 %v8177_v20  ;;  %v3427_v4 = vld [vmem:[#allocation9 + $0xa78] sm:$0xff] }
 0x719   : > { %4835 = vmatmul.f32.vlgmr.msra.gmra.mxu3 %v8197_v22  ;;  %4859 = vmatpush.msra.mxu2 %v3219_v62  ;;  %v3555_v51 = vld [vmem:[#allocation9 + $0xe78] sm:$0xff] }
 0x71a   : > { %4899 = vmatpush.msra.mxu1 %v3475_v18  ;;  %4919 = vmatpush.msrb.mxu3 %v3603_v17  ;;  %v3163_v55 = vld [vmem:[#allocation9 + $0x238] sm:$0xff] }
 0x71b   : > { %4968 = vmatpush.msrb.mxu0 %v3787_v33  ;;  %4860 = vmatpush.msra.mxu2 %v3211_v14  ;;  %v3419_v6 = vld [vmem:[#allocation9 + $0xa38] sm:$0xff] }
 0x71c   : > { %4900 = vmatpush.msra.mxu1 %v3467_v48  ;;  %4920 = vmatpush.msrb.mxu3 %v3595_v59  ;;  %v3547_v32 = vld [vmem:[#allocation9 + $0xe38] sm:$0xff] }
 0x71d   : > { %4969 = vmatpush.msrb.mxu0 %v3779_v49  ;;  %4861 = vmatpush.msra.mxu2 %v3203_v40  ;;  %v3155_v41 = vld [vmem:[#allocation9 + $0x1f8] sm:$0xff] }
 0x71e   : > { %4901 = vmatpush.msra.mxu1 %v3459_v36  ;;  %4921 = vmatpush.msrb.mxu3 %v3587_v24  ;;  %v3411_v8 = vld [vmem:[#allocation9 + $0x9f8] sm:$0xff] }
 0x71f   : > { %4970 = vmatpush.msrb.mxu0 %v3771_v44  ;;  %4862 = vmatpush.msra.mxu2 %v3195_v16  ;;  %v3539_v39 = vld [vmem:[#allocation9 + $0xdf8] sm:$0xff] }
 0x720   : > { %4902 = vmatpush.msra.mxu1 %v3451_v56  ;;  %4922 = vmatpush.msrb.mxu3 %v3579_v7  ;;  %v3147_v27 = vld [vmem:[#allocation9 + $0x1b8] sm:$0xff] }
 0x721   : > { %4971 = vmatpush.msrb.mxu0 %v3763_v52  ;;  %4863 = vmatpush.msra.mxu2 %v3187_v46  ;;  %v3403_v5 = vld [vmem:[#allocation9 + $0x9b8] sm:$0xff] }
 0x722   : > { %4903 = vmatpush.msra.mxu1 %v3443_v9  ;;  %4923 = vmatpush.msrb.mxu3 %v3571_v0  ;;  %v3531_v45 = vld [vmem:[#allocation9 + $0xdb8] sm:$0xff] }
 0x723   : > { %4972 = vmatpush.msrb.mxu0 %v3755_v29  ;;  %4864 = vmatpush.msra.mxu2 %v3179_v23  ;;  %v3139_v38 = vld [vmem:[#allocation9 + $0x178] sm:$0xff] }
 0x724   : > { %4904 = vmatpush.msra.mxu1 %v3435_v42  ;;  %4924 = vmatpush.msrb.mxu3 %v3563_v54  ;;  %v3395_v58 = vld [vmem:[#allocation9 + $0x978] sm:$0xff] }
 0x725   : > { %4973 = vmatpush.msrb.mxu0 %v3747_v19  ;;  %4865 = vmatpush.msra.mxu2 %v3171_v21  ;;  %v3523_v61 = vld [vmem:[#allocation9 + $0xd78] sm:$0xff] }
 0x726   : > { %4905 = vmatpush.msra.mxu1 %v3427_v4  ;;  %4925 = vmatpush.msrb.mxu3 %v3555_v51  ;;  %v3131_v1 = vld [vmem:[#allocation9 + $0x138] sm:$0xff] }
 0x727   : > { %4974 = vmatpush.msrb.mxu0 %v3739_v15  ;;  %4866 = vmatpush.msra.mxu2 %v3163_v55  ;;  %v3515_v47 = vld [vmem:[#allocation9 + $0xd38] sm:$0xff]  ;;  %v4596_v55 = vpop.f32.mrf.mxu0 }
 0x728   : > { %4975 = vmatmul.f32.vlgmr.msrb.gmra.mxu0 %v8197_v22  ;;  %4906 = vmatpush.msra.mxu1 %v3419_v6  ;;  %v3387_v22 = vld [vmem:[#allocation9 + $0x938] sm:$0xff] }
 0x729   : > { %4926 = vmatpush.msrb.mxu3 %v3547_v32  ;;  %4867 = vmatpush.msra.mxu2 %v3155_v41  ;;  %v3123_v3 = vld [vmem:[#allocation9 + $0xf8] sm:$0xff] }
 0x72a   : > { %4907 = vmatpush.msra.mxu1 %v3411_v8  ;;  %v3379_v43 = vld [vmem:[#allocation9 + $0x8f8] sm:$0xff] }
 0x72b   : > { %4927 = vmatpush.msrb.mxu3 %v3539_v39  ;;  %4868 = vmatpush.msra.mxu2 %v3147_v27  ;;  %v3507_v11 = vld [vmem:[#allocation9 + $0xcf8] sm:$0xff] }
 0x72c   : > { %4908 = vmatpush.msra.mxu1 %v3403_v5  ;;  %v3115_v25 = vld [vmem:[#allocation9 + $0xb8] sm:$0xff] }
 0x72d   : > { %4928 = vmatpush.msrb.mxu3 %v3531_v45  ;;  %4869 = vmatpush.msra.mxu2 %v3139_v38  ;;  %v3371_v60 = vld [vmem:[#allocation9 + $0x8b8] sm:$0xff] }
 0x72e   : > { %4909 = vmatpush.msra.mxu1 %v3395_v58  ;;  %v3499_v35 = vld [vmem:[#allocation9 + $0xcb8] sm:$0xff]  ;;  %v4556_v40 = vpop.f32.mrf.mxu1 }
 0x72f   : > { %4929 = vmatpush.msrb.mxu3 %v3523_v61  ;;  %4870 = vmatpush.msra.mxu2 %v3131_v1  ;;  %v4496_v57 = vpop.f32.mrf.mxu2  ;;  %v3107_v26 = vld [vmem:[#allocation9 + $0x78] sm:$0xff] }
 0x730   : > { %4910 = vmatpush.msra.mxu1 %v3387_v22  ;;  %v4497_v10 = vadd.f32 %v4496_v57, %v4477_v37  ;;  %v3363_v18 = vld [vmem:[#allocation9 + $0x878] sm:$0xff]  ;;  %v4536_v17 = vpop.f32.mrf.mxu3 }
 0x731   : > { %4930 = vmatpush.msrb.mxu3 %v3515_v47  ;;  %4871 = vmatpush.msra.mxu2 %v3123_v3  ;;  %v3491_v33 = vld [vmem:[#allocation9 + $0xc78] sm:$0xff] }
 0x732   : > { %4911 = vmatpush.msra.mxu1 %v3379_v43  ;;  %v4517_v62 = vadd.f32 %v4516_v12, %v4497_v10  ;;  %v3099_v14 = vld [vmem:[#allocation9 + $0x38] sm:$0xff] }
 0x733   : > { %4931 = vmatpush.msrb.mxu3 %v3507_v11  ;;  %4872 = vmatpush.msra.mxu2 %v3115_v25  ;;  %v3355_v59 = vld [vmem:[#allocation9 + $0x838] sm:$0xff] }
 0x734   : > { %4912 = vmatpush.msra.mxu1 %v3371_v60  ;;  %v4537_v48 = vadd.f32 %v4536_v17, %v4517_v62  ;;  %v3483_v49 = vld [vmem:[#allocation9 + $0xc38] sm:$0xff] }
 0x735   : > { %4932 = vmatpush.msrb.mxu3 %v3499_v35  ;;  %4873 = vmatpush.msra.mxu2 %v3107_v26  ;;  %v3731_v36 = vld [vmem:[#allocation9 + $0x13f8] sm:$0xff]  ;;  %v5056_v26 = vld [vmem:[#allocation12 + $0x68] sm:$0xff] }
 0x736   : > { %4913 = vmatpush.msra.mxu1 %v3363_v18  ;;  %v4557_v24 = vadd.f32 %v4556_v40, %v4537_v48  ;;  %v3875_v44 = vld [vmem:[#allocation9 + $0x1878] sm:$0xff]  ;;  %v5055_v18 = vld [vmem:[#allocation12 + $0x60] sm:$0xff]  ;;  %v5048_v40 = vld [vmem:[#allocation12 + $0x28] sm:$0xff] }
 0x737   : > { %4933 = vmatpush.msrb.mxu3 %v3491_v33  ;;  %4874 = vmatpush.msra.mxu2 %v3099_v14  ;;  %v3723_v16 = vld [vmem:[#allocation9 + $0x13b8] sm:$0xff]  ;;  %v5052_v14 = vld [vmem:[#allocation12 + $0x48] sm:$0xff]  ;;  %v5051_v48 = vld [vmem:[#allocation12 + $0x40] sm:$0xff] }
 0x738   : > { %4914 = vmatpush.msra.mxu1 %v3355_v59  ;;  %4875 = vmatmul.f32.vlgmr.msra.gmra.mxu2 %v8172_v28  ;;  %v3867_v56 = vld [vmem:[#allocation9 + $0x1838] sm:$0xff] }
 0x739   : > { %4934 = vmatpush.msrb.mxu3 %v3483_v49  ;;  %4915 = vmatmul.f32.vlgmr.msra.gmra.mxu1 %v8190_v31  ;;  %v3715_v52 = vld [vmem:[#allocation9 + $0x1378] sm:$0xff] }
 0x73a   : > { %4935 = vmatmul.f32.vlgmr.msrb.gmra.mxu3 %v8184_v34  ;;  %4939 = vmatpush.msrb.mxu2 %v3731_v36  ;;  %v4576_v7 = vpop.f32.mrf.mxu2  ;;  %v8264_v9 = vld [vmem:[#allocation1 + $0x3] ss:$9 sm:$0xff]  ;;  %v4676_v27 = vpop.f32.mrf.mxu0 }
 0x73b   : > { %4993 = vmatpush.msrb.mxu1 %v3875_v44  ;;  %v4577_v46 = vadd.f32 %v4576_v7, %v4557_v24  ;;  %v3707_v0 = vld [vmem:[#allocation9 + $0x1338] sm:$0xff]  ;;  %v5047_v36 = vld [vmem:[#allocation12 + $0x20] sm:$0xff] }
 0x73c   : > { %4940 = vmatpush.msrb.mxu2 %v3723_v16  ;;  %v3699_v28 = vld [vmem:[#allocation9 + $0x12f8] sm:$0xff]  ;;  %v5044_v16 = vld [vmem:[#allocation12 + $0x8] sm:$0xff] }
 0x73d   : > { %4994 = vmatpush.msrb.mxu1 %v3867_v56  ;;  %5020 = vst [vmem:[#allocation1] sm:$0xff] %v4577_v46  ;;  %v3691_v31 = vld [vmem:[#allocation9 + $0x12b8] sm:$0xff]  ;;  %v5043_v56 = vld [vmem:[#allocation12] sm:$0xff] }
 0x73e   : > { %4941 = vmatpush.msrb.mxu2 %v3715_v52  ;;  %v3683_v34 = vld [vmem:[#allocation9 + $0x1278] sm:$0xff] }
 0x73f   : > { %v3675_v29 = vld [vmem:[#allocation9 + $0x1238] sm:$0xff] }
 0x740   : > { %4942 = vmatpush.msrb.mxu2 %v3707_v0  ;;  %v3667_v23 = vld [vmem:[#allocation9 + $0x11f8] sm:$0xff] }
 0x741   : > { %5261 = vmatmul.msk.f32.vlgmr.msrb.gmra.mxu1 %vm2276_vm1, %v8200_v50  ;;  %v3659_v42 = vld [vmem:[#allocation9 + $0x11b8] sm:$0xff] }
 0x742   : > { %4943 = vmatpush.msrb.mxu2 %v3699_v28  ;;  %v3651_v54 = vld [vmem:[#allocation9 + $0x1178] sm:$0xff] }
 0x743   : > { %v3643_v19 = vld [vmem:[#allocation9 + $0x1138] sm:$0xff] }
 0x744   : > { %4944 = vmatpush.msrb.mxu2 %v3691_v31  ;;  %v3635_v21 = vld [vmem:[#allocation9 + $0x10f8] sm:$0xff]  ;;  %v4999_v31 = vld [vmem:[#allocation10] sm:$0x1] }
 0x745   : > { %v3627_v4 = vld [vmem:[#allocation9 + $0x10b8] sm:$0xff] }
 0x746   : > { %4945 = vmatpush.msrb.mxu2 %v3683_v34  ;;  %v3619_v51 = vld [vmem:[#allocation9 + $0x1078] sm:$0xff] }
 0x747   : > { %v3611_v50 = vld [vmem:[#allocation9 + $0x1038] sm:$0xff] }
 0x748   : > { %4946 = vmatpush.msrb.mxu2 %v3675_v29  ;;  %v8269_v61 = vld [vmem:[#allocation1 + $0x4] ss:$9 sm:$0xff] }
 0x749   : > { %v5058_v10 = vld [vmem:[#allocation12 + $0x78] sm:$0xff]  ;;  %v5057_v12 = vld [vmem:[#allocation12 + $0x70] sm:$0xff] }
 0x74a   : > { %4947 = vmatpush.msrb.mxu2 %v3667_v23  ;;  %5060 = vmatpush.msra.mxu3 %v5058_v10  ;;  %v5054_v17 = vld [vmem:[#allocation12 + $0x58] sm:$0xff]  ;;  %v5053_v33 = vld [vmem:[#allocation12 + $0x50] sm:$0xff] }
 0x74b   : > { %v5050_v59 = vld [vmem:[#allocation12 + $0x38] sm:$0xff]  ;;  %v5049_v49 = vld [vmem:[#allocation12 + $0x30] sm:$0xff] }
 0x74c   : > { %4948 = vmatpush.msrb.mxu2 %v3659_v42  ;;  %5061 = vmatpush.msra.mxu3 %v5057_v12  ;;  %v5046_v24 = vld [vmem:[#allocation12 + $0x18] sm:$0xff]  ;;  %v5045_v44 = vld [vmem:[#allocation12 + $0x10] sm:$0xff]  ;;  %v5000_v42 = vadd.f32 %v4999_v31, %v8226_v30 }
 0x74e   : > { %4949 = vmatpush.msrb.mxu2 %v3651_v54  ;;  %5062 = vmatpush.msra.mxu3 %v5056_v26 }
 0x750   : > { %4950 = vmatpush.msrb.mxu2 %v3643_v19  ;;  %5063 = vmatpush.msra.mxu3 %v5055_v18 }
 0x751   : > { %v4656_v8 = vpop.f32.mrf.mxu1 }
 0x752   : > { %4951 = vmatpush.msrb.mxu2 %v3635_v21  ;;  %v4636_v32 = vpop.f32.mrf.mxu3  ;;  %5064 = vmatpush.msra.mxu3 %v5054_v17 }
 0x754   : > { %4952 = vmatpush.msrb.mxu2 %v3627_v4  ;;  %5065 = vmatpush.msra.mxu3 %v5053_v33  ;;  %v5006_v4 = vadd.f32 %v8242_v53, %v5000_v42  ;;  %v5059_v53 = vld [vmem:[#allocation13] sm:$0x1] }
 0x756   : > { %4953 = vmatpush.msrb.mxu2 %v3619_v51  ;;  %v4616_v15 = vpop.f32.mrf.mxu2  ;;  %5066 = vmatpush.msra.mxu3 %v5052_v14 }
 0x757   : > { %v4617_v6 = vadd.f32 %v4616_v15, %v4596_v55  ;;  %v5012_v15 = vadd.f32 %v8255_v2, %v5006_v4 }
 0x758   : > { %4954 = vmatpush.msrb.mxu2 %v3611_v50  ;;  %5067 = vmatpush.msra.mxu3 %v5051_v48 }
 0x759   : > { %4955 = vmatmul.f32.vlgmr.msrb.gmra.mxu2 %v8177_v20  ;;  %v4637_v41 = vadd.f32 %v4636_v32, %v4617_v6  ;;  %v5018_v6 = vadd.f32 %v8264_v9, %v5012_v15 }
 0x75a   : > { %5068 = vmatpush.msra.mxu3 %v5050_v59 }
 0x75b   : > { %v4657_v39 = vadd.f32 %v4656_v8, %v4637_v41  ;;  %v5024_v32 = vadd.f32 %v8269_v61, %v5018_v6 }
 0x75c   : > { %5069 = vmatpush.msra.mxu3 %v5049_v49 }
 0x75d   : > { %v4677_v5 = vadd.f32 %v4676_v27, %v4657_v39  ;;  %v4716_v63 = vpop.f32.mrf.mxu3  ;;  %v4776_v20 = vpop.f32.mrf.mxu0 }
 0x75e   : > { %5070 = vmatpush.msra.mxu3 %v5048_v40 }
 0x760   : > { %5071 = vmatpush.msra.mxu3 %v5047_v36 }
 0x762   : > { %5072 = vmatpush.msra.mxu3 %v5046_v24 }
 0x764   : > { %5073 = vmatpush.msra.mxu3 %v5045_v44 }
 0x766   : > { %5074 = vmatpush.msra.mxu3 %v5044_v16 }
 0x767   : > { %v4856_v60 = vpop.f32.mrf.mxu0 }
 0x768   : > { %5075 = vmatpush.msra.mxu3 %v5043_v56 }
 0x773   : > { %v4736_v13 = vpop.f32.mrf.mxu1 }
 0x779   : > { %v4696_v45 = vpop.f32.mrf.mxu2 }
 0x77a   : > { %v4697_v38 = vadd.f32 %v4696_v45, %v4677_v5  ;;  %v4756_v1 = vpop.f32.mrf.mxu3 }
 0x77b   : > { %v4757_v22 = vadd.f32 %v4756_v1, %v4736_v13 }
 0x77c   : > { %v4717_v58 = vadd.f32 %v4716_v63, %v4697_v38 }
 0x77d   : > { %v4777_v37 = vadd.f32 %v4776_v20, %v4757_v22 }
 0x77e   : > { %5026 = vst [vmem:[#allocation1] sm:$0xff] %v4717_v58 }
 0x783   : > { %v4896_v52 = vpop.f32.mrf.mxu0 }
 0x785   : > { %v5028_v62 = vld [vmem:[#allocation1 + $0x5] ss:$9 sm:$0xff] }
 0x786   : > { %v5030_v41 = vadd.f32 %v5028_v62, %v5024_v32 }
 0x795   : > { %v4816_v43 = vpop.f32.mrf.mxu1 }
 0x79b   : > { %v4796_v47 = vpop.f32.mrf.mxu2 }
 0x79c   : > { %v4797_v3 = vadd.f32 %v4796_v47, %v4777_v37  ;;  %v4836_v11 = vpop.f32.mrf.mxu3 }
 0x79e   : > { %v4817_v57 = vadd.f32 %v4816_v43, %v4797_v3 }
 0x7a0   : > { %v4837_v25 = vadd.f32 %v4836_v11, %v4817_v57 }
 0x7a2   : > { %v4857_v35 = vadd.f32 %v4856_v60, %v4837_v25 }
 0x7a4   : > { %5032 = vst [vmem:[#allocation1] sm:$0xff] %v4857_v35 }
 0x7a5   : > { %v4976_v19 = vpop.f32.mrf.mxu0 }
 0x7ab   : > { %v5034_v55 = vld [vmem:[#allocation1 + $0x6] ss:$9 sm:$0xff] }
 0x7ac   : > { %v5036_v8 = vadd.f32 %v5034_v55, %v5030_v41 }
 0x7b6   : > { %v4916_v0 = vpop.f32.mrf.mxu1 }
 0x7bb   : > { %v4876_v7 = vpop.f32.mrf.mxu2 }
 0x7bc   : > { %v4897_v46 = vadd.f32 %v4896_v52, %v4876_v7 }
 0x7bd   : > { %v4936_v34 = vpop.f32.mrf.mxu3 }
 0x7be   : > { %v4917_v28 = vadd.f32 %v4916_v0, %v4897_v46  ;;  %v4996_v51 = vpop.f32.mrf.mxu1 }
 0x7c0   : > { %v4937_v29 = vadd.f32 %v4936_v34, %v4917_v28 }
 0x7dc   : > { %v4956_v23 = vpop.f32.mrf.mxu2 }
 0x7dd   : > { %v4957_v54 = vadd.f32 %v4956_v23, %v4937_v29 }
 0x7df   : > { %v4977_v21 = vadd.f32 %v4976_v19, %v4957_v54 }
 0x7e1   : > { %v4997_v50 = vadd.f32 %v4996_v51, %v4977_v21 }
 0x7e3   : > { %5038 = vst [vmem:[#allocation1] sm:$0xff] %v4997_v50 }
 0x7ea   : > { %v5040_v30 = vld [vmem:[#allocation1 + $0x7] ss:$9 sm:$0xff] }
 0x7eb   : > { %v5042_v39 = vadd.f32 %v5040_v30, %v5036_v8 }
 0x7ed   : > { %5076 = vmatmul.f32.vlgmr.msra.gmra.mxu3 %v5042_v39 }
 0x870   : > { %v5077_v2 = vpop.f32.mrf.mxu3 }
 0x871   : > { %v5078_v9 = vadd.f32 %v5077_v2, %v5059_v53 }
 0x873   : > { %5080 = vst [vmem:[%s418_s25] sm:$0x1] %v5078_v9 }
 0x874   : > { %5762 = shalt.err (!%p5759_p8)
}
 0x875   : > { %5288 = dma.vmem_to_hbm [thread:$0]  (%p5944_p5), %s5093_s26, 16, %s5095_s29, %s5082_s3  }
 0x876 PF: > { %p5325_p9 = scmp.ge.s32.totalorder %s5813_s12, 2  ;;  %s5106_s17 = sand.u32 1, %s5801_s30  }
 0x877   : > { %s5107_s14 = scalar_lea.sflag [#allocation6], %s5106_s17 }
 0x878   : > { %p5310_p10 = pnand %p5325_p9, %p5948_p6 }
 0x87a   : > { %p5311_p11 = pneg %p5310_p10 }
 0x87c   : > { %5796 = dma.done.wait (%p5311_p11), %s5107_s14, 16  }
 0x87d   : > { %5798 = vsyncadd (%p5311_p11), %s5107_s14, 4294967280  ;;  %s8712_s12 = sld [smem:[#allocation22_spill]]  ;;  %s8715_s30 = smov %s5805_s10 }
 0x87e   : > { %s8713_s22 = sld [smem:[#allocation21_spill]] }
 0x87f   : > { %s8714_s11 = sld [smem:[#allocation23_spill]] }
 0x883   : > { %p23_p12 = scmp.ge.s32.totalorder %s8712_s12, 4  }
 0x884   : > { %s8716_s10 = smov %s8713_s22 }
 0x885   :  { %25 = sbr.rel (!%p23_p12) target bundleno = 11 (0xb), region = 126 }
 0x88a   :  { %5112 = vsyncpa [#allocation5], 1 }
 0x88b   :  { %5114 = vsyncpa [#allocation5 + $0x1], 1 }
 0x88c   :  { %5115 = vsyncpa [#allocation8], 1 }
 0x88d   :  { %5116 = vsyncpa [#allocation11], 1 }
 0x88e   :  { %5117 = vsyncpa [#allocation14], 1 }
 0x88f   :  { %5118 = vsyncpa [#allocation6], 1 }
 0x890   :  { %5120 = vsyncpa [#allocation6 + $0x1], 1 }

</bundles_post_ra>
